<compile_context>
chip_gen: v5e
topology: v5e:2x2
jax: 0.10.0
libtpu: 0.0.40
codegen_flags: <defaults>
</compile_context>

<pallas_src>
import functools

import jax
import jax.numpy as jnp
import numpy as np
from jax.experimental import pallas as pl
from jax.experimental.pallas import tpu as pltpu

_COMPUTE_DTYPE = jnp.bfloat16   # MXU operand / streamed-tensor dtype


# --------------------------------------------------------------------------
# Hardware / sizing helpers (trace-time Python, not traced)
# --------------------------------------------------------------------------

def _round_up(x, m):
    return (x + m - 1) // m * m


def _device_kind():
    try:
        return jax.devices()[0].device_kind.lower()
    except Exception:
        return ""


def _num_tensorcores():
    # v7x packs 2 TensorCores behind one device; v5e/v6e are single-TC, so a
    # "parallel" batch split buys nothing there and just doubles grid steps.
    kind = _device_kind()
    return 2 if ("7" in kind) else 1


def _act_dtype():
    # bf16 EUP (transcendental) path exists on v6e / v7x; keep f32 elsewhere.
    kind = _device_kind()
    if ("v6" in kind) or ("7" in kind):
        return jnp.bfloat16
    return jnp.float32


def _tpu_vmem_bytes():
    try:
        return int(pltpu.get_tpu_info().vmem_capacity_bytes)
    except Exception:
        return 64 << 20   # conservative (v7x per-TC VMEM)


def _choose_batch_block(bp, n_cores):
    """Split padded batch only when there are 2 TensorCores to shard across."""
    if n_cores >= 2 and bp >= 16 and (bp // 2) % 8 == 0:
        return bp // 2
    return bp


def _time_chunk_cap(bb, din_max, hp, vmem_cap):
    """Largest time-chunk cap whose footprint stays well inside VMEM."""
    budget = int(vmem_cap * 0.5)
    fixed = 2 * 2 * (din_max * 4 * hp + hp * 4 * hp)      # dbl-buffered bf16 weights
    fixed += 2 * bb * hp * 4 + 2 * (4 * hp * 4)           # f32 h/c scratch + bias
    per_t = 2 * bb * (din_max * 2 + hp * 2)               # dbl-buffered bf16 x + out
    for cap in (32, 16, 8):
        if fixed + cap * per_t <= budget:
            return cap
    return 8


def _choose_time_chunk(T, cap):
    """Pick a chunk size <= cap minimizing time padding (never falls to 1)."""
    cap = max(int(cap), 8)
    if T <= cap:
        return T
    best_c, best_pad = 8, (-T) % 8
    for c in range(8, cap + 1):
        pad = (-T) % c
        if pad < best_pad or (pad == best_pad and c > best_c):
            best_c, best_pad = c, pad
    return best_c


# --------------------------------------------------------------------------
# Pallas kernel: fused input projection + LSTM recurrence over a time chunk
# --------------------------------------------------------------------------

def _lstm_fused_kernel(x_ref, wih_ref, whh_ref, bias_ref, out_ref,
                       h_scr, c_scr, *, tc, hp, act_dtype):
    """Blocks:
         x_ref    : (tc, bb, din)  bf16   layer input for this time chunk
         wih_ref  : (din, 4*hp)    bf16   W_ih^T (gate- and input-padded), resident
         whh_ref  : (hp, 4*hp)     bf16   W_hh^T (gate-padded), resident
         bias_ref : (1, 4*hp)      f32    b_ih + b_hh (gate-padded)
         out_ref  : (tc, bb, hp)   bf16   hidden states for this chunk
       Scratch: h_scr / c_scr (bb, hp) f32, carried across time chunks."""
    t_chunk = pl.program_id(1)

    @pl.when(t_chunk == 0)
    def _():
        h_scr[...] = jnp.zeros_like(h_scr)
        c_scr[...] = jnp.zeros_like(c_scr)

    wih = wih_ref[...]                    # resident in VMEM across the chunk
    whh = whh_ref[...]
    bb = h_scr.shape[0]
    bias_b = jnp.broadcast_to(bias_ref[...], (bb, 4 * hp))   # hoisted broadcast

    def body(s, carry):
        h_prev, c_prev = carry                                 # f32 (bb, hp)
        # Input projection on the MXU (independent of h -> off the serial path).
        gx = jnp.dot(x_ref[s], wih, preferred_element_type=jnp.float32)
        gh = jnp.dot(h_prev.astype(whh.dtype), whh,
                     preferred_element_type=jnp.float32)
        gates = gx + bias_b + gh                               # f32 (bb, 4*hp)
        ga = gates.astype(act_dtype)
        # lane-aligned gate slices (hp is a multiple of 128); order i, f, g, o
        i = jax.nn.sigmoid(ga[:, 0 * hp:1 * hp]).astype(jnp.float32)
        f = jax.nn.sigmoid(ga[:, 1 * hp:2 * hp]).astype(jnp.float32)
        g = jnp.tanh(ga[:, 2 * hp:3 * hp]).astype(jnp.float32)
        o = jax.nn.sigmoid(ga[:, 3 * hp:4 * hp]).astype(jnp.float32)
        c_new = f * c_prev + i * g                             # f32 state update
        h_new = o * jnp.tanh(c_new)
        out_ref[s] = h_new.astype(out_ref.dtype)               # bf16 store
        return h_new, c_new

    h_fin, c_fin = jax.lax.fori_loop(
        0, tc, body, (h_scr[...], c_scr[...]), unroll=True)
    h_scr[...] = h_fin
    c_scr[...] = c_fin


def _run_lstm_layer(x, wih, whh, bias, *, hp, tc, bb, vmem_cap, act_dtype):
    """x: (T_pad, Bp, din) bf16.  Returns (T_pad, Bp, hp) bf16."""
    T_pad, bp, din = x.shape
    n_b = bp // bb
    n_t = T_pad // tc

    # VMEM budget from actual buffer sizes (double-buffered pipeline inputs).
    x_blk = tc * bb * din * 2
    out_blk = tc * bb * hp * 2
    w_bytes = (din * 4 * hp + hp * 4 * hp) * 2 + 4 * hp * 4
    scratch = 2 * bb * hp * 4
    need = 2 * (x_blk + out_blk + w_bytes) + scratch + (4 << 20)
    hi = max(min(int(vmem_cap) - (16 << 20), 100 << 20), 24 << 20)
    vmem_limit = int(min(max(need, 16 << 20), hi))

    kernel = functools.partial(_lstm_fused_kernel, tc=tc, hp=hp,
                               act_dtype=act_dtype)
    return pl.pallas_call(
        kernel,
        out_shape=jax.ShapeDtypeStruct((T_pad, bp, hp), _COMPUTE_DTYPE),
        grid_spec=pltpu.PrefetchScalarGridSpec(
            num_scalar_prefetch=0,
            grid=(n_b, n_t),
            in_specs=[
                pl.BlockSpec((tc, bb, din), lambda b, t: (t, b, 0)),
                # constant index maps: weights/bias DMA'd once, stay resident
                pl.BlockSpec((din, 4 * hp), lambda b, t: (0, 0)),
                pl.BlockSpec((hp, 4 * hp), lambda b, t: (0, 0)),
                pl.BlockSpec((1, 4 * hp), lambda b, t: (0, 0)),
            ],
            out_specs=pl.BlockSpec((tc, bb, hp), lambda b, t: (t, b, 0)),
            scratch_shapes=[
                pltpu.VMEM((bb, hp), jnp.float32),   # h carry
                pltpu.VMEM((bb, hp), jnp.float32),   # c carry
            ],
        ),
        compiler_params=pltpu.CompilerParams(
            # batch blocks are independent -> parallel (sharded on 2-TC v7x);
            # time must stay "arbitrary" for the h/c scratch carry.
            dimension_semantics=("parallel", "arbitrary"),
            vmem_limit_bytes=vmem_limit,
        ),
    )(x, wih, whh, bias)


# --------------------------------------------------------------------------
# Parameter preparation (done ONCE per model, outside the jitted forward)
# --------------------------------------------------------------------------

def _prepare_layer_weights(p, hp, din_pad):
    """PyTorch layout -> transposed, gate-padded (H -> hp) bf16 weights."""
    H = p["w_hh"].shape[1]
    d_in = p["w_ih"].shape[1]
    wih_t = jnp.asarray(p["w_ih"], jnp.float32).T.reshape(d_in, 4, H)
    wih_t = jnp.pad(wih_t, ((0, din_pad - d_in), (0, 0), (0, hp - H)))
    wih_t = wih_t.reshape(din_pad, 4 * hp)
    whh_t = jnp.asarray(p["w_hh"], jnp.float32).T.reshape(H, 4, H)
    whh_t = jnp.pad(whh_t, ((0, hp - H), (0, 0), (0, hp - H))).reshape(hp, 4 * hp)
    bias = jnp.asarray(p["b_ih"], jnp.float32) + jnp.asarray(p["b_hh"], jnp.float32)
    bias = jnp.pad(bias.reshape(4, H), ((0, 0), (0, hp - H))).reshape(1, 4 * hp)
    return wih_t.astype(_COMPUTE_DTYPE), whh_t.astype(_COMPUTE_DTYPE), bias


def prepare_encoder_lstm_params(params):
    """Pad/transpose/cast all layer weights once; returns (prepared, hidden_size)."""
    H = params[0]["w_hh"].shape[1]
    hp = _round_up(H, 128)
    prepared = []
    for layer, p in enumerate(params):
        d_in = p["w_ih"].shape[1]
        din_pad = d_in if layer == 0 else hp   # layer>0 consumes hp-wide bf16 x
        wih_t, whh_t, bias = _prepare_layer_weights(p, hp, din_pad)
        prepared.append(dict(wih_t=wih_t, whh_t=whh_t, bias=bias))
    return prepared, H


def init_encoder_lstm_params(key, input_size, hidden_size, num_layers):
    """Deterministic params matching nn.LSTM's per-layer shapes."""
    params = []
    k = 1.0 / np.sqrt(hidden_size)
    for layer in range(num_layers):
        d_in = input_size if layer == 0 else hidden_size
        key, k1, k2, k3, k4 = jax.random.split(key, 5)
        params.append(dict(
            w_ih=jax.random.uniform(k1, (4 * hidden_size, d_in), jnp.float32, -k, k),
            w_hh=jax.random.uniform(k2, (4 * hidden_size, hidden_size), jnp.float32, -k, k),
            b_ih=jax.random.uniform(k3, (4 * hidden_size,), jnp.float32, -k, k),
            b_hh=jax.random.uniform(k4, (4 * hidden_size,), jnp.float32, -k, k),
        ))
    return params


# --------------------------------------------------------------------------
# Forward pass (== EncoderLSTM.forward -> `out`)
# --------------------------------------------------------------------------

@functools.partial(jax.jit, static_argnames=("hidden_size",))
def encoder_lstm_forward(x_btd, prepared, hidden_size):
    """x_btd: (B, T, input_size), batch_first like the PyTorch module.
    prepared: output of prepare_encoder_lstm_params.
    Returns out: (B, T, hidden_size) float32."""
    B, T, _ = x_btd.shape
    H = hidden_size
    hp = prepared[0]["whh_t"].shape[0]

    n_cores = _num_tensorcores()
    vmem_cap = _tpu_vmem_bytes()
    act_dtype = _act_dtype()

    b_mult = 16 if n_cores >= 2 else 8          # fuller bf16 sublanes when split
    bp = _round_up(B, b_mult)
    bb = _choose_batch_block(bp, n_cores)

    d0 = prepared[0]["wih_t"].shape[0]
    cap = _time_chunk_cap(bb, max(d0, hp), hp, vmem_cap)
    tc = _choose_time_chunk(T, cap)
    T_pad = _round_up(T, tc)                    # pad time instead of tc=1 fallback

    x = jnp.transpose(x_btd, (1, 0, 2)).astype(jnp.float32)       # (T, B, D0)
    x = jnp.pad(x, ((0, T_pad - T), (0, bp - B), (0, 0)))         # (T_pad, Bp, D0)
    x = x.astype(_COMPUTE_DTYPE)

    for lp in prepared:
        # Fused Pallas layer: x@W_ih^T + h@W_hh^T + bias, LSTM cell update,
        # bf16 streamed in/out, f32 h/c carry.
        x = _run_lstm_layer(x, lp["wih_t"], lp["whh_t"], lp["bias"],
                            hp=hp, tc=tc, bb=bb, vmem_cap=vmem_cap,
                            act_dtype=act_dtype)                  # (T_pad, Bp, hp) bf16

    out = x[:T, :B, :H].astype(jnp.float32)
    return jnp.transpose(out, (1, 0, 2))                          # (B, T, H)


# --------------------------------------------------------------------------
# Pure-JAX f32 reference (matches torch.nn.LSTM, gate order i,f,g,o)
# --------------------------------------------------------------------------

def _reference_lstm(x_btd, params):
    x = jnp.transpose(x_btd, (1, 0, 2)).astype(jnp.float32)
    for p in params:
        H = p["w_hh"].shape[1]
        B = x.shape[1]
        w_ih_t, w_hh_t = p["w_ih"].T, p["w_hh"].T
        bias = p["b_ih"] + p["b_hh"]

        def step(carry, x_t):
            h, c = carry
            gates = x_t @ w_ih_t + h @ w_hh_t + bias
            i = jax.nn.sigmoid(gates[:, 0 * H:1 * H])
            f = jax.nn.sigmoid(gates[:, 1 * H:2 * H])
            g = jnp.tanh(gates[:, 2 * H:3 * H])
            o = jax.nn.sigmoid(gates[:, 3 * H:4 * H])
            c = f * c + i * g
            h = o * jnp.tanh(c)
            return (h, c), h

        init = (jnp.zeros((B, H), jnp.float32), jnp.zeros((B, H), jnp.float32))
        _, hs = jax.lax.scan(step, init, x)
        x = hs
    return jnp.transpose(x, (1, 0, 2))


if __name__ == "__main__":
    # Small shapes consistent with the module: x is (batch, seq, input_size).
    B, T, INPUT_SIZE, HIDDEN_SIZE, NUM_LAYERS = 2, 8, 16, 32, 2

    key = jax.random.PRNGKey(0)
    kx, kp = jax.random.split(key)
    x = jax.random.normal(kx, (B, T, INPUT_SIZE), dtype=jnp.float32)
    params = init_encoder_lstm_params(kp, INPUT_SIZE, HIDDEN_SIZE, NUM_LAYERS)
    prepared, H = prepare_encoder_lstm_params(params)   # once per model

    out = encoder_lstm_forward(x, prepared, hidden_size=H)
    out = jax.block_until_ready(out)

    ref = jax.block_until_ready(_reference_lstm(x, params))
    assert out.shape == (B, T, HIDDEN_SIZE), out.shape
    # Tolerance relaxed vs the f32 reference: matmul operands, layer-to-layer
    # activations (and on v6e/v7x the gate nonlinearities) are bf16; the
    # accumulation and c/h state math stay f32.
    np.testing.assert_allclose(np.asarray(out), np.asarray(ref), rtol=2e-2, atol=2e-2)

    print("KERNEL_OK")
</pallas_src>

<mosaic_0001>
module attributes {stable_mosaic.version = 11 : i64} {
  func.func @_lstm_fused_kernel(%arg0: i32, %arg1: i32, %arg2: memref<8x8x128xbf16, #tpu.memory_space<vmem>>, %arg3: memref<128x512xbf16, #tpu.memory_space<vmem>>, %arg4: memref<128x512xbf16, #tpu.memory_space<vmem>>, %arg5: memref<1x512xf32, #tpu.memory_space<vmem>>, %arg6: memref<8x8x128xbf16, #tpu.memory_space<vmem>>, %arg7: memref<8x128xf32, #tpu.memory_space<vmem>>, %arg8: memref<8x128xf32, #tpu.memory_space<vmem>>) attributes {dimension_semantics = [#tpu.dimension_semantics<parallel>, #tpu.dimension_semantics<arbitrary>], iteration_bounds = array<i64: 1, 1>, scalar_prefetch = 0 : i64, scratch_operands = 2 : i64, tpu.core_type = #tpu.core_type<tc>, window_params = [{transform_indices = @transform_0, window_bounds = array<i64: 8, 8, 128>}, {pipeline_mode = #tpu.pipeline_mode<synchronous>, transform_indices = @transform_1, window_bounds = array<i64: 128, 512>}, {pipeline_mode = #tpu.pipeline_mode<synchronous>, transform_indices = @transform_2, window_bounds = array<i64: 128, 512>}, {pipeline_mode = #tpu.pipeline_mode<synchronous>, transform_indices = @transform_3, window_bounds = array<i64: 1, 512>}, {transform_indices = @transform_4, window_bounds = array<i64: 8, 8, 128>}]} {
    %c0_i32 = arith.constant 0 : i32
    %0 = arith.cmpi eq, %arg1, %c0_i32 : i32
    %1 = arith.extui %0 : i1 to i32
    %c0_i32_0 = arith.constant 0 : i32
    %2 = arith.cmpi ne, %1, %c0_i32_0 : i32
    scf.if %2 {
      %cst_86 = arith.constant 0.000000e+00 : f32
      %316 = vector.broadcast %cst_86 : f32 to vector<8x128xf32>
      %c0_87 = arith.constant 0 : index
      %c0_88 = arith.constant 0 : index
      %317 = vector.load %arg7[%c0_87, %c0_88] : memref<8x128xf32, #tpu.memory_space<vmem>>, vector<8x128xf32>
      tpu.vector_store %arg7[%c0_87, %c0_88], %316 {strides = array<i32>} : memref<8x128xf32, #tpu.memory_space<vmem>>, vector<8x128xf32>,
      %cst_89 = arith.constant 0.000000e+00 : f32
      %318 = vector.broadcast %cst_89 : f32 to vector<8x128xf32>
      %c0_90 = arith.constant 0 : index
      %c0_91 = arith.constant 0 : index
      %319 = vector.load %arg8[%c0_90, %c0_91] : memref<8x128xf32, #tpu.memory_space<vmem>>, vector<8x128xf32>
      tpu.vector_store %arg8[%c0_90, %c0_91], %318 {strides = array<i32>} : memref<8x128xf32, #tpu.memory_space<vmem>>, vector<8x128xf32>,
    } else {
    }
    %c0 = arith.constant 0 : index
    %c0_1 = arith.constant 0 : index
    %3 = vector.load %arg3[%c0, %c0_1] : memref<128x512xbf16, #tpu.memory_space<vmem>>, vector<128x512xbf16>
    %c0_2 = arith.constant 0 : index
    %c0_3 = arith.constant 0 : index
    %4 = vector.load %arg4[%c0_2, %c0_3] : memref<128x512xbf16, #tpu.memory_space<vmem>>, vector<128x512xbf16>
    %c0_4 = arith.constant 0 : index
    %c0_5 = arith.constant 0 : index
    %5 = vector.load %arg5[%c0_4, %c0_5] : memref<1x512xf32, #tpu.memory_space<vmem>>, vector<1x512xf32>
    %6 = vector.shape_cast %5 : vector<1x512xf32> to vector<1x512xf32>
    %7 = vector.broadcast %6 : vector<1x512xf32> to vector<8x512xf32>
    %c0_6 = arith.constant 0 : index
    %c0_7 = arith.constant 0 : index
    %8 = vector.load %arg7[%c0_6, %c0_7] : memref<8x128xf32, #tpu.memory_space<vmem>>, vector<8x128xf32>
    %c0_8 = arith.constant 0 : index
    %c0_9 = arith.constant 0 : index
    %9 = vector.load %arg8[%c0_8, %c0_9] : memref<8x128xf32, #tpu.memory_space<vmem>>, vector<8x128xf32>
    %c0_i32_10 = arith.constant 0 : i32
    %10 = arith.index_cast %c0_i32_10 : i32 to index
    %c0_11 = arith.constant 0 : index
    %c0_12 = arith.constant 0 : index
    %11 = vector.load %arg2[%10, %c0_11, %c0_12] : memref<8x8x128xbf16, #tpu.memory_space<vmem>>, vector<1x8x128xbf16>
    %12 = vector.shape_cast %11 : vector<1x8x128xbf16> to vector<8x128xbf16>
    %cst = arith.constant dense<0.000000e+00> : vector<8x512xf32>
    %13 = tpu.matmul %12, %3, %cst {dimension_numbers = #tpu.dot_dimension_numbers<[1], [0], [0], [1], [0, 0, 1, 1], [], []>} : vector<8x128xbf16>, vector<128x512xbf16>, vector<8x512xf32> -> vector<8x512xf32>
    %14 = arith.truncf %8 : vector<8x128xf32> to vector<8x128xbf16>
    %cst_13 = arith.constant dense<0.000000e+00> : vector<8x512xf32>
    %15 = tpu.matmul %14, %4, %cst_13 {dimension_numbers = #tpu.dot_dimension_numbers<[1], [0], [0], [1], [0, 0, 1, 1], [], []>} : vector<8x128xbf16>, vector<128x512xbf16>, vector<8x512xf32> -> vector<8x512xf32>
    %16 = arith.addf %13, %7 : vector<8x512xf32>
    %17 = arith.addf %16, %15 : vector<8x512xf32>
    %18 = vector.extract_strided_slice %17 {offsets = [0, 0], sizes = [8, 128], strides = [1, 1]} : vector<8x512xf32> to vector<8x128xf32>
    %19 = arith.negf %18 : vector<8x128xf32>
    %20 = math.exp %19 : vector<8x128xf32>
    %cst_14 = arith.constant 1.000000e+00 : f32
    %21 = vector.broadcast %cst_14 : f32 to vector<8x128xf32>
    %22 = arith.addf %21, %20 : vector<8x128xf32>
    %23 = arith.divf %21, %22 : vector<8x128xf32>
    %24 = vector.extract_strided_slice %17 {offsets = [0, 128], sizes = [8, 128], strides = [1, 1]} : vector<8x512xf32> to vector<8x128xf32>
    %25 = arith.negf %24 : vector<8x128xf32>
    %26 = math.exp %25 : vector<8x128xf32>
    %cst_15 = arith.constant 1.000000e+00 : f32
    %27 = vector.broadcast %cst_15 : f32 to vector<8x128xf32>
    %28 = arith.addf %27, %26 : vector<8x128xf32>
    %29 = arith.divf %27, %28 : vector<8x128xf32>
    %30 = vector.extract_strided_slice %17 {offsets = [0, 256], sizes = [8, 128], strides = [1, 1]} : vector<8x512xf32> to vector<8x128xf32>
    %31 = math.tanh %30 : vector<8x128xf32>
    %32 = vector.extract_strided_slice %17 {offsets = [0, 384], sizes = [8, 128], strides = [1, 1]} : vector<8x512xf32> to vector<8x128xf32>
    %33 = arith.negf %32 : vector<8x128xf32>
    %34 = math.exp %33 : vector<8x128xf32>
    %cst_16 = arith.constant 1.000000e+00 : f32
    %35 = vector.broadcast %cst_16 : f32 to vector<8x128xf32>
    %36 = arith.addf %35, %34 : vector<8x128xf32>
    %37 = arith.divf %35, %36 : vector<8x128xf32>
    %38 = arith.mulf %29, %9 : vector<8x128xf32>
    %39 = arith.mulf %23, %31 : vector<8x128xf32>
    %40 = arith.addf %38, %39 : vector<8x128xf32>
    %41 = math.tanh %40 : vector<8x128xf32>
    %42 = arith.mulf %37, %41 : vector<8x128xf32>
    %43 = arith.truncf %42 : vector<8x128xf32> to vector<8x128xbf16>
    %44 = arith.index_cast %c0_i32_10 : i32 to index
    %c0_17 = arith.constant 0 : index
    %c0_18 = arith.constant 0 : index
    %45 = vector.load %arg6[%44, %c0_17, %c0_18] : memref<8x8x128xbf16, #tpu.memory_space<vmem>>, vector<1x8x128xbf16>
    %46 = vector.shape_cast %45 : vector<1x8x128xbf16> to vector<8x128xbf16>
    %47 = vector.shape_cast %43 : vector<8x128xbf16> to vector<1x8x128xbf16>
    tpu.vector_store %arg6[%44, %c0_17, %c0_18], %47 {strides = array<i32>} : memref<8x8x128xbf16, #tpu.memory_space<vmem>>, vector<1x8x128xbf16>,
    %c1_i32 = arith.constant 1 : i32
    %48 = arith.index_cast %c1_i32 : i32 to index
    %c0_19 = arith.constant 0 : index
    %c0_20 = arith.constant 0 : index
    %49 = vector.load %arg2[%48, %c0_19, %c0_20] : memref<8x8x128xbf16, #tpu.memory_space<vmem>>, vector<1x8x128xbf16>
    %50 = vector.shape_cast %49 : vector<1x8x128xbf16> to vector<8x128xbf16>
    %cst_21 = arith.constant dense<0.000000e+00> : vector<8x512xf32>
    %51 = tpu.matmul %50, %3, %cst_21 {dimension_numbers = #tpu.dot_dimension_numbers<[1], [0], [0], [1], [0, 0, 1, 1], [], []>} : vector<8x128xbf16>, vector<128x512xbf16>, vector<8x512xf32> -> vector<8x512xf32>
    %52 = arith.truncf %42 : vector<8x128xf32> to vector<8x128xbf16>
    %cst_22 = arith.constant dense<0.000000e+00> : vector<8x512xf32>
    %53 = tpu.matmul %52, %4, %cst_22 {dimension_numbers = #tpu.dot_dimension_numbers<[1], [0], [0], [1], [0, 0, 1, 1], [], []>} : vector<8x128xbf16>, vector<128x512xbf16>, vector<8x512xf32> -> vector<8x512xf32>
    %54 = arith.addf %51, %7 : vector<8x512xf32>
    %55 = arith.addf %54, %53 : vector<8x512xf32>
    %56 = vector.extract_strided_slice %55 {offsets = [0, 0], sizes = [8, 128], strides = [1, 1]} : vector<8x512xf32> to vector<8x128xf32>
    %57 = arith.negf %56 : vector<8x128xf32>
    %58 = math.exp %57 : vector<8x128xf32>
    %cst_23 = arith.constant 1.000000e+00 : f32
    %59 = vector.broadcast %cst_23 : f32 to vector<8x128xf32>
    %60 = arith.addf %59, %58 : vector<8x128xf32>
    %61 = arith.divf %59, %60 : vector<8x128xf32>
    %62 = vector.extract_strided_slice %55 {offsets = [0, 128], sizes = [8, 128], strides = [1, 1]} : vector<8x512xf32> to vector<8x128xf32>
    %63 = arith.negf %62 : vector<8x128xf32>
    %64 = math.exp %63 : vector<8x128xf32>
    %cst_24 = arith.constant 1.000000e+00 : f32
    %65 = vector.broadcast %cst_24 : f32 to vector<8x128xf32>
    %66 = arith.addf %65, %64 : vector<8x128xf32>
    %67 = arith.divf %65, %66 : vector<8x128xf32>
    %68 = vector.extract_strided_slice %55 {offsets = [0, 256], sizes = [8, 128], strides = [1, 1]} : vector<8x512xf32> to vector<8x128xf32>
    %69 = math.tanh %68 : vector<8x128xf32>
    %70 = vector.extract_strided_slice %55 {offsets = [0, 384], sizes = [8, 128], strides = [1, 1]} : vector<8x512xf32> to vector<8x128xf32>
    %71 = arith.negf %70 : vector<8x128xf32>
    %72 = math.exp %71 : vector<8x128xf32>
    %cst_25 = arith.constant 1.000000e+00 : f32
    %73 = vector.broadcast %cst_25 : f32 to vector<8x128xf32>
    %74 = arith.addf %73, %72 : vector<8x128xf32>
    %75 = arith.divf %73, %74 : vector<8x128xf32>
    %76 = arith.mulf %67, %40 : vector<8x128xf32>
    %77 = arith.mulf %61, %69 : vector<8x128xf32>
    %78 = arith.addf %76, %77 : vector<8x128xf32>
    %79 = math.tanh %78 : vector<8x128xf32>
    %80 = arith.mulf %75, %79 : vector<8x128xf32>
    %81 = arith.truncf %80 : vector<8x128xf32> to vector<8x128xbf16>
    %82 = arith.index_cast %c1_i32 : i32 to index
    %c0_26 = arith.constant 0 : index
    %c0_27 = arith.constant 0 : index
    %83 = vector.load %arg6[%82, %c0_26, %c0_27] : memref<8x8x128xbf16, #tpu.memory_space<vmem>>, vector<1x8x128xbf16>
    %84 = vector.shape_cast %83 : vector<1x8x128xbf16> to vector<8x128xbf16>
    %85 = vector.shape_cast %81 : vector<8x128xbf16> to vector<1x8x128xbf16>
    tpu.vector_store %arg6[%82, %c0_26, %c0_27], %85 {strides = array<i32>} : memref<8x8x128xbf16, #tpu.memory_space<vmem>>, vector<1x8x128xbf16>,
    %c2_i32 = arith.constant 2 : i32
    %86 = arith.index_cast %c2_i32 : i32 to index
    %c0_28 = arith.constant 0 : index
    %c0_29 = arith.constant 0 : index
    %87 = vector.load %arg2[%86, %c0_28, %c0_29] : memref<8x8x128xbf16, #tpu.memory_space<vmem>>, vector<1x8x128xbf16>
    %88 = vector.shape_cast %87 : vector<1x8x128xbf16> to vector<8x128xbf16>
    %cst_30 = arith.constant dense<0.000000e+00> : vector<8x512xf32>
    %89 = tpu.matmul %88, %3, %cst_30 {dimension_numbers = #tpu.dot_dimension_numbers<[1], [0], [0], [1], [0, 0, 1, 1], [], []>} : vector<8x128xbf16>, vector<128x512xbf16>, vector<8x512xf32> -> vector<8x512xf32>
    %90 = arith.truncf %80 : vector<8x128xf32> to vector<8x128xbf16>
    %cst_31 = arith.constant dense<0.000000e+00> : vector<8x512xf32>
    %91 = tpu.matmul %90, %4, %cst_31 {dimension_numbers = #tpu.dot_dimension_numbers<[1], [0], [0], [1], [0, 0, 1, 1], [], []>} : vector<8x128xbf16>, vector<128x512xbf16>, vector<8x512xf32> -> vector<8x512xf32>
    %92 = arith.addf %89, %7 : vector<8x512xf32>
    %93 = arith.addf %92, %91 : vector<8x512xf32>
    %94 = vector.extract_strided_slice %93 {offsets = [0, 0], sizes = [8, 128], strides = [1, 1]} : vector<8x512xf32> to vector<8x128xf32>
    %95 = arith.negf %94 : vector<8x128xf32>
    %96 = math.exp %95 : vector<8x128xf32>
    %cst_32 = arith.constant 1.000000e+00 : f32
    %97 = vector.broadcast %cst_32 : f32 to vector<8x128xf32>
    %98 = arith.addf %97, %96 : vector<8x128xf32>
    %99 = arith.divf %97, %98 : vector<8x128xf32>
    %100 = vector.extract_strided_slice %93 {offsets = [0, 128], sizes = [8, 128], strides = [1, 1]} : vector<8x512xf32> to vector<8x128xf32>
    %101 = arith.negf %100 : vector<8x128xf32>
    %102 = math.exp %101 : vector<8x128xf32>
    %cst_33 = arith.constant 1.000000e+00 : f32
    %103 = vector.broadcast %cst_33 : f32 to vector<8x128xf32>
    %104 = arith.addf %103, %102 : vector<8x128xf32>
    %105 = arith.divf %103, %104 : vector<8x128xf32>
    %106 = vector.extract_strided_slice %93 {offsets = [0, 256], sizes = [8, 128], strides = [1, 1]} : vector<8x512xf32> to vector<8x128xf32>
    %107 = math.tanh %106 : vector<8x128xf32>
    %108 = vector.extract_strided_slice %93 {offsets = [0, 384], sizes = [8, 128], strides = [1, 1]} : vector<8x512xf32> to vector<8x128xf32>
    %109 = arith.negf %108 : vector<8x128xf32>
    %110 = math.exp %109 : vector<8x128xf32>
    %cst_34 = arith.constant 1.000000e+00 : f32
    %111 = vector.broadcast %cst_34 : f32 to vector<8x128xf32>
    %112 = arith.addf %111, %110 : vector<8x128xf32>
    %113 = arith.divf %111, %112 : vector<8x128xf32>
    %114 = arith.mulf %105, %78 : vector<8x128xf32>
    %115 = arith.mulf %99, %107 : vector<8x128xf32>
    %116 = arith.addf %114, %115 : vector<8x128xf32>
    %117 = math.tanh %116 : vector<8x128xf32>
    %118 = arith.mulf %113, %117 : vector<8x128xf32>
    %119 = arith.truncf %118 : vector<8x128xf32> to vector<8x128xbf16>
    %120 = arith.index_cast %c2_i32 : i32 to index
    %c0_35 = arith.constant 0 : index
    %c0_36 = arith.constant 0 : index
    %121 = vector.load %arg6[%120, %c0_35, %c0_36] : memref<8x8x128xbf16, #tpu.memory_space<vmem>>, vector<1x8x128xbf16>
    %122 = vector.shape_cast %121 : vector<1x8x128xbf16> to vector<8x128xbf16>
    %123 = vector.shape_cast %119 : vector<8x128xbf16> to vector<1x8x128xbf16>
    tpu.vector_store %arg6[%120, %c0_35, %c0_36], %123 {strides = array<i32>} : memref<8x8x128xbf16, #tpu.memory_space<vmem>>, vector<1x8x128xbf16>,
    %c3_i32 = arith.constant 3 : i32
    %124 = arith.index_cast %c3_i32 : i32 to index
    %c0_37 = arith.constant 0 : index
    %c0_38 = arith.constant 0 : index
    %125 = vector.load %arg2[%124, %c0_37, %c0_38] : memref<8x8x128xbf16, #tpu.memory_space<vmem>>, vector<1x8x128xbf16>
    %126 = vector.shape_cast %125 : vector<1x8x128xbf16> to vector<8x128xbf16>
    %cst_39 = arith.constant dense<0.000000e+00> : vector<8x512xf32>
    %127 = tpu.matmul %126, %3, %cst_39 {dimension_numbers = #tpu.dot_dimension_numbers<[1], [0], [0], [1], [0, 0, 1, 1], [], []>} : vector<8x128xbf16>, vector<128x512xbf16>, vector<8x512xf32> -> vector<8x512xf32>
    %128 = arith.truncf %118 : vector<8x128xf32> to vector<8x128xbf16>
    %cst_40 = arith.constant dense<0.000000e+00> : vector<8x512xf32>
    %129 = tpu.matmul %128, %4, %cst_40 {dimension_numbers = #tpu.dot_dimension_numbers<[1], [0], [0], [1], [0, 0, 1, 1], [], []>} : vector<8x128xbf16>, vector<128x512xbf16>, vector<8x512xf32> -> vector<8x512xf32>
    %130 = arith.addf %127, %7 : vector<8x512xf32>
    %131 = arith.addf %130, %129 : vector<8x512xf32>
    %132 = vector.extract_strided_slice %131 {offsets = [0, 0], sizes = [8, 128], strides = [1, 1]} : vector<8x512xf32> to vector<8x128xf32>
    %133 = arith.negf %132 : vector<8x128xf32>
    %134 = math.exp %133 : vector<8x128xf32>
    %cst_41 = arith.constant 1.000000e+00 : f32
    %135 = vector.broadcast %cst_41 : f32 to vector<8x128xf32>
    %136 = arith.addf %135, %134 : vector<8x128xf32>
    %137 = arith.divf %135, %136 : vector<8x128xf32>
    %138 = vector.extract_strided_slice %131 {offsets = [0, 128], sizes = [8, 128], strides = [1, 1]} : vector<8x512xf32> to vector<8x128xf32>
    %139 = arith.negf %138 : vector<8x128xf32>
    %140 = math.exp %139 : vector<8x128xf32>
    %cst_42 = arith.constant 1.000000e+00 : f32
    %141 = vector.broadcast %cst_42 : f32 to vector<8x128xf32>
    %142 = arith.addf %141, %140 : vector<8x128xf32>
    %143 = arith.divf %141, %142 : vector<8x128xf32>
    %144 = vector.extract_strided_slice %131 {offsets = [0, 256], sizes = [8, 128], strides = [1, 1]} : vector<8x512xf32> to vector<8x128xf32>
    %145 = math.tanh %144 : vector<8x128xf32>
    %146 = vector.extract_strided_slice %131 {offsets = [0, 384], sizes = [8, 128], strides = [1, 1]} : vector<8x512xf32> to vector<8x128xf32>
    %147 = arith.negf %146 : vector<8x128xf32>
    %148 = math.exp %147 : vector<8x128xf32>
    %cst_43 = arith.constant 1.000000e+00 : f32
    %149 = vector.broadcast %cst_43 : f32 to vector<8x128xf32>
    %150 = arith.addf %149, %148 : vector<8x128xf32>
    %151 = arith.divf %149, %150 : vector<8x128xf32>
    %152 = arith.mulf %143, %116 : vector<8x128xf32>
    %153 = arith.mulf %137, %145 : vector<8x128xf32>
    %154 = arith.addf %152, %153 : vector<8x128xf32>
    %155 = math.tanh %154 : vector<8x128xf32>
    %156 = arith.mulf %151, %155 : vector<8x128xf32>
    %157 = arith.truncf %156 : vector<8x128xf32> to vector<8x128xbf16>
    %158 = arith.index_cast %c3_i32 : i32 to index
    %c0_44 = arith.constant 0 : index
    %c0_45 = arith.constant 0 : index
    %159 = vector.load %arg6[%158, %c0_44, %c0_45] : memref<8x8x128xbf16, #tpu.memory_space<vmem>>, vector<1x8x128xbf16>
    %160 = vector.shape_cast %159 : vector<1x8x128xbf16> to vector<8x128xbf16>
    %161 = vector.shape_cast %157 : vector<8x128xbf16> to vector<1x8x128xbf16>
    tpu.vector_store %arg6[%158, %c0_44, %c0_45], %161 {strides = array<i32>} : memref<8x8x128xbf16, #tpu.memory_space<vmem>>, vector<1x8x128xbf16>,
    %c4_i32 = arith.constant 4 : i32
    %162 = arith.index_cast %c4_i32 : i32 to index
    %c0_46 = arith.constant 0 : index
    %c0_47 = arith.constant 0 : index
    %163 = vector.load %arg2[%162, %c0_46, %c0_47] : memref<8x8x128xbf16, #tpu.memory_space<vmem>>, vector<1x8x128xbf16>
    %164 = vector.shape_cast %163 : vector<1x8x128xbf16> to vector<8x128xbf16>
    %cst_48 = arith.constant dense<0.000000e+00> : vector<8x512xf32>
    %165 = tpu.matmul %164, %3, %cst_48 {dimension_numbers = #tpu.dot_dimension_numbers<[1], [0], [0], [1], [0, 0, 1, 1], [], []>} : vector<8x128xbf16>, vector<128x512xbf16>, vector<8x512xf32> -> vector<8x512xf32>
    %166 = arith.truncf %156 : vector<8x128xf32> to vector<8x128xbf16>
    %cst_49 = arith.constant dense<0.000000e+00> : vector<8x512xf32>
    %167 = tpu.matmul %166, %4, %cst_49 {dimension_numbers = #tpu.dot_dimension_numbers<[1], [0], [0], [1], [0, 0, 1, 1], [], []>} : vector<8x128xbf16>, vector<128x512xbf16>, vector<8x512xf32> -> vector<8x512xf32>
    %168 = arith.addf %165, %7 : vector<8x512xf32>
    %169 = arith.addf %168, %167 : vector<8x512xf32>
    %170 = vector.extract_strided_slice %169 {offsets = [0, 0], sizes = [8, 128], strides = [1, 1]} : vector<8x512xf32> to vector<8x128xf32>
    %171 = arith.negf %170 : vector<8x128xf32>
    %172 = math.exp %171 : vector<8x128xf32>
    %cst_50 = arith.constant 1.000000e+00 : f32
    %173 = vector.broadcast %cst_50 : f32 to vector<8x128xf32>
    %174 = arith.addf %173, %172 : vector<8x128xf32>
    %175 = arith.divf %173, %174 : vector<8x128xf32>
    %176 = vector.extract_strided_slice %169 {offsets = [0, 128], sizes = [8, 128], strides = [1, 1]} : vector<8x512xf32> to vector<8x128xf32>
    %177 = arith.negf %176 : vector<8x128xf32>
    %178 = math.exp %177 : vector<8x128xf32>
    %cst_51 = arith.constant 1.000000e+00 : f32
    %179 = vector.broadcast %cst_51 : f32 to vector<8x128xf32>
    %180 = arith.addf %179, %178 : vector<8x128xf32>
    %181 = arith.divf %179, %180 : vector<8x128xf32>
    %182 = vector.extract_strided_slice %169 {offsets = [0, 256], sizes = [8, 128], strides = [1, 1]} : vector<8x512xf32> to vector<8x128xf32>
    %183 = math.tanh %182 : vector<8x128xf32>
    %184 = vector.extract_strided_slice %169 {offsets = [0, 384], sizes = [8, 128], strides = [1, 1]} : vector<8x512xf32> to vector<8x128xf32>
    %185 = arith.negf %184 : vector<8x128xf32>
    %186 = math.exp %185 : vector<8x128xf32>
    %cst_52 = arith.constant 1.000000e+00 : f32
    %187 = vector.broadcast %cst_52 : f32 to vector<8x128xf32>
    %188 = arith.addf %187, %186 : vector<8x128xf32>
    %189 = arith.divf %187, %188 : vector<8x128xf32>
    %190 = arith.mulf %181, %154 : vector<8x128xf32>
    %191 = arith.mulf %175, %183 : vector<8x128xf32>
    %192 = arith.addf %190, %191 : vector<8x128xf32>
    %193 = math.tanh %192 : vector<8x128xf32>
    %194 = arith.mulf %189, %193 : vector<8x128xf32>
    %195 = arith.truncf %194 : vector<8x128xf32> to vector<8x128xbf16>
    %196 = arith.index_cast %c4_i32 : i32 to index
    %c0_53 = arith.constant 0 : index
    %c0_54 = arith.constant 0 : index
    %197 = vector.load %arg6[%196, %c0_53, %c0_54] : memref<8x8x128xbf16, #tpu.memory_space<vmem>>, vector<1x8x128xbf16>
    %198 = vector.shape_cast %197 : vector<1x8x128xbf16> to vector<8x128xbf16>
    %199 = vector.shape_cast %195 : vector<8x128xbf16> to vector<1x8x128xbf16>
    tpu.vector_store %arg6[%196, %c0_53, %c0_54], %199 {strides = array<i32>} : memref<8x8x128xbf16, #tpu.memory_space<vmem>>, vector<1x8x128xbf16>,
    %c5_i32 = arith.constant 5 : i32
    %200 = arith.index_cast %c5_i32 : i32 to index
    %c0_55 = arith.constant 0 : index
    %c0_56 = arith.constant 0 : index
    %201 = vector.load %arg2[%200, %c0_55, %c0_56] : memref<8x8x128xbf16, #tpu.memory_space<vmem>>, vector<1x8x128xbf16>
    %202 = vector.shape_cast %201 : vector<1x8x128xbf16> to vector<8x128xbf16>
    %cst_57 = arith.constant dense<0.000000e+00> : vector<8x512xf32>
    %203 = tpu.matmul %202, %3, %cst_57 {dimension_numbers = #tpu.dot_dimension_numbers<[1], [0], [0], [1], [0, 0, 1, 1], [], []>} : vector<8x128xbf16>, vector<128x512xbf16>, vector<8x512xf32> -> vector<8x512xf32>
    %204 = arith.truncf %194 : vector<8x128xf32> to vector<8x128xbf16>
    %cst_58 = arith.constant dense<0.000000e+00> : vector<8x512xf32>
    %205 = tpu.matmul %204, %4, %cst_58 {dimension_numbers = #tpu.dot_dimension_numbers<[1], [0], [0], [1], [0, 0, 1, 1], [], []>} : vector<8x128xbf16>, vector<128x512xbf16>, vector<8x512xf32> -> vector<8x512xf32>
    %206 = arith.addf %203, %7 : vector<8x512xf32>
    %207 = arith.addf %206, %205 : vector<8x512xf32>
    %208 = vector.extract_strided_slice %207 {offsets = [0, 0], sizes = [8, 128], strides = [1, 1]} : vector<8x512xf32> to vector<8x128xf32>
    %209 = arith.negf %208 : vector<8x128xf32>
    %210 = math.exp %209 : vector<8x128xf32>
    %cst_59 = arith.constant 1.000000e+00 : f32
    %211 = vector.broadcast %cst_59 : f32 to vector<8x128xf32>
    %212 = arith.addf %211, %210 : vector<8x128xf32>
    %213 = arith.divf %211, %212 : vector<8x128xf32>
    %214 = vector.extract_strided_slice %207 {offsets = [0, 128], sizes = [8, 128], strides = [1, 1]} : vector<8x512xf32> to vector<8x128xf32>
    %215 = arith.negf %214 : vector<8x128xf32>
    %216 = math.exp %215 : vector<8x128xf32>
    %cst_60 = arith.constant 1.000000e+00 : f32
    %217 = vector.broadcast %cst_60 : f32 to vector<8x128xf32>
    %218 = arith.addf %217, %216 : vector<8x128xf32>
    %219 = arith.divf %217, %218 : vector<8x128xf32>
    %220 = vector.extract_strided_slice %207 {offsets = [0, 256], sizes = [8, 128], strides = [1, 1]} : vector<8x512xf32> to vector<8x128xf32>
    %221 = math.tanh %220 : vector<8x128xf32>
    %222 = vector.extract_strided_slice %207 {offsets = [0, 384], sizes = [8, 128], strides = [1, 1]} : vector<8x512xf32> to vector<8x128xf32>
    %223 = arith.negf %222 : vector<8x128xf32>
    %224 = math.exp %223 : vector<8x128xf32>
    %cst_61 = arith.constant 1.000000e+00 : f32
    %225 = vector.broadcast %cst_61 : f32 to vector<8x128xf32>
    %226 = arith.addf %225, %224 : vector<8x128xf32>
    %227 = arith.divf %225, %226 : vector<8x128xf32>
    %228 = arith.mulf %219, %192 : vector<8x128xf32>
    %229 = arith.mulf %213, %221 : vector<8x128xf32>
    %230 = arith.addf %228, %229 : vector<8x128xf32>
    %231 = math.tanh %230 : vector<8x128xf32>
    %232 = arith.mulf %227, %231 : vector<8x128xf32>
    %233 = arith.truncf %232 : vector<8x128xf32> to vector<8x128xbf16>
    %234 = arith.index_cast %c5_i32 : i32 to index
    %c0_62 = arith.constant 0 : index
    %c0_63 = arith.constant 0 : index
    %235 = vector.load %arg6[%234, %c0_62, %c0_63] : memref<8x8x128xbf16, #tpu.memory_space<vmem>>, vector<1x8x128xbf16>
    %236 = vector.shape_cast %235 : vector<1x8x128xbf16> to vector<8x128xbf16>
    %237 = vector.shape_cast %233 : vector<8x128xbf16> to vector<1x8x128xbf16>
    tpu.vector_store %arg6[%234, %c0_62, %c0_63], %237 {strides = array<i32>} : memref<8x8x128xbf16, #tpu.memory_space<vmem>>, vector<1x8x128xbf16>,
    %c6_i32 = arith.constant 6 : i32
    %238 = arith.index_cast %c6_i32 : i32 to index
    %c0_64 = arith.constant 0 : index
    %c0_65 = arith.constant 0 : index
    %239 = vector.load %arg2[%238, %c0_64, %c0_65] : memref<8x8x128xbf16, #tpu.memory_space<vmem>>, vector<1x8x128xbf16>
    %240 = vector.shape_cast %239 : vector<1x8x128xbf16> to vector<8x128xbf16>
    %cst_66 = arith.constant dense<0.000000e+00> : vector<8x512xf32>
    %241 = tpu.matmul %240, %3, %cst_66 {dimension_numbers = #tpu.dot_dimension_numbers<[1], [0], [0], [1], [0, 0, 1, 1], [], []>} : vector<8x128xbf16>, vector<128x512xbf16>, vector<8x512xf32> -> vector<8x512xf32>
    %242 = arith.truncf %232 : vector<8x128xf32> to vector<8x128xbf16>
    %cst_67 = arith.constant dense<0.000000e+00> : vector<8x512xf32>
    %243 = tpu.matmul %242, %4, %cst_67 {dimension_numbers = #tpu.dot_dimension_numbers<[1], [0], [0], [1], [0, 0, 1, 1], [], []>} : vector<8x128xbf16>, vector<128x512xbf16>, vector<8x512xf32> -> vector<8x512xf32>
    %244 = arith.addf %241, %7 : vector<8x512xf32>
    %245 = arith.addf %244, %243 : vector<8x512xf32>
    %246 = vector.extract_strided_slice %245 {offsets = [0, 0], sizes = [8, 128], strides = [1, 1]} : vector<8x512xf32> to vector<8x128xf32>
    %247 = arith.negf %246 : vector<8x128xf32>
    %248 = math.exp %247 : vector<8x128xf32>
    %cst_68 = arith.constant 1.000000e+00 : f32
    %249 = vector.broadcast %cst_68 : f32 to vector<8x128xf32>
    %250 = arith.addf %249, %248 : vector<8x128xf32>
    %251 = arith.divf %249, %250 : vector<8x128xf32>
    %252 = vector.extract_strided_slice %245 {offsets = [0, 128], sizes = [8, 128], strides = [1, 1]} : vector<8x512xf32> to vector<8x128xf32>
    %253 = arith.negf %252 : vector<8x128xf32>
    %254 = math.exp %253 : vector<8x128xf32>
    %cst_69 = arith.constant 1.000000e+00 : f32
    %255 = vector.broadcast %cst_69 : f32 to vector<8x128xf32>
    %256 = arith.addf %255, %254 : vector<8x128xf32>
    %257 = arith.divf %255, %256 : vector<8x128xf32>
    %258 = vector.extract_strided_slice %245 {offsets = [0, 256], sizes = [8, 128], strides = [1, 1]} : vector<8x512xf32> to vector<8x128xf32>
    %259 = math.tanh %258 : vector<8x128xf32>
    %260 = vector.extract_strided_slice %245 {offsets = [0, 384], sizes = [8, 128], strides = [1, 1]} : vector<8x512xf32> to vector<8x128xf32>
    %261 = arith.negf %260 : vector<8x128xf32>
    %262 = math.exp %261 : vector<8x128xf32>
    %cst_70 = arith.constant 1.000000e+00 : f32
    %263 = vector.broadcast %cst_70 : f32 to vector<8x128xf32>
    %264 = arith.addf %263, %262 : vector<8x128xf32>
    %265 = arith.divf %263, %264 : vector<8x128xf32>
    %266 = arith.mulf %257, %230 : vector<8x128xf32>
    %267 = arith.mulf %251, %259 : vector<8x128xf32>
    %268 = arith.addf %266, %267 : vector<8x128xf32>
    %269 = math.tanh %268 : vector<8x128xf32>
    %270 = arith.mulf %265, %269 : vector<8x128xf32>
    %271 = arith.truncf %270 : vector<8x128xf32> to vector<8x128xbf16>
    %272 = arith.index_cast %c6_i32 : i32 to index
    %c0_71 = arith.constant 0 : index
    %c0_72 = arith.constant 0 : index
    %273 = vector.load %arg6[%272, %c0_71, %c0_72] : memref<8x8x128xbf16, #tpu.memory_space<vmem>>, vector<1x8x128xbf16>
    %274 = vector.shape_cast %273 : vector<1x8x128xbf16> to vector<8x128xbf16>
    %275 = vector.shape_cast %271 : vector<8x128xbf16> to vector<1x8x128xbf16>
    tpu.vector_store %arg6[%272, %c0_71, %c0_72], %275 {strides = array<i32>} : memref<8x8x128xbf16, #tpu.memory_space<vmem>>, vector<1x8x128xbf16>,
    %c7_i32 = arith.constant 7 : i32
    %276 = arith.index_cast %c7_i32 : i32 to index
    %c0_73 = arith.constant 0 : index
    %c0_74 = arith.constant 0 : index
    %277 = vector.load %arg2[%276, %c0_73, %c0_74] : memref<8x8x128xbf16, #tpu.memory_space<vmem>>, vector<1x8x128xbf16>
    %278 = vector.shape_cast %277 : vector<1x8x128xbf16> to vector<8x128xbf16>
    %cst_75 = arith.constant dense<0.000000e+00> : vector<8x512xf32>
    %279 = tpu.matmul %278, %3, %cst_75 {dimension_numbers = #tpu.dot_dimension_numbers<[1], [0], [0], [1], [0, 0, 1, 1], [], []>} : vector<8x128xbf16>, vector<128x512xbf16>, vector<8x512xf32> -> vector<8x512xf32>
    %280 = arith.truncf %270 : vector<8x128xf32> to vector<8x128xbf16>
    %cst_76 = arith.constant dense<0.000000e+00> : vector<8x512xf32>
    %281 = tpu.matmul %280, %4, %cst_76 {dimension_numbers = #tpu.dot_dimension_numbers<[1], [0], [0], [1], [0, 0, 1, 1], [], []>} : vector<8x128xbf16>, vector<128x512xbf16>, vector<8x512xf32> -> vector<8x512xf32>
    %282 = arith.addf %279, %7 : vector<8x512xf32>
    %283 = arith.addf %282, %281 : vector<8x512xf32>
    %284 = vector.extract_strided_slice %283 {offsets = [0, 0], sizes = [8, 128], strides = [1, 1]} : vector<8x512xf32> to vector<8x128xf32>
    %285 = arith.negf %284 : vector<8x128xf32>
    %286 = math.exp %285 : vector<8x128xf32>
    %cst_77 = arith.constant 1.000000e+00 : f32
    %287 = vector.broadcast %cst_77 : f32 to vector<8x128xf32>
    %288 = arith.addf %287, %286 : vector<8x128xf32>
    %289 = arith.divf %287, %288 : vector<8x128xf32>
    %290 = vector.extract_strided_slice %283 {offsets = [0, 128], sizes = [8, 128], strides = [1, 1]} : vector<8x512xf32> to vector<8x128xf32>
    %291 = arith.negf %290 : vector<8x128xf32>
    %292 = math.exp %291 : vector<8x128xf32>
    %cst_78 = arith.constant 1.000000e+00 : f32
    %293 = vector.broadcast %cst_78 : f32 to vector<8x128xf32>
    %294 = arith.addf %293, %292 : vector<8x128xf32>
    %295 = arith.divf %293, %294 : vector<8x128xf32>
    %296 = vector.extract_strided_slice %283 {offsets = [0, 256], sizes = [8, 128], strides = [1, 1]} : vector<8x512xf32> to vector<8x128xf32>
    %297 = math.tanh %296 : vector<8x128xf32>
    %298 = vector.extract_strided_slice %283 {offsets = [0, 384], sizes = [8, 128], strides = [1, 1]} : vector<8x512xf32> to vector<8x128xf32>
    %299 = arith.negf %298 : vector<8x128xf32>
    %300 = math.exp %299 : vector<8x128xf32>
    %cst_79 = arith.constant 1.000000e+00 : f32
    %301 = vector.broadcast %cst_79 : f32 to vector<8x128xf32>
    %302 = arith.addf %301, %300 : vector<8x128xf32>
    %303 = arith.divf %301, %302 : vector<8x128xf32>
    %304 = arith.mulf %295, %268 : vector<8x128xf32>
    %305 = arith.mulf %289, %297 : vector<8x128xf32>
    %306 = arith.addf %304, %305 : vector<8x128xf32>
    %307 = math.tanh %306 : vector<8x128xf32>
    %308 = arith.mulf %303, %307 : vector<8x128xf32>
    %309 = arith.truncf %308 : vector<8x128xf32> to vector<8x128xbf16>
    %310 = arith.index_cast %c7_i32 : i32 to index
    %c0_80 = arith.constant 0 : index
    %c0_81 = arith.constant 0 : index
    %311 = vector.load %arg6[%310, %c0_80, %c0_81] : memref<8x8x128xbf16, #tpu.memory_space<vmem>>, vector<1x8x128xbf16>
    %312 = vector.shape_cast %311 : vector<1x8x128xbf16> to vector<8x128xbf16>
    %313 = vector.shape_cast %309 : vector<8x128xbf16> to vector<1x8x128xbf16>
    tpu.vector_store %arg6[%310, %c0_80, %c0_81], %313 {strides = array<i32>} : memref<8x8x128xbf16, #tpu.memory_space<vmem>>, vector<1x8x128xbf16>,
    %c8_i32 = arith.constant 8 : i32
    %c0_82 = arith.constant 0 : index
    %c0_83 = arith.constant 0 : index
    %314 = vector.load %arg7[%c0_82, %c0_83] : memref<8x128xf32, #tpu.memory_space<vmem>>, vector<8x128xf32>
    tpu.vector_store %arg7[%c0_82, %c0_83], %308 {strides = array<i32>} : memref<8x128xf32, #tpu.memory_space<vmem>>, vector<8x128xf32>,
    %c0_84 = arith.constant 0 : index
    %c0_85 = arith.constant 0 : index
    %315 = vector.load %arg8[%c0_84, %c0_85] : memref<8x128xf32, #tpu.memory_space<vmem>>, vector<8x128xf32>
    tpu.vector_store %arg8[%c0_84, %c0_85], %306 {strides = array<i32>} : memref<8x128xf32, #tpu.memory_space<vmem>>, vector<8x128xf32>,
    return
  }
  func.func @transform_0(%arg0: i32, %arg1: i32) -> (i32, i32, i32) {
    %c0_i32 = arith.constant 0 : i32
    %c0_i32_0 = arith.constant 0 : i32
    return %arg1, %arg0, %c0_i32 : i32, i32, i32
  }
  func.func @transform_1(%arg0: i32, %arg1: i32) -> (i32, i32) {
    %c0_i32 = arith.constant 0 : i32
    %c0_i32_0 = arith.constant 0 : i32
    %c0_i32_1 = arith.constant 0 : i32
    return %c0_i32, %c0_i32_0 : i32, i32
  }
  func.func @transform_2(%arg0: i32, %arg1: i32) -> (i32, i32) {
    %c0_i32 = arith.constant 0 : i32
    %c0_i32_0 = arith.constant 0 : i32
    %c0_i32_1 = arith.constant 0 : i32
    return %c0_i32, %c0_i32_0 : i32, i32
  }
  func.func @transform_3(%arg0: i32, %arg1: i32) -> (i32, i32) {
    %c0_i32 = arith.constant 0 : i32
    %c0_i32_0 = arith.constant 0 : i32
    %c0_i32_1 = arith.constant 0 : i32
    return %c0_i32, %c0_i32_0 : i32, i32
  }
  func.func @transform_4(%arg0: i32, %arg1: i32) -> (i32, i32, i32) {
    %c0_i32 = arith.constant 0 : i32
    %c0_i32_0 = arith.constant 0 : i32
    return %arg1, %arg0, %c0_i32 : i32, i32, i32
  }
}

module attributes {stable_mosaic.version = 11 : i64} {
  func.func @_lstm_fused_kernel(%arg0: i32, %arg1: i32, %arg2: memref<8x8x16xbf16, #tpu.memory_space<vmem>>, %arg3: memref<16x512xbf16, #tpu.memory_space<vmem>>, %arg4: memref<128x512xbf16, #tpu.memory_space<vmem>>, %arg5: memref<1x512xf32, #tpu.memory_space<vmem>>, %arg6: memref<8x8x128xbf16, #tpu.memory_space<vmem>>, %arg7: memref<8x128xf32, #tpu.memory_space<vmem>>, %arg8: memref<8x128xf32, #tpu.memory_space<vmem>>) attributes {dimension_semantics = [#tpu.dimension_semantics<parallel>, #tpu.dimension_semantics<arbitrary>], iteration_bounds = array<i64: 1, 1>, scalar_prefetch = 0 : i64, scratch_operands = 2 : i64, tpu.core_type = #tpu.core_type<tc>, window_params = [{transform_indices = @transform_0, window_bounds = array<i64: 8, 8, 16>}, {pipeline_mode = #tpu.pipeline_mode<synchronous>, transform_indices = @transform_1, window_bounds = array<i64: 16, 512>}, {pipeline_mode = #tpu.pipeline_mode<synchronous>, transform_indices = @transform_2, window_bounds = array<i64: 128, 512>}, {pipeline_mode = #tpu.pipeline_mode<synchronous>, transform_indices = @transform_3, window_bounds = array<i64: 1, 512>}, {transform_indices = @transform_4, window_bounds = array<i64: 8, 8, 128>}]} {
    %c0_i32 = arith.constant 0 : i32
    %0 = arith.cmpi eq, %arg1, %c0_i32 : i32
    %1 = arith.extui %0 : i1 to i32
    %c0_i32_0 = arith.constant 0 : i32
    %2 = arith.cmpi ne, %1, %c0_i32_0 : i32
    scf.if %2 {
      %cst_86 = arith.constant 0.000000e+00 : f32
      %316 = vector.broadcast %cst_86 : f32 to vector<8x128xf32>
      %c0_87 = arith.constant 0 : index
      %c0_88 = arith.constant 0 : index
      %317 = vector.load %arg7[%c0_87, %c0_88] : memref<8x128xf32, #tpu.memory_space<vmem>>, vector<8x128xf32>
      tpu.vector_store %arg7[%c0_87, %c0_88], %316 {strides = array<i32>} : memref<8x128xf32, #tpu.memory_space<vmem>>, vector<8x128xf32>,
      %cst_89 = arith.constant 0.000000e+00 : f32
      %318 = vector.broadcast %cst_89 : f32 to vector<8x128xf32>
      %c0_90 = arith.constant 0 : index
      %c0_91 = arith.constant 0 : index
      %319 = vector.load %arg8[%c0_90, %c0_91] : memref<8x128xf32, #tpu.memory_space<vmem>>, vector<8x128xf32>
      tpu.vector_store %arg8[%c0_90, %c0_91], %318 {strides = array<i32>} : memref<8x128xf32, #tpu.memory_space<vmem>>, vector<8x128xf32>,
    } else {
    }
    %c0 = arith.constant 0 : index
    %c0_1 = arith.constant 0 : index
    %3 = vector.load %arg3[%c0, %c0_1] : memref<16x512xbf16, #tpu.memory_space<vmem>>, vector<16x512xbf16>
    %c0_2 = arith.constant 0 : index
    %c0_3 = arith.constant 0 : index
    %4 = vector.load %arg4[%c0_2, %c0_3] : memref<128x512xbf16, #tpu.memory_space<vmem>>, vector<128x512xbf16>
    %c0_4 = arith.constant 0 : index
    %c0_5 = arith.constant 0 : index
    %5 = vector.load %arg5[%c0_4, %c0_5] : memref<1x512xf32, #tpu.memory_space<vmem>>, vector<1x512xf32>
    %6 = vector.shape_cast %5 : vector<1x512xf32> to vector<1x512xf32>
    %7 = vector.broadcast %6 : vector<1x512xf32> to vector<8x512xf32>
    %c0_6 = arith.constant 0 : index
    %c0_7 = arith.constant 0 : index
    %8 = vector.load %arg7[%c0_6, %c0_7] : memref<8x128xf32, #tpu.memory_space<vmem>>, vector<8x128xf32>
    %c0_8 = arith.constant 0 : index
    %c0_9 = arith.constant 0 : index
    %9 = vector.load %arg8[%c0_8, %c0_9] : memref<8x128xf32, #tpu.memory_space<vmem>>, vector<8x128xf32>
    %c0_i32_10 = arith.constant 0 : i32
    %10 = arith.index_cast %c0_i32_10 : i32 to index
    %c0_11 = arith.constant 0 : index
    %c0_12 = arith.constant 0 : index
    %11 = vector.load %arg2[%10, %c0_11, %c0_12] : memref<8x8x16xbf16, #tpu.memory_space<vmem>>, vector<1x8x16xbf16>
    %12 = vector.shape_cast %11 : vector<1x8x16xbf16> to vector<8x16xbf16>
    %cst = arith.constant dense<0.000000e+00> : vector<8x512xf32>
    %13 = tpu.matmul %12, %3, %cst {dimension_numbers = #tpu.dot_dimension_numbers<[1], [0], [0], [1], [0, 0, 1, 1], [], []>} : vector<8x16xbf16>, vector<16x512xbf16>, vector<8x512xf32> -> vector<8x512xf32>
    %14 = arith.truncf %8 : vector<8x128xf32> to vector<8x128xbf16>
    %cst_13 = arith.constant dense<0.000000e+00> : vector<8x512xf32>
    %15 = tpu.matmul %14, %4, %cst_13 {dimension_numbers = #tpu.dot_dimension_numbers<[1], [0], [0], [1], [0, 0, 1, 1], [], []>} : vector<8x128xbf16>, vector<128x512xbf16>, vector<8x512xf32> -> vector<8x512xf32>
    %16 = arith.addf %13, %7 : vector<8x512xf32>
    %17 = arith.addf %16, %15 : vector<8x512xf32>
    %18 = vector.extract_strided_slice %17 {offsets = [0, 0], sizes = [8, 128], strides = [1, 1]} : vector<8x512xf32> to vector<8x128xf32>
    %19 = arith.negf %18 : vector<8x128xf32>
    %20 = math.exp %19 : vector<8x128xf32>
    %cst_14 = arith.constant 1.000000e+00 : f32
    %21 = vector.broadcast %cst_14 : f32 to vector<8x128xf32>
    %22 = arith.addf %21, %20 : vector<8x128xf32>
    %23 = arith.divf %21, %22 : vector<8x128xf32>
    %24 = vector.extract_strided_slice %17 {offsets = [0, 128], sizes = [8, 128], strides = [1, 1]} : vector<8x512xf32> to vector<8x128xf32>
    %25 = arith.negf %24 : vector<8x128xf32>
    %26 = math.exp %25 : vector<8x128xf32>
    %cst_15 = arith.constant 1.000000e+00 : f32
    %27 = vector.broadcast %cst_15 : f32 to vector<8x128xf32>
    %28 = arith.addf %27, %26 : vector<8x128xf32>
    %29 = arith.divf %27, %28 : vector<8x128xf32>
    %30 = vector.extract_strided_slice %17 {offsets = [0, 256], sizes = [8, 128], strides = [1, 1]} : vector<8x512xf32> to vector<8x128xf32>
    %31 = math.tanh %30 : vector<8x128xf32>
    %32 = vector.extract_strided_slice %17 {offsets = [0, 384], sizes = [8, 128], strides = [1, 1]} : vector<8x512xf32> to vector<8x128xf32>
    %33 = arith.negf %32 : vector<8x128xf32>
    %34 = math.exp %33 : vector<8x128xf32>
    %cst_16 = arith.constant 1.000000e+00 : f32
    %35 = vector.broadcast %cst_16 : f32 to vector<8x128xf32>
    %36 = arith.addf %35, %34 : vector<8x128xf32>
    %37 = arith.divf %35, %36 : vector<8x128xf32>
    %38 = arith.mulf %29, %9 : vector<8x128xf32>
    %39 = arith.mulf %23, %31 : vector<8x128xf32>
    %40 = arith.addf %38, %39 : vector<8x128xf32>
    %41 = math.tanh %40 : vector<8x128xf32>
    %42 = arith.mulf %37, %41 : vector<8x128xf32>
    %43 = arith.truncf %42 : vector<8x128xf32> to vector<8x128xbf16>
    %44 = arith.index_cast %c0_i32_10 : i32 to index
    %c0_17 = arith.constant 0 : index
    %c0_18 = arith.constant 0 : index
    %45 = vector.load %arg6[%44, %c0_17, %c0_18] : memref<8x8x128xbf16, #tpu.memory_space<vmem>>, vector<1x8x128xbf16>
    %46 = vector.shape_cast %45 : vector<1x8x128xbf16> to vector<8x128xbf16>
    %47 = vector.shape_cast %43 : vector<8x128xbf16> to vector<1x8x128xbf16>
    tpu.vector_store %arg6[%44, %c0_17, %c0_18], %47 {strides = array<i32>} : memref<8x8x128xbf16, #tpu.memory_space<vmem>>, vector<1x8x128xbf16>,
    %c1_i32 = arith.constant 1 : i32
    %48 = arith.index_cast %c1_i32 : i32 to index
    %c0_19 = arith.constant 0 : index
    %c0_20 = arith.constant 0 : index
    %49 = vector.load %arg2[%48, %c0_19, %c0_20] : memref<8x8x16xbf16, #tpu.memory_space<vmem>>, vector<1x8x16xbf16>
    %50 = vector.shape_cast %49 : vector<1x8x16xbf16> to vector<8x16xbf16>
    %cst_21 = arith.constant dense<0.000000e+00> : vector<8x512xf32>
    %51 = tpu.matmul %50, %3, %cst_21 {dimension_numbers = #tpu.dot_dimension_numbers<[1], [0], [0], [1], [0, 0, 1, 1], [], []>} : vector<8x16xbf16>, vector<16x512xbf16>, vector<8x512xf32> -> vector<8x512xf32>
    %52 = arith.truncf %42 : vector<8x128xf32> to vector<8x128xbf16>
    %cst_22 = arith.constant dense<0.000000e+00> : vector<8x512xf32>
    %53 = tpu.matmul %52, %4, %cst_22 {dimension_numbers = #tpu.dot_dimension_numbers<[1], [0], [0], [1], [0, 0, 1, 1], [], []>} : vector<8x128xbf16>, vector<128x512xbf16>, vector<8x512xf32> -> vector<8x512xf32>
    %54 = arith.addf %51, %7 : vector<8x512xf32>
    %55 = arith.addf %54, %53 : vector<8x512xf32>
    %56 = vector.extract_strided_slice %55 {offsets = [0, 0], sizes = [8, 128], strides = [1, 1]} : vector<8x512xf32> to vector<8x128xf32>
    %57 = arith.negf %56 : vector<8x128xf32>
    %58 = math.exp %57 : vector<8x128xf32>
    %cst_23 = arith.constant 1.000000e+00 : f32
    %59 = vector.broadcast %cst_23 : f32 to vector<8x128xf32>
    %60 = arith.addf %59, %58 : vector<8x128xf32>
    %61 = arith.divf %59, %60 : vector<8x128xf32>
    %62 = vector.extract_strided_slice %55 {offsets = [0, 128], sizes = [8, 128], strides = [1, 1]} : vector<8x512xf32> to vector<8x128xf32>
    %63 = arith.negf %62 : vector<8x128xf32>
    %64 = math.exp %63 : vector<8x128xf32>
    %cst_24 = arith.constant 1.000000e+00 : f32
    %65 = vector.broadcast %cst_24 : f32 to vector<8x128xf32>
    %66 = arith.addf %65, %64 : vector<8x128xf32>
    %67 = arith.divf %65, %66 : vector<8x128xf32>
    %68 = vector.extract_strided_slice %55 {offsets = [0, 256], sizes = [8, 128], strides = [1, 1]} : vector<8x512xf32> to vector<8x128xf32>
    %69 = math.tanh %68 : vector<8x128xf32>
    %70 = vector.extract_strided_slice %55 {offsets = [0, 384], sizes = [8, 128], strides = [1, 1]} : vector<8x512xf32> to vector<8x128xf32>
    %71 = arith.negf %70 : vector<8x128xf32>
    %72 = math.exp %71 : vector<8x128xf32>
    %cst_25 = arith.constant 1.000000e+00 : f32
    %73 = vector.broadcast %cst_25 : f32 to vector<8x128xf32>
    %74 = arith.addf %73, %72 : vector<8x128xf32>
    %75 = arith.divf %73, %74 : vector<8x128xf32>
    %76 = arith.mulf %67, %40 : vector<8x128xf32>
    %77 = arith.mulf %61, %69 : vector<8x128xf32>
    %78 = arith.addf %76, %77 : vector<8x128xf32>
    %79 = math.tanh %78 : vector<8x128xf32>
    %80 = arith.mulf %75, %79 : vector<8x128xf32>
    %81 = arith.truncf %80 : vector<8x128xf32> to vector<8x128xbf16>
    %82 = arith.index_cast %c1_i32 : i32 to index
    %c0_26 = arith.constant 0 : index
    %c0_27 = arith.constant 0 : index
    %83 = vector.load %arg6[%82, %c0_26, %c0_27] : memref<8x8x128xbf16, #tpu.memory_space<vmem>>, vector<1x8x128xbf16>
    %84 = vector.shape_cast %83 : vector<1x8x128xbf16> to vector<8x128xbf16>
    %85 = vector.shape_cast %81 : vector<8x128xbf16> to vector<1x8x128xbf16>
    tpu.vector_store %arg6[%82, %c0_26, %c0_27], %85 {strides = array<i32>} : memref<8x8x128xbf16, #tpu.memory_space<vmem>>, vector<1x8x128xbf16>,
    %c2_i32 = arith.constant 2 : i32
    %86 = arith.index_cast %c2_i32 : i32 to index
    %c0_28 = arith.constant 0 : index
    %c0_29 = arith.constant 0 : index
    %87 = vector.load %arg2[%86, %c0_28, %c0_29] : memref<8x8x16xbf16, #tpu.memory_space<vmem>>, vector<1x8x16xbf16>
    %88 = vector.shape_cast %87 : vector<1x8x16xbf16> to vector<8x16xbf16>
    %cst_30 = arith.constant dense<0.000000e+00> : vector<8x512xf32>
    %89 = tpu.matmul %88, %3, %cst_30 {dimension_numbers = #tpu.dot_dimension_numbers<[1], [0], [0], [1], [0, 0, 1, 1], [], []>} : vector<8x16xbf16>, vector<16x512xbf16>, vector<8x512xf32> -> vector<8x512xf32>
    %90 = arith.truncf %80 : vector<8x128xf32> to vector<8x128xbf16>
    %cst_31 = arith.constant dense<0.000000e+00> : vector<8x512xf32>
    %91 = tpu.matmul %90, %4, %cst_31 {dimension_numbers = #tpu.dot_dimension_numbers<[1], [0], [0], [1], [0, 0, 1, 1], [], []>} : vector<8x128xbf16>, vector<128x512xbf16>, vector<8x512xf32> -> vector<8x512xf32>
    %92 = arith.addf %89, %7 : vector<8x512xf32>
    %93 = arith.addf %92, %91 : vector<8x512xf32>
    %94 = vector.extract_strided_slice %93 {offsets = [0, 0], sizes = [8, 128], strides = [1, 1]} : vector<8x512xf32> to vector<8x128xf32>
    %95 = arith.negf %94 : vector<8x128xf32>
    %96 = math.exp %95 : vector<8x128xf32>
    %cst_32 = arith.constant 1.000000e+00 : f32
    %97 = vector.broadcast %cst_32 : f32 to vector<8x128xf32>
    %98 = arith.addf %97, %96 : vector<8x128xf32>
    %99 = arith.divf %97, %98 : vector<8x128xf32>
    %100 = vector.extract_strided_slice %93 {offsets = [0, 128], sizes = [8, 128], strides = [1, 1]} : vector<8x512xf32> to vector<8x128xf32>
    %101 = arith.negf %100 : vector<8x128xf32>
    %102 = math.exp %101 : vector<8x128xf32>
    %cst_33 = arith.constant 1.000000e+00 : f32
    %103 = vector.broadcast %cst_33 : f32 to vector<8x128xf32>
    %104 = arith.addf %103, %102 : vector<8x128xf32>
    %105 = arith.divf %103, %104 : vector<8x128xf32>
    %106 = vector.extract_strided_slice %93 {offsets = [0, 256], sizes = [8, 128], strides = [1, 1]} : vector<8x512xf32> to vector<8x128xf32>
    %107 = math.tanh %106 : vector<8x128xf32>
    %108 = vector.extract_strided_slice %93 {offsets = [0, 384], sizes = [8, 128], strides = [1, 1]} : vector<8x512xf32> to vector<8x128xf32>
    %109 = arith.negf %108 : vector<8x128xf32>
    %110 = math.exp %109 : vector<8x128xf32>
    %cst_34 = arith.constant 1.000000e+00 : f32
    %111 = vector.broadcast %cst_34 : f32 to vector<8x128xf32>
    %112 = arith.addf %111, %110 : vector<8x128xf32>
    %113 = arith.divf %111, %112 : vector<8x128xf32>
    %114 = arith.mulf %105, %78 : vector<8x128xf32>
    %115 = arith.mulf %99, %107 : vector<8x128xf32>
    %116 = arith.addf %114, %115 : vector<8x128xf32>
    %117 = math.tanh %116 : vector<8x128xf32>
    %118 = arith.mulf %113, %117 : vector<8x128xf32>
    %119 = arith.truncf %118 : vector<8x128xf32> to vector<8x128xbf16>
    %120 = arith.index_cast %c2_i32 : i32 to index
    %c0_35 = arith.constant 0 : index
    %c0_36 = arith.constant 0 : index
    %121 = vector.load %arg6[%120, %c0_35, %c0_36] : memref<8x8x128xbf16, #tpu.memory_space<vmem>>, vector<1x8x128xbf16>
    %122 = vector.shape_cast %121 : vector<1x8x128xbf16> to vector<8x128xbf16>
    %123 = vector.shape_cast %119 : vector<8x128xbf16> to vector<1x8x128xbf16>
    tpu.vector_store %arg6[%120, %c0_35, %c0_36], %123 {strides = array<i32>} : memref<8x8x128xbf16, #tpu.memory_space<vmem>>, vector<1x8x128xbf16>,
    %c3_i32 = arith.constant 3 : i32
    %124 = arith.index_cast %c3_i32 : i32 to index
    %c0_37 = arith.constant 0 : index
    %c0_38 = arith.constant 0 : index
    %125 = vector.load %arg2[%124, %c0_37, %c0_38] : memref<8x8x16xbf16, #tpu.memory_space<vmem>>, vector<1x8x16xbf16>
    %126 = vector.shape_cast %125 : vector<1x8x16xbf16> to vector<8x16xbf16>
    %cst_39 = arith.constant dense<0.000000e+00> : vector<8x512xf32>
    %127 = tpu.matmul %126, %3, %cst_39 {dimension_numbers = #tpu.dot_dimension_numbers<[1], [0], [0], [1], [0, 0, 1, 1], [], []>} : vector<8x16xbf16>, vector<16x512xbf16>, vector<8x512xf32> -> vector<8x512xf32>
    %128 = arith.truncf %118 : vector<8x128xf32> to vector<8x128xbf16>
    %cst_40 = arith.constant dense<0.000000e+00> : vector<8x512xf32>
    %129 = tpu.matmul %128, %4, %cst_40 {dimension_numbers = #tpu.dot_dimension_numbers<[1], [0], [0], [1], [0, 0, 1, 1], [], []>} : vector<8x128xbf16>, vector<128x512xbf16>, vector<8x512xf32> -> vector<8x512xf32>
    %130 = arith.addf %127, %7 : vector<8x512xf32>
    %131 = arith.addf %130, %129 : vector<8x512xf32>
    %132 = vector.extract_strided_slice %131 {offsets = [0, 0], sizes = [8, 128], strides = [1, 1]} : vector<8x512xf32> to vector<8x128xf32>
    %133 = arith.negf %132 : vector<8x128xf32>
    %134 = math.exp %133 : vector<8x128xf32>
    %cst_41 = arith.constant 1.000000e+00 : f32
    %135 = vector.broadcast %cst_41 : f32 to vector<8x128xf32>
    %136 = arith.addf %135, %134 : vector<8x128xf32>
    %137 = arith.divf %135, %136 : vector<8x128xf32>
    %138 = vector.extract_strided_slice %131 {offsets = [0, 128], sizes = [8, 128], strides = [1, 1]} : vector<8x512xf32> to vector<8x128xf32>
    %139 = arith.negf %138 : vector<8x128xf32>
    %140 = math.exp %139 : vector<8x128xf32>
    %cst_42 = arith.constant 1.000000e+00 : f32
    %141 = vector.broadcast %cst_42 : f32 to vector<8x128xf32>
    %142 = arith.addf %141, %140 : vector<8x128xf32>
    %143 = arith.divf %141, %142 : vector<8x128xf32>
    %144 = vector.extract_strided_slice %131 {offsets = [0, 256], sizes = [8, 128], strides = [1, 1]} : vector<8x512xf32> to vector<8x128xf32>
    %145 = math.tanh %144 : vector<8x128xf32>
    %146 = vector.extract_strided_slice %131 {offsets = [0, 384], sizes = [8, 128], strides = [1, 1]} : vector<8x512xf32> to vector<8x128xf32>
    %147 = arith.negf %146 : vector<8x128xf32>
    %148 = math.exp %147 : vector<8x128xf32>
    %cst_43 = arith.constant 1.000000e+00 : f32
    %149 = vector.broadcast %cst_43 : f32 to vector<8x128xf32>
    %150 = arith.addf %149, %148 : vector<8x128xf32>
    %151 = arith.divf %149, %150 : vector<8x128xf32>
    %152 = arith.mulf %143, %116 : vector<8x128xf32>
    %153 = arith.mulf %137, %145 : vector<8x128xf32>
    %154 = arith.addf %152, %153 : vector<8x128xf32>
    %155 = math.tanh %154 : vector<8x128xf32>
    %156 = arith.mulf %151, %155 : vector<8x128xf32>
    %157 = arith.truncf %156 : vector<8x128xf32> to vector<8x128xbf16>
    %158 = arith.index_cast %c3_i32 : i32 to index
    %c0_44 = arith.constant 0 : index
    %c0_45 = arith.constant 0 : index
    %159 = vector.load %arg6[%158, %c0_44, %c0_45] : memref<8x8x128xbf16, #tpu.memory_space<vmem>>, vector<1x8x128xbf16>
    %160 = vector.shape_cast %159 : vector<1x8x128xbf16> to vector<8x128xbf16>
    %161 = vector.shape_cast %157 : vector<8x128xbf16> to vector<1x8x128xbf16>
    tpu.vector_store %arg6[%158, %c0_44, %c0_45], %161 {strides = array<i32>} : memref<8x8x128xbf16, #tpu.memory_space<vmem>>, vector<1x8x128xbf16>,
    %c4_i32 = arith.constant 4 : i32
    %162 = arith.index_cast %c4_i32 : i32 to index
    %c0_46 = arith.constant 0 : index
    %c0_47 = arith.constant 0 : index
    %163 = vector.load %arg2[%162, %c0_46, %c0_47] : memref<8x8x16xbf16, #tpu.memory_space<vmem>>, vector<1x8x16xbf16>
    %164 = vector.shape_cast %163 : vector<1x8x16xbf16> to vector<8x16xbf16>
    %cst_48 = arith.constant dense<0.000000e+00> : vector<8x512xf32>
    %165 = tpu.matmul %164, %3, %cst_48 {dimension_numbers = #tpu.dot_dimension_numbers<[1], [0], [0], [1], [0, 0, 1, 1], [], []>} : vector<8x16xbf16>, vector<16x512xbf16>, vector<8x512xf32> -> vector<8x512xf32>
    %166 = arith.truncf %156 : vector<8x128xf32> to vector<8x128xbf16>
    %cst_49 = arith.constant dense<0.000000e+00> : vector<8x512xf32>
    %167 = tpu.matmul %166, %4, %cst_49 {dimension_numbers = #tpu.dot_dimension_numbers<[1], [0], [0], [1], [0, 0, 1, 1], [], []>} : vector<8x128xbf16>, vector<128x512xbf16>, vector<8x512xf32> -> vector<8x512xf32>
    %168 = arith.addf %165, %7 : vector<8x512xf32>
    %169 = arith.addf %168, %167 : vector<8x512xf32>
    %170 = vector.extract_strided_slice %169 {offsets = [0, 0], sizes = [8, 128], strides = [1, 1]} : vector<8x512xf32> to vector<8x128xf32>
    %171 = arith.negf %170 : vector<8x128xf32>
    %172 = math.exp %171 : vector<8x128xf32>
    %cst_50 = arith.constant 1.000000e+00 : f32
    %173 = vector.broadcast %cst_50 : f32 to vector<8x128xf32>
    %174 = arith.addf %173, %172 : vector<8x128xf32>
    %175 = arith.divf %173, %174 : vector<8x128xf32>
    %176 = vector.extract_strided_slice %169 {offsets = [0, 128], sizes = [8, 128], strides = [1, 1]} : vector<8x512xf32> to vector<8x128xf32>
    %177 = arith.negf %176 : vector<8x128xf32>
    %178 = math.exp %177 : vector<8x128xf32>
    %cst_51 = arith.constant 1.000000e+00 : f32
    %179 = vector.broadcast %cst_51 : f32 to vector<8x128xf32>
    %180 = arith.addf %179, %178 : vector<8x128xf32>
    %181 = arith.divf %179, %180 : vector<8x128xf32>
    %182 = vector.extract_strided_slice %169 {offsets = [0, 256], sizes = [8, 128], strides = [1, 1]} : vector<8x512xf32> to vector<8x128xf32>
    %183 = math.tanh %182 : vector<8x128xf32>
    %184 = vector.extract_strided_slice %169 {offsets = [0, 384], sizes = [8, 128], strides = [1, 1]} : vector<8x512xf32> to vector<8x128xf32>
    %185 = arith.negf %184 : vector<8x128xf32>
    %186 = math.exp %185 : vector<8x128xf32>
    %cst_52 = arith.constant 1.000000e+00 : f32
    %187 = vector.broadcast %cst_52 : f32 to vector<8x128xf32>
    %188 = arith.addf %187, %186 : vector<8x128xf32>
    %189 = arith.divf %187, %188 : vector<8x128xf32>
    %190 = arith.mulf %181, %154 : vector<8x128xf32>
    %191 = arith.mulf %175, %183 : vector<8x128xf32>
    %192 = arith.addf %190, %191 : vector<8x128xf32>
    %193 = math.tanh %192 : vector<8x128xf32>
    %194 = arith.mulf %189, %193 : vector<8x128xf32>
    %195 = arith.truncf %194 : vector<8x128xf32> to vector<8x128xbf16>
    %196 = arith.index_cast %c4_i32 : i32 to index
    %c0_53 = arith.constant 0 : index
    %c0_54 = arith.constant 0 : index
    %197 = vector.load %arg6[%196, %c0_53, %c0_54] : memref<8x8x128xbf16, #tpu.memory_space<vmem>>, vector<1x8x128xbf16>
    %198 = vector.shape_cast %197 : vector<1x8x128xbf16> to vector<8x128xbf16>
    %199 = vector.shape_cast %195 : vector<8x128xbf16> to vector<1x8x128xbf16>
    tpu.vector_store %arg6[%196, %c0_53, %c0_54], %199 {strides = array<i32>} : memref<8x8x128xbf16, #tpu.memory_space<vmem>>, vector<1x8x128xbf16>,
    %c5_i32 = arith.constant 5 : i32
    %200 = arith.index_cast %c5_i32 : i32 to index
    %c0_55 = arith.constant 0 : index
    %c0_56 = arith.constant 0 : index
    %201 = vector.load %arg2[%200, %c0_55, %c0_56] : memref<8x8x16xbf16, #tpu.memory_space<vmem>>, vector<1x8x16xbf16>
    %202 = vector.shape_cast %201 : vector<1x8x16xbf16> to vector<8x16xbf16>
    %cst_57 = arith.constant dense<0.000000e+00> : vector<8x512xf32>
    %203 = tpu.matmul %202, %3, %cst_57 {dimension_numbers = #tpu.dot_dimension_numbers<[1], [0], [0], [1], [0, 0, 1, 1], [], []>} : vector<8x16xbf16>, vector<16x512xbf16>, vector<8x512xf32> -> vector<8x512xf32>
    %204 = arith.truncf %194 : vector<8x128xf32> to vector<8x128xbf16>
    %cst_58 = arith.constant dense<0.000000e+00> : vector<8x512xf32>
    %205 = tpu.matmul %204, %4, %cst_58 {dimension_numbers = #tpu.dot_dimension_numbers<[1], [0], [0], [1], [0, 0, 1, 1], [], []>} : vector<8x128xbf16>, vector<128x512xbf16>, vector<8x512xf32> -> vector<8x512xf32>
    %206 = arith.addf %203, %7 : vector<8x512xf32>
    %207 = arith.addf %206, %205 : vector<8x512xf32>
    %208 = vector.extract_strided_slice %207 {offsets = [0, 0], sizes = [8, 128], strides = [1, 1]} : vector<8x512xf32> to vector<8x128xf32>
    %209 = arith.negf %208 : vector<8x128xf32>
    %210 = math.exp %209 : vector<8x128xf32>
    %cst_59 = arith.constant 1.000000e+00 : f32
    %211 = vector.broadcast %cst_59 : f32 to vector<8x128xf32>
    %212 = arith.addf %211, %210 : vector<8x128xf32>
    %213 = arith.divf %211, %212 : vector<8x128xf32>
    %214 = vector.extract_strided_slice %207 {offsets = [0, 128], sizes = [8, 128], strides = [1, 1]} : vector<8x512xf32> to vector<8x128xf32>
    %215 = arith.negf %214 : vector<8x128xf32>
    %216 = math.exp %215 : vector<8x128xf32>
    %cst_60 = arith.constant 1.000000e+00 : f32
    %217 = vector.broadcast %cst_60 : f32 to vector<8x128xf32>
    %218 = arith.addf %217, %216 : vector<8x128xf32>
    %219 = arith.divf %217, %218 : vector<8x128xf32>
    %220 = vector.extract_strided_slice %207 {offsets = [0, 256], sizes = [8, 128], strides = [1, 1]} : vector<8x512xf32> to vector<8x128xf32>
    %221 = math.tanh %220 : vector<8x128xf32>
    %222 = vector.extract_strided_slice %207 {offsets = [0, 384], sizes = [8, 128], strides = [1, 1]} : vector<8x512xf32> to vector<8x128xf32>
    %223 = arith.negf %222 : vector<8x128xf32>
    %224 = math.exp %223 : vector<8x128xf32>
    %cst_61 = arith.constant 1.000000e+00 : f32
    %225 = vector.broadcast %cst_61 : f32 to vector<8x128xf32>
    %226 = arith.addf %225, %224 : vector<8x128xf32>
    %227 = arith.divf %225, %226 : vector<8x128xf32>
    %228 = arith.mulf %219, %192 : vector<8x128xf32>
    %229 = arith.mulf %213, %221 : vector<8x128xf32>
    %230 = arith.addf %228, %229 : vector<8x128xf32>
    %231 = math.tanh %230 : vector<8x128xf32>
    %232 = arith.mulf %227, %231 : vector<8x128xf32>
    %233 = arith.truncf %232 : vector<8x128xf32> to vector<8x128xbf16>
    %234 = arith.index_cast %c5_i32 : i32 to index
    %c0_62 = arith.constant 0 : index
    %c0_63 = arith.constant 0 : index
    %235 = vector.load %arg6[%234, %c0_62, %c0_63] : memref<8x8x128xbf16, #tpu.memory_space<vmem>>, vector<1x8x128xbf16>
    %236 = vector.shape_cast %235 : vector<1x8x128xbf16> to vector<8x128xbf16>
    %237 = vector.shape_cast %233 : vector<8x128xbf16> to vector<1x8x128xbf16>
    tpu.vector_store %arg6[%234, %c0_62, %c0_63], %237 {strides = array<i32>} : memref<8x8x128xbf16, #tpu.memory_space<vmem>>, vector<1x8x128xbf16>,
    %c6_i32 = arith.constant 6 : i32
    %238 = arith.index_cast %c6_i32 : i32 to index
    %c0_64 = arith.constant 0 : index
    %c0_65 = arith.constant 0 : index
    %239 = vector.load %arg2[%238, %c0_64, %c0_65] : memref<8x8x16xbf16, #tpu.memory_space<vmem>>, vector<1x8x16xbf16>
    %240 = vector.shape_cast %239 : vector<1x8x16xbf16> to vector<8x16xbf16>
    %cst_66 = arith.constant dense<0.000000e+00> : vector<8x512xf32>
    %241 = tpu.matmul %240, %3, %cst_66 {dimension_numbers = #tpu.dot_dimension_numbers<[1], [0], [0], [1], [0, 0, 1, 1], [], []>} : vector<8x16xbf16>, vector<16x512xbf16>, vector<8x512xf32> -> vector<8x512xf32>
    %242 = arith.truncf %232 : vector<8x128xf32> to vector<8x128xbf16>
    %cst_67 = arith.constant dense<0.000000e+00> : vector<8x512xf32>
    %243 = tpu.matmul %242, %4, %cst_67 {dimension_numbers = #tpu.dot_dimension_numbers<[1], [0], [0], [1], [0, 0, 1, 1], [], []>} : vector<8x128xbf16>, vector<128x512xbf16>, vector<8x512xf32> -> vector<8x512xf32>
    %244 = arith.addf %241, %7 : vector<8x512xf32>
    %245 = arith.addf %244, %243 : vector<8x512xf32>
    %246 = vector.extract_strided_slice %245 {offsets = [0, 0], sizes = [8, 128], strides = [1, 1]} : vector<8x512xf32> to vector<8x128xf32>
    %247 = arith.negf %246 : vector<8x128xf32>
    %248 = math.exp %247 : vector<8x128xf32>
    %cst_68 = arith.constant 1.000000e+00 : f32
    %249 = vector.broadcast %cst_68 : f32 to vector<8x128xf32>
    %250 = arith.addf %249, %248 : vector<8x128xf32>
    %251 = arith.divf %249, %250 : vector<8x128xf32>
    %252 = vector.extract_strided_slice %245 {offsets = [0, 128], sizes = [8, 128], strides = [1, 1]} : vector<8x512xf32> to vector<8x128xf32>
    %253 = arith.negf %252 : vector<8x128xf32>
    %254 = math.exp %253 : vector<8x128xf32>
    %cst_69 = arith.constant 1.000000e+00 : f32
    %255 = vector.broadcast %cst_69 : f32 to vector<8x128xf32>
    %256 = arith.addf %255, %254 : vector<8x128xf32>
    %257 = arith.divf %255, %256 : vector<8x128xf32>
    %258 = vector.extract_strided_slice %245 {offsets = [0, 256], sizes = [8, 128], strides = [1, 1]} : vector<8x512xf32> to vector<8x128xf32>
    %259 = math.tanh %258 : vector<8x128xf32>
    %260 = vector.extract_strided_slice %245 {offsets = [0, 384], sizes = [8, 128], strides = [1, 1]} : vector<8x512xf32> to vector<8x128xf32>
    %261 = arith.negf %260 : vector<8x128xf32>
    %262 = math.exp %261 : vector<8x128xf32>
    %cst_70 = arith.constant 1.000000e+00 : f32
    %263 = vector.broadcast %cst_70 : f32 to vector<8x128xf32>
    %264 = arith.addf %263, %262 : vector<8x128xf32>
    %265 = arith.divf %263, %264 : vector<8x128xf32>
    %266 = arith.mulf %257, %230 : vector<8x128xf32>
    %267 = arith.mulf %251, %259 : vector<8x128xf32>
    %268 = arith.addf %266, %267 : vector<8x128xf32>
    %269 = math.tanh %268 : vector<8x128xf32>
    %270 = arith.mulf %265, %269 : vector<8x128xf32>
    %271 = arith.truncf %270 : vector<8x128xf32> to vector<8x128xbf16>
    %272 = arith.index_cast %c6_i32 : i32 to index
    %c0_71 = arith.constant 0 : index
    %c0_72 = arith.constant 0 : index
    %273 = vector.load %arg6[%272, %c0_71, %c0_72] : memref<8x8x128xbf16, #tpu.memory_space<vmem>>, vector<1x8x128xbf16>
    %274 = vector.shape_cast %273 : vector<1x8x128xbf16> to vector<8x128xbf16>
    %275 = vector.shape_cast %271 : vector<8x128xbf16> to vector<1x8x128xbf16>
    tpu.vector_store %arg6[%272, %c0_71, %c0_72], %275 {strides = array<i32>} : memref<8x8x128xbf16, #tpu.memory_space<vmem>>, vector<1x8x128xbf16>,
    %c7_i32 = arith.constant 7 : i32
    %276 = arith.index_cast %c7_i32 : i32 to index
    %c0_73 = arith.constant 0 : index
    %c0_74 = arith.constant 0 : index
    %277 = vector.load %arg2[%276, %c0_73, %c0_74] : memref<8x8x16xbf16, #tpu.memory_space<vmem>>, vector<1x8x16xbf16>
    %278 = vector.shape_cast %277 : vector<1x8x16xbf16> to vector<8x16xbf16>
    %cst_75 = arith.constant dense<0.000000e+00> : vector<8x512xf32>
    %279 = tpu.matmul %278, %3, %cst_75 {dimension_numbers = #tpu.dot_dimension_numbers<[1], [0], [0], [1], [0, 0, 1, 1], [], []>} : vector<8x16xbf16>, vector<16x512xbf16>, vector<8x512xf32> -> vector<8x512xf32>
    %280 = arith.truncf %270 : vector<8x128xf32> to vector<8x128xbf16>
    %cst_76 = arith.constant dense<0.000000e+00> : vector<8x512xf32>
    %281 = tpu.matmul %280, %4, %cst_76 {dimension_numbers = #tpu.dot_dimension_numbers<[1], [0], [0], [1], [0, 0, 1, 1], [], []>} : vector<8x128xbf16>, vector<128x512xbf16>, vector<8x512xf32> -> vector<8x512xf32>
    %282 = arith.addf %279, %7 : vector<8x512xf32>
    %283 = arith.addf %282, %281 : vector<8x512xf32>
    %284 = vector.extract_strided_slice %283 {offsets = [0, 0], sizes = [8, 128], strides = [1, 1]} : vector<8x512xf32> to vector<8x128xf32>
    %285 = arith.negf %284 : vector<8x128xf32>
    %286 = math.exp %285 : vector<8x128xf32>
    %cst_77 = arith.constant 1.000000e+00 : f32
    %287 = vector.broadcast %cst_77 : f32 to vector<8x128xf32>
    %288 = arith.addf %287, %286 : vector<8x128xf32>
    %289 = arith.divf %287, %288 : vector<8x128xf32>
    %290 = vector.extract_strided_slice %283 {offsets = [0, 128], sizes = [8, 128], strides = [1, 1]} : vector<8x512xf32> to vector<8x128xf32>
    %291 = arith.negf %290 : vector<8x128xf32>
    %292 = math.exp %291 : vector<8x128xf32>
    %cst_78 = arith.constant 1.000000e+00 : f32
    %293 = vector.broadcast %cst_78 : f32 to vector<8x128xf32>
    %294 = arith.addf %293, %292 : vector<8x128xf32>
    %295 = arith.divf %293, %294 : vector<8x128xf32>
    %296 = vector.extract_strided_slice %283 {offsets = [0, 256], sizes = [8, 128], strides = [1, 1]} : vector<8x512xf32> to vector<8x128xf32>
    %297 = math.tanh %296 : vector<8x128xf32>
    %298 = vector.extract_strided_slice %283 {offsets = [0, 384], sizes = [8, 128], strides = [1, 1]} : vector<8x512xf32> to vector<8x128xf32>
    %299 = arith.negf %298 : vector<8x128xf32>
    %300 = math.exp %299 : vector<8x128xf32>
    %cst_79 = arith.constant 1.000000e+00 : f32
    %301 = vector.broadcast %cst_79 : f32 to vector<8x128xf32>
    %302 = arith.addf %301, %300 : vector<8x128xf32>
    %303 = arith.divf %301, %302 : vector<8x128xf32>
    %304 = arith.mulf %295, %268 : vector<8x128xf32>
    %305 = arith.mulf %289, %297 : vector<8x128xf32>
    %306 = arith.addf %304, %305 : vector<8x128xf32>
    %307 = math.tanh %306 : vector<8x128xf32>
    %308 = arith.mulf %303, %307 : vector<8x128xf32>
    %309 = arith.truncf %308 : vector<8x128xf32> to vector<8x128xbf16>
    %310 = arith.index_cast %c7_i32 : i32 to index
    %c0_80 = arith.constant 0 : index
    %c0_81 = arith.constant 0 : index
    %311 = vector.load %arg6[%310, %c0_80, %c0_81] : memref<8x8x128xbf16, #tpu.memory_space<vmem>>, vector<1x8x128xbf16>
    %312 = vector.shape_cast %311 : vector<1x8x128xbf16> to vector<8x128xbf16>
    %313 = vector.shape_cast %309 : vector<8x128xbf16> to vector<1x8x128xbf16>
    tpu.vector_store %arg6[%310, %c0_80, %c0_81], %313 {strides = array<i32>} : memref<8x8x128xbf16, #tpu.memory_space<vmem>>, vector<1x8x128xbf16>,
    %c8_i32 = arith.constant 8 : i32
    %c0_82 = arith.constant 0 : index
    %c0_83 = arith.constant 0 : index
    %314 = vector.load %arg7[%c0_82, %c0_83] : memref<8x128xf32, #tpu.memory_space<vmem>>, vector<8x128xf32>
    tpu.vector_store %arg7[%c0_82, %c0_83], %308 {strides = array<i32>} : memref<8x128xf32, #tpu.memory_space<vmem>>, vector<8x128xf32>,
    %c0_84 = arith.constant 0 : index
    %c0_85 = arith.constant 0 : index
    %315 = vector.load %arg8[%c0_84, %c0_85] : memref<8x128xf32, #tpu.memory_space<vmem>>, vector<8x128xf32>
    tpu.vector_store %arg8[%c0_84, %c0_85], %306 {strides = array<i32>} : memref<8x128xf32, #tpu.memory_space<vmem>>, vector<8x128xf32>,
    return
  }
  func.func @transform_0(%arg0: i32, %arg1: i32) -> (i32, i32, i32) {
    %c0_i32 = arith.constant 0 : i32
    %c0_i32_0 = arith.constant 0 : i32
    return %arg1, %arg0, %c0_i32 : i32, i32, i32
  }
  func.func @transform_1(%arg0: i32, %arg1: i32) -> (i32, i32) {
    %c0_i32 = arith.constant 0 : i32
    %c0_i32_0 = arith.constant 0 : i32
    %c0_i32_1 = arith.constant 0 : i32
    return %c0_i32, %c0_i32_0 : i32, i32
  }
  func.func @transform_2(%arg0: i32, %arg1: i32) -> (i32, i32) {
    %c0_i32 = arith.constant 0 : i32
    %c0_i32_0 = arith.constant 0 : i32
    %c0_i32_1 = arith.constant 0 : i32
    return %c0_i32, %c0_i32_0 : i32, i32
  }
  func.func @transform_3(%arg0: i32, %arg1: i32) -> (i32, i32) {
    %c0_i32 = arith.constant 0 : i32
    %c0_i32_0 = arith.constant 0 : i32
    %c0_i32_1 = arith.constant 0 : i32
    return %c0_i32, %c0_i32_0 : i32, i32
  }
  func.func @transform_4(%arg0: i32, %arg1: i32) -> (i32, i32, i32) {
    %c0_i32 = arith.constant 0 : i32
    %c0_i32_0 = arith.constant 0 : i32
    return %arg1, %arg0, %c0_i32 : i32, i32, i32
  }
}

</mosaic_0001>

<bundles_post_ra>
// kernel: encoder_lstm_forward.2
= control target key start
LH: loop header
LB: loop body
LE: loop exit
PB: predicated region body
PF: predicated region fallthrough
CT: control target
= control target key end

     0   :  { %9 = vsyncpa [#allocation5], 0  ;;  %s2115_s18 = smov [#allocation4]   ;;  %s2116_s20 = smov 256   ;;  %s2682_s0 = inlined_call_operand.vmem [shape: bf16[8,8,16], index: 0, kind: input, shape index: {}]   ;;  %s2683_s1 = inlined_call_operand.vmem [shape: bf16[16,512], index: 1, kind: input, shape index: {}]   ;;  %s2684_s2 = inlined_call_operand.hbm [shape: bf16[128,512], index: 2, kind: input, shape index: {}]   ;;  %s2685_s3 = inlined_call_operand.vmem [shape: f32[1,512], index: 3, kind: input, shape index: {}]   ;;  %s2686_s4 = inlined_call_operand.vmem [shape: bf16[8,8,128], index: 4, kind: output, shape index: {}]  }
   0x1   :  { %s18_s17 = sshll.u32 %s2684_s2, 4  ;;  %s20_s19 = sshll.u32 %s2115_s18, 4  ;;  %s19_s17 = int_to_ptr.hbm [resolvable:$true] %s18_s17  ;;  %s21_s19 = int_to_ptr.vmem [resolvable:$true] %s20_s19 }
   0x2   :  { %s2117_s21 = smov 16  }
   0x3   :  { %26 = dma.hbm_to_vmem [thread:$0]  %s19_s17, 4096, %s21_s19, [#allocation5], %s2116_s20, %s2116_s20, %s2117_s21  }
   0x4   :  { %2113 = dma.done.wait [#allocation5], 4096  }
   0x5   :  { %2114 = vsyncadd [#allocation5], 4294963200  ;;  %v1821_v0 = vld [vmem:[#allocation4 + $0xe0] sm:$0xf]  ;;  %v1955_v1 = vld [vmem:[#allocation4 + $0xec] sm:$0xf0] }
   0x6   :  { %v1953_v2 = vld [vmem:[#allocation4 + $0xe4] sm:$0xf]  ;;  %v2147_v3 = vor.u32 %v1955_v1, %v1821_v0  ;;  %v1823_v4 = vld [vmem:[#allocation4 + $0xf0] sm:$0xf0]  ;;  %v1829_v5 = vld [vmem:[#allocation4 + $0xe8] sm:$0xf] }
   0x7   :  { %v1956_v6 = vld [vmem:[#allocation4 + $0xf4] sm:$0xf0]  ;;  %v2149_v7 = vor.u32 %v1953_v2, %v1823_v4  ;;  %v1954_v9 = vld [vmem:[#allocation4 + $0xec] sm:$0xf]  ;;  %v1831_v10 = vld [vmem:[#allocation4 + $0xf8] sm:$0xf0] }
   0x8   :  { %v2151_v8 = vor.u32 %v1956_v6, %v1829_v5  ;;  %v1805_v11 = vld [vmem:[#allocation4 + $0xc0] sm:$0xf]  ;;  %250 = vmatpush.bf16.msra.mxu0 %v2147_v3  ;;  %v2154_v12 = vor.u32 %v1954_v9, %v1831_v10  ;;  %v1951_v13 = vld [vmem:[#allocation4 + $0xcc] sm:$0xf0]  ;;  %v1949_v14 = vld [vmem:[#allocation4 + $0xc4] sm:$0xf] }
   0x9   :  { %v1807_v15 = vld [vmem:[#allocation4 + $0xd0] sm:$0xf0]  ;;  %263 = vmatpush.bf16.msra.mxu1 %v2149_v7  ;;  %v2158_v16 = vor.u32 %v1951_v13, %v1805_v11  ;;  %v1813_v18 = vld [vmem:[#allocation4 + $0xc8] sm:$0xf]  ;;  %v1952_v19 = vld [vmem:[#allocation4 + $0xd4] sm:$0xf0] }
   0xa   :  { %276 = vmatpush.bf16.msra.mxu2 %v2151_v8  ;;  %v2160_v17 = vor.u32 %v1949_v14, %v1807_v15  ;;  %v1950_v20 = vld [vmem:[#allocation4 + $0xcc] sm:$0xf]  ;;  %289 = vmatpush.bf16.msra.mxu3 %v2154_v12  ;;  %v2163_v21 = vor.u32 %v1952_v19, %v1813_v18  ;;  %v1815_v22 = vld [vmem:[#allocation4 + $0xd8] sm:$0xf0]  ;;  %v1789_v23 = vld [vmem:[#allocation4 + $0xa0] sm:$0xf] }
   0xb   :  { %v1947_v24 = vld [vmem:[#allocation4 + $0xac] sm:$0xf0]  ;;  %v2165_v25 = vor.u32 %v1950_v20, %v1815_v22  ;;  %v1945_v26 = vld [vmem:[#allocation4 + $0xa4] sm:$0xf]  ;;  %v1791_v27 = vld [vmem:[#allocation4 + $0xb0] sm:$0xf0] }
   0xc   :  { %v1797_v28 = vld [vmem:[#allocation4 + $0xa8] sm:$0xf]  ;;  %251 = vmatpush.bf16.msra.mxu0 %v2158_v16  ;;  %v2168_v29 = vor.u32 %v1947_v24, %v1789_v23  ;;  %v1948_v30 = vld [vmem:[#allocation4 + $0xb4] sm:$0xf0]  ;;  %v1946_v31 = vld [vmem:[#allocation4 + $0xac] sm:$0xf]  ;;  %v2172_v33 = vor.u32 %v1945_v26, %v1791_v27 }
   0xd   :  { %v1799_v32 = vld [vmem:[#allocation4 + $0xb8] sm:$0xf0]  ;;  %264 = vmatpush.bf16.msra.mxu1 %v2160_v17  ;;  %v2174_v34 = vor.u32 %v1948_v30, %v1797_v28  ;;  %v1773_v35 = vld [vmem:[#allocation4 + $0x80] sm:$0xf]  ;;  %v1943_v36 = vld [vmem:[#allocation4 + $0x8c] sm:$0xf0] }
   0xe   :  { %277 = vmatpush.bf16.msra.mxu2 %v2163_v21  ;;  %v1941_v37 = vld [vmem:[#allocation4 + $0x84] sm:$0xf]  ;;  %290 = vmatpush.bf16.msra.mxu3 %v2165_v25  ;;  %v2177_v38 = vor.u32 %v1946_v31, %v1799_v32  ;;  %v1775_v39 = vld [vmem:[#allocation4 + $0x90] sm:$0xf0]  ;;  %v1781_v40 = vld [vmem:[#allocation4 + $0x88] sm:$0xf]  ;;  %v2180_v44 = vor.u32 %v1943_v36, %v1773_v35 }
   0xf   :  { %v1944_v41 = vld [vmem:[#allocation4 + $0x94] sm:$0xf0]  ;;  %v1942_v42 = vld [vmem:[#allocation4 + $0x8c] sm:$0xf]  ;;  %v1783_v43 = vld [vmem:[#allocation4 + $0x98] sm:$0xf0]  ;;  %v2184_v45 = vor.u32 %v1941_v37, %v1775_v39 }
  0x10   :  { %252 = vmatpush.bf16.msra.mxu0 %v2168_v29  ;;  %v2186_v46 = vor.u32 %v1944_v41, %v1781_v40  ;;  %v1757_v47 = vld [vmem:[#allocation4 + $0x60] sm:$0xf]  ;;  %v1939_v48 = vld [vmem:[#allocation4 + $0x6c] sm:$0xf0]  ;;  %v1937_v49 = vld [vmem:[#allocation4 + $0x64] sm:$0xf]  ;;  %v2189_v50 = vor.u32 %v1942_v42, %v1783_v43 }
  0x11   :  { %265 = vmatpush.bf16.msra.mxu1 %v2172_v33  ;;  %v1759_v51 = vld [vmem:[#allocation4 + $0x70] sm:$0xf0]  ;;  %v1765_v52 = vld [vmem:[#allocation4 + $0x68] sm:$0xf]  ;;  %v1940_v53 = vld [vmem:[#allocation4 + $0x74] sm:$0xf0]  ;;  %v2192_v56 = vor.u32 %v1939_v48, %v1757_v47 }
  0x12   :  { %278 = vmatpush.bf16.msra.mxu2 %v2174_v34  ;;  %291 = vmatpush.bf16.msra.mxu3 %v2177_v38  ;;  %v1938_v54 = vld [vmem:[#allocation4 + $0x6c] sm:$0xf]  ;;  %v1767_v55 = vld [vmem:[#allocation4 + $0x78] sm:$0xf0]  ;;  %v2196_v57 = vor.u32 %v1937_v49, %v1759_v51  ;;  %v2198_v58 = vor.u32 %v1940_v53, %v1765_v52  ;;  %v1741_v59 = vld [vmem:[#allocation4 + $0x40] sm:$0xf] }
  0x13   :  { %v1935_v60 = vld [vmem:[#allocation4 + $0x4c] sm:$0xf0]  ;;  %v1933_v61 = vld [vmem:[#allocation4 + $0x44] sm:$0xf]  ;;  %v2201_v62 = vor.u32 %v1938_v54, %v1767_v55  ;;  %v1743_v63 = vld [vmem:[#allocation4 + $0x50] sm:$0xf0] }
  0x14   :  { %253 = vmatpush.bf16.msra.mxu0 %v2180_v44  ;;  %v1749_v0 = vld [vmem:[#allocation4 + $0x48] sm:$0xf]  ;;  %v1936_v1 = vld [vmem:[#allocation4 + $0x54] sm:$0xf0]  ;;  %v1934_v2 = vld [vmem:[#allocation4 + $0x4c] sm:$0xf]  ;;  %v2204_v5 = vor.u32 %v1935_v60, %v1741_v59  ;;  %v2208_v6 = vor.u32 %v1933_v61, %v1743_v63 }
  0x15   :  { %266 = vmatpush.bf16.msra.mxu1 %v2184_v45  ;;  %v1751_v4 = vld [vmem:[#allocation4 + $0x58] sm:$0xf0]  ;;  %v2210_v9 = vor.u32 %v1936_v1, %v1749_v0  ;;  %v1725_v10 = vld [vmem:[#allocation4 + $0x20] sm:$0xf]  ;;  %v1931_v11 = vld [vmem:[#allocation4 + $0x2c] sm:$0xf0] }
  0x16   :  { %279 = vmatpush.bf16.msra.mxu2 %v2186_v46  ;;  %292 = vmatpush.bf16.msra.mxu3 %v2189_v50  ;;  %v1929_v13 = vld [vmem:[#allocation4 + $0x24] sm:$0xf]  ;;  %v2213_v14 = vor.u32 %v1934_v2, %v1751_v4  ;;  %v1727_v15 = vld [vmem:[#allocation4 + $0x30] sm:$0xf0]  ;;  %v1733_v18 = vld [vmem:[#allocation4 + $0x28] sm:$0xf]  ;;  %v2216_v23 = vor.u32 %v1931_v11, %v1725_v10 }
  0x17   :  { %v1932_v19 = vld [vmem:[#allocation4 + $0x34] sm:$0xf0]  ;;  %v1930_v20 = vld [vmem:[#allocation4 + $0x2c] sm:$0xf]  ;;  %v1735_v22 = vld [vmem:[#allocation4 + $0x38] sm:$0xf0]  ;;  %v2220_v26 = vor.u32 %v1929_v13, %v1727_v15 }
  0x18   :  { %254 = vmatpush.bf16.msra.mxu0 %v2192_v56  ;;  %v1709_v24 = vld [vmem:[#allocation4] sm:$0xf]  ;;  %v2222_v27 = vor.u32 %v1932_v19, %v1733_v18  ;;  %v1927_v28 = vld [vmem:[#allocation4 + $0xc] sm:$0xf0]  ;;  %v1925_v30 = vld [vmem:[#allocation4 + $0x4] sm:$0xf]  ;;  %v2225_v32 = vor.u32 %v1930_v20, %v1735_v22 }
  0x19   :  { %267 = vmatpush.bf16.msra.mxu1 %v2196_v57  ;;  %v1711_v31 = vld [vmem:[#allocation4 + $0x10] sm:$0xf0]  ;;  %v1717_v35 = vld [vmem:[#allocation4 + $0x8] sm:$0xf]  ;;  %v1928_v36 = vld [vmem:[#allocation4 + $0x14] sm:$0xf0]  ;;  %v2234_v42 = vor.u32 %v1927_v28, %v1709_v24 }
  0x1a   :  { %280 = vmatpush.bf16.msra.mxu2 %v2198_v58  ;;  %293 = vmatpush.bf16.msra.mxu3 %v2201_v62  ;;  %v1926_v37 = vld [vmem:[#allocation4 + $0xc] sm:$0xf]  ;;  %v1719_v39 = vld [vmem:[#allocation4 + $0x18] sm:$0xf0]  ;;  %v1837_v40 = vld [vmem:[%s2683_s1] sm:$0xf]  ;;  %v2244_v48 = vor.u32 %v1925_v30, %v1711_v31  ;;  %v2246_v49 = vor.u32 %v1928_v36, %v1717_v35 }
  0x1b   :  { %v1923_v41 = vld [vmem:[%s2683_s1 + $0xc] sm:$0xf0]  ;;  %v1921_v43 = vld [vmem:[%s2683_s1 + $0x4] sm:$0xf]  ;;  %v1839_v47 = vld [vmem:[%s2683_s1 + $0x10] sm:$0xf0]  ;;  %v2249_v51 = vor.u32 %v1926_v37, %v1719_v39 }
  0x1c   :  { %255 = vmatpush.bf16.msra.mxu0 %v2204_v5  ;;  %v2251_v52 = vor.u32 %v1923_v41, %v1837_v40  ;;  %v1845_v53 = vld [vmem:[%s2683_s1 + $0x8] sm:$0xf]  ;;  %v1924_v54 = vld [vmem:[%s2683_s1 + $0x14] sm:$0xf0]  ;;  %v2259_v55 = vor.u32 %v1921_v43, %v1839_v47  ;;  %v1922_v59 = vld [vmem:[%s2683_s1 + $0xc] sm:$0xf] }
  0x1d   :  { %268 = vmatpush.bf16.msra.mxu1 %v2208_v6  ;;  %v1847_v60 = vld [vmem:[%s2683_s1 + $0x18] sm:$0xf0]  ;;  %v2270_v61 = vor.u32 %v1924_v54, %v1845_v53  ;;  %v2118_v0 = vmov 0.0|0.0   ;;  %v88_v1 = vld [vmem:[%s2682_s0] sm:$0xf]  ;;  %vm322_vm0 = vcmask 130048  }
  0x1e   :  { %281 = vmatpush.bf16.msra.mxu2 %v2210_v9  ;;  %294 = vmatpush.bf16.msra.mxu3 %v2213_v14  ;;  %v2274_v63 = vor.u32 %v1922_v59, %v1847_v60  ;;  %v76_v18 = vld [vmem:[%s2685_s3] sm:$0xf] }
  0x1f   :  { %v2325_v19 = vperm.slane %v76_v18, 0  ;;  %v2327_v20 = vperm.slane %v76_v18, 1  ;;  %v2331_v40 = vperm.slane %v76_v18, 3 }
  0x20   :  { %256 = vmatpush.bf16.msra.mxu0 %v2216_v23 }
  0x21   :  { %269 = vmatpush.bf16.msra.mxu1 %v2220_v26  ;;  %2691 = vst [vmem:[#allocation7_spill] sm:$0xff] %v2331_v40 }
  0x22   :  { %282 = vmatpush.bf16.msra.mxu2 %v2222_v27  ;;  %295 = vmatpush.bf16.msra.mxu3 %v2225_v32 }
  0x24   :  { %257 = vmatpush.bf16.msra.mxu0 %v2234_v42 }
  0x25   :  { %270 = vmatpush.bf16.msra.mxu1 %v2244_v48 }
  0x26   :  { %283 = vmatpush.bf16.msra.mxu2 %v2246_v49  ;;  %296 = vmatpush.bf16.msra.mxu3 %v2249_v51 }
  0x27   :  { %258 = vmatmul.bf16.vlgmr.msra.gmra.mxu0 %v2118_v0 }
  0x28   :  { %333 = vmatpush.bf16.msrb.mxu0 %v2251_v52  ;;  %271 = vmatmul.bf16.vlgmr.msra.gmra.mxu1 %v2118_v0 }
  0x29   :  { %346 = vmatpush.bf16.msrb.mxu1 %v2259_v55  ;;  %284 = vmatmul.bf16.vlgmr.msra.gmra.mxu2 %v2118_v0 }
  0x2a   :  { %297 = vmatmul.bf16.vlgmr.msra.gmra.mxu3 %v2118_v0  ;;  %359 = vmatpush.bf16.msrb.mxu2 %v2270_v61 }
  0x2b   :  { %372 = vmatpush.bf16.msrb.mxu3 %v2274_v63 }
  0x2c   :  { %449 = vmatpush.bf16.msra.mxu0 %v2147_v3 }
  0x2d   :  { %462 = vmatpush.bf16.msra.mxu1 %v2149_v7 }
  0x2e   :  { %475 = vmatpush.bf16.msra.mxu2 %v2151_v8 }
  0x2f   :  { %488 = vmatpush.bf16.msra.mxu3 %v2154_v12 }
  0x30   :  { %450 = vmatpush.bf16.msra.mxu0 %v2158_v16 }
  0x31   :  { %463 = vmatpush.bf16.msra.mxu1 %v2160_v17 }
  0x32   :  { %476 = vmatpush.bf16.msra.mxu2 %v2163_v21 }
  0x33   :  { %489 = vmatpush.bf16.msra.mxu3 %v2165_v25 }
  0x34   :  { %451 = vmatpush.bf16.msra.mxu0 %v2168_v29 }
  0x35   :  { %464 = vmatpush.bf16.msra.mxu1 %v2172_v33 }
  0x36   :  { %477 = vmatpush.bf16.msra.mxu2 %v2174_v34 }
  0x37   :  { %490 = vmatpush.bf16.msra.mxu3 %v2177_v38  ;;  %1851 = vmatmul.msk.bf16.vlgmr.msrb.gmra.mxu0 %vm322_vm0, %v88_v1 }
  0x38   :  { %452 = vmatpush.bf16.msra.mxu0 %v2180_v44  ;;  %1852 = vmatmul.msk.bf16.vlgmr.msrb.gmra.mxu1 %vm322_vm0, %v88_v1 }
  0x39   :  { %465 = vmatpush.bf16.msra.mxu1 %v2184_v45  ;;  %1853 = vmatmul.msk.bf16.vlgmr.msrb.gmra.mxu2 %vm322_vm0, %v88_v1 }
  0x3a   :  { %1854 = vmatmul.msk.bf16.vlgmr.msrb.gmra.mxu3 %vm322_vm0, %v88_v1  ;;  %478 = vmatpush.bf16.msra.mxu2 %v2186_v46 }
  0x3b   :  { %491 = vmatpush.bf16.msra.mxu3 %v2189_v50 }
  0x3c   :  { %453 = vmatpush.bf16.msra.mxu0 %v2192_v56 }
  0x3d   :  { %466 = vmatpush.bf16.msra.mxu1 %v2196_v57 }
  0x3e   :  { %479 = vmatpush.bf16.msra.mxu2 %v2198_v58 }
  0x3f   :  { %492 = vmatpush.bf16.msra.mxu3 %v2201_v62 }
  0x40   :  { %454 = vmatpush.bf16.msra.mxu0 %v2204_v5 }
  0x41   :  { %467 = vmatpush.bf16.msra.mxu1 %v2208_v6 }
  0x42   :  { %480 = vmatpush.bf16.msra.mxu2 %v2210_v9 }
  0x43   :  { %493 = vmatpush.bf16.msra.mxu3 %v2213_v14 }
  0x44   :  { %455 = vmatpush.bf16.msra.mxu0 %v2216_v23 }
  0x45   :  { %468 = vmatpush.bf16.msra.mxu1 %v2220_v26 }
  0x46   :  { %481 = vmatpush.bf16.msra.mxu2 %v2222_v27 }
  0x47   :  { %494 = vmatpush.bf16.msra.mxu3 %v2225_v32 }
  0x48   :  { %456 = vmatpush.bf16.msra.mxu0 %v2234_v42 }
  0x49   :  { %469 = vmatpush.bf16.msra.mxu1 %v2244_v48 }
  0x4a   :  { %482 = vmatpush.bf16.msra.mxu2 %v2246_v49 }
  0x4b   :  { %495 = vmatpush.bf16.msra.mxu3 %v2249_v51 }
  0x4c   :  { %511 = vmatpush.bf16.msrb.mxu0 %v2251_v52 }
  0x4d   :  { %524 = vmatpush.bf16.msrb.mxu1 %v2259_v55 }
  0x4e   :  { %537 = vmatpush.bf16.msrb.mxu2 %v2270_v61 }
  0x4f   :  { %550 = vmatpush.bf16.msrb.mxu3 %v2274_v63 }
  0xa4   :  { %v259_v2 = vpop.f32.mrf.mxu0 }
  0xa5   :  { %v272_v4 = vpop.f32.mrf.mxu1 }
  0xac   :  { %v285_v10 = vpop.f32.mrf.mxu2  ;;  %v261_v13 = vpop.f32.mrf.mxu0 }
  0xad   :  { %v298_v11 = vpop.f32.mrf.mxu3  ;;  %v274_v15 = vpop.f32.mrf.mxu1 }
  0xb4   :  { %v287_v22 = vpop.f32.mrf.mxu2  ;;  %v335_v28 = vpop.f32.mrf.mxu0 }
  0xb5   :  { %v300_v24 = vpop.f32.mrf.mxu3  ;;  %v336_v30 = vadd.f32 %v335_v28, %v2325_v19  ;;  %v348_v31 = vpop.f32.mrf.mxu1  ;;  %v2334_v22 = vperm.slane %v76_v18, 2 }
  0xb6   :  { %v349_v35 = vadd.f32 %v348_v31, %v2327_v20 }
  0xb7   :  { %v378_v36 = vadd.f32 %v336_v30, %v259_v2  ;;  %2692 = vst [vmem:[#allocation8_spill] sm:$0xff] %v2334_v22 }
  0xb8   :  { %v379_v37 = vadd.f32 %v349_v35, %v272_v4 }
  0xb9   :  { %v1855_v39 = vmul.f32 -1.442695, %v378_v36 }
  0xba   :  { %v1856_v41 = vmul.f32 -1.442695, %v379_v37 }
  0xbb   :  { %1961 = vpow2.f32 %v1855_v39 }
  0xbc   :  { %v361_v43 = vpop.f32.mrf.mxu2  ;;  %1963 = vpow2.f32 %v1856_v41  ;;  %v337_v53 = vpop.f32.mrf.mxu0 }
  0xbd   :  { %v374_v47 = vpop.f32.mrf.mxu3  ;;  %v350_v59 = vpop.f32.mrf.mxu1  ;;  %v362_v28 = vadd.f32 %v361_v43, %v2334_v22 }
  0xbe   :  { %v375_v54 = vadd.f32 %v374_v47, %v2331_v40 }
  0xbf   :  { %v380_v35 = vadd.f32 %v362_v28, %v285_v10 }
  0xc0   :  { %v381_v60 = vadd.f32 %v375_v54, %v298_v11 }
  0xc1   :  { %v1962_v0 = vpop.eup %1961 }
  0xc2   :  { %v1857_v1 = vmul.f32 -1.442695, %v381_v60  ;;  %v1964_v13 = vpop.eup %1963  ;;  %v385_v15 = vadd.f32 1.0, %v1962_v0 }
  0xc3   :  { %v404_v2 = vadd.f32 1.0, %v1964_v13 }
  0xc4   :  { %1965 = vpow2.f32 %v1857_v1  ;;  %v363_v4 = vpop.f32.mrf.mxu2  ;;  %v397_v18 = vand.u32 2147483648, %v385_v15  ;;  %v395_v59 = vand.u32 2147483647, %v385_v15  ;;  %vm391_vm3 = vweird.f32 %v385_v15 }
  0xc5   :  { %1967 = vrcp.f32 %v385_v15  ;;  %v376_v24 = vpop.f32.mrf.mxu3  ;;  %v416_v53 = vand.u32 2147483648, %v404_v2  ;;  %v414_v0 = vand.u32 2147483647, %v404_v2  ;;  %vm410_vm4 = vweird.f32 %v404_v2 }
  0xc6   :  { %1969 = vrcp.f32 %v404_v2  ;;  %v398_v10 = vor.u32 1.1754944e-38, %v397_v18  ;;  %vm396_vm6 = vcmp.eq.f32.partialorder %v395_v59, 8.507059e+37 }
  0xc7   :  { %v417_v4 = vor.u32 1.1754944e-38, %v416_v53  ;;  %vm415_vm8 = vcmp.eq.f32.partialorder %v414_v0, 8.507059e+37 }
  0xca   :  { %v1966_v30 = vpop.eup %1965 }
  0xcb   :  { %v1968_v31 = vpop.eup %1967  ;;  %v424_v36 = vadd.f32 1.0, %v1966_v30 }
  0xcc   :  { %v1970_v37 = vpop.eup %1969  ;;  %v387_v11 = vmul.f32 %v1968_v31, %v385_v15  ;;  %vm392_vm1 = vweird.f32 %v1968_v31 }
  0xcd   :  { %v406_v39 = vmul.f32 %v1970_v37, %v404_v2  ;;  %1971 = vrcp.f32 %v424_v36  ;;  %vm411_vm2 = vweird.f32 %v1970_v37  ;;  %vm393_vm5 = vmor %vm391_vm3, %vm392_vm1  ;;  %v436_v18 = vand.u32 2147483648, %v424_v36 }
  0xce   :  { %v388_v41 = vsub.f32 1.0, %v387_v11  ;;  %1973 = vtanh.f32 %v380_v35  ;;  %vm412_vm7 = vmor %vm410_vm4, %vm411_vm2  ;;  %vm430_vm10 = vweird.f32 %v424_v36 }
  0xcf   :  { %v407_v47 = vsub.f32 1.0, %v406_v39  ;;  %v437_v59 = vor.u32 1.1754944e-38, %v436_v18 }
  0xd0   :  { %v389_v54 = vmul.f32 %v1968_v31, %v388_v41 }
  0xd1   :  { %v408_v60 = vmul.f32 %v1970_v37, %v407_v47 }
  0xd2   :  { %v390_v43 = vadd.f32 %v1968_v31, %v389_v54 }
  0xd3   :  { %v1972_v1 = vpop.eup %1971  ;;  %v409_v13 = vadd.f32 %v1970_v37, %v408_v60 }
  0xd4   :  { %v394_v24 = vsel %vm393_vm5, %v1968_v31, %v390_v43  ;;  %v426_v28 = vmul.f32 %v1972_v1, %v424_v36  ;;  %v1974_v30 = vpop.eup %1973  ;;  %vm431_vm9 = vweird.f32 %v1972_v1  ;;  %v434_v31 = vand.u32 2147483647, %v424_v36 }
  0xd5   :  { %v399_v35 = vsel %vm396_vm6, %v398_v10, %v394_v24  ;;  %v413_v11 = vsel %vm412_vm7, %v1970_v37, %v409_v13  ;;  %vm432_vm11 = vmor %vm430_vm10, %vm431_vm9 }
  0xd6   :  { %v418_v39 = vsel %vm415_vm8, %v417_v4, %v413_v11  ;;  %v441_v41 = vmul.f32 %v1974_v30, %v399_v35  ;;  %v427_v47 = vsub.f32 1.0, %v426_v28  ;;  %vm435_vm12 = vcmp.eq.f32.partialorder %v434_v31, 8.507059e+37 }
  0xd7   :  { %v440_v22 = vmul.f32 0.0, %v418_v39 }
  0xd8   :  { %v428_v54 = vmul.f32 %v1972_v1, %v427_v47 }
  0xd9   :  { %v2337_v15 = vadd.f32 %v441_v41, %v440_v22  ;;  %v1858_v22 = vld [vmem:[%s2682_s0 + $0x4] sm:$0xf] }
  0xda   :  { %v429_v2 = vadd.f32 %v1972_v1, %v428_v54 }
  0xdb   :  { %1975 = vtanh.f32 %v2337_v15 }
  0xdc   :  { %v433_v53 = vsel %vm432_vm11, %v1972_v1, %v429_v2 }
  0xdd   :  { %v438_v60 = vsel %vm435_vm12, %v437_v59, %v433_v53 }
  0xe1   :  { %v1976_v37 = vpop.eup %1975 }
  0xe2   :  { %v444_v0 = vmul.f32 %v1976_v37, %v438_v60 }
  0xe4   :  { %v445_v43 = vpack.c.bf16 %v444_v0, %v444_v0 }
  0xe6   :  { %446 = vst [vmem:[%s2686_s4] sm:$0xf] %v445_v43  ;;  %457 = vmatmul.bf16.vlgmr.msra.gmra.mxu0 %v445_v43  ;;  %470 = vmatmul.bf16.vlgmr.msra.gmra.mxu1 %v445_v43 }
  0xe7   :  { %483 = vmatmul.bf16.vlgmr.msra.gmra.mxu2 %v445_v43  ;;  %496 = vmatmul.bf16.vlgmr.msra.gmra.mxu3 %v445_v43 }
  0xe8   :  { %628 = vmatpush.bf16.msra.mxu0 %v2147_v3  ;;  %641 = vmatpush.bf16.msra.mxu1 %v2149_v7 }
  0xe9   :  { %654 = vmatpush.bf16.msra.mxu2 %v2151_v8  ;;  %667 = vmatpush.bf16.msra.mxu3 %v2154_v12 }
  0xec   :  { %629 = vmatpush.bf16.msra.mxu0 %v2158_v16  ;;  %642 = vmatpush.bf16.msra.mxu1 %v2160_v17 }
  0xed   :  { %655 = vmatpush.bf16.msra.mxu2 %v2163_v21  ;;  %668 = vmatpush.bf16.msra.mxu3 %v2165_v25 }
  0xf0   :  { %630 = vmatpush.bf16.msra.mxu0 %v2168_v29  ;;  %643 = vmatpush.bf16.msra.mxu1 %v2172_v33 }
  0xf1   :  { %656 = vmatpush.bf16.msra.mxu2 %v2174_v34  ;;  %669 = vmatpush.bf16.msra.mxu3 %v2177_v38 }
  0xf4   :  { %631 = vmatpush.bf16.msra.mxu0 %v2180_v44  ;;  %644 = vmatpush.bf16.msra.mxu1 %v2184_v45 }
  0xf5   :  { %657 = vmatpush.bf16.msra.mxu2 %v2186_v46  ;;  %670 = vmatpush.bf16.msra.mxu3 %v2189_v50 }
  0xf6   :  { %1859 = vmatmul.msk.bf16.vlgmr.msrb.gmra.mxu0 %vm322_vm0, %v1858_v22  ;;  %1860 = vmatmul.msk.bf16.vlgmr.msrb.gmra.mxu1 %vm322_vm0, %v1858_v22 }
  0xf7   :  { %1861 = vmatmul.msk.bf16.vlgmr.msrb.gmra.mxu2 %vm322_vm0, %v1858_v22  ;;  %1862 = vmatmul.msk.bf16.vlgmr.msrb.gmra.mxu3 %vm322_vm0, %v1858_v22 }
  0xf8   :  { %632 = vmatpush.bf16.msra.mxu0 %v2192_v56  ;;  %645 = vmatpush.bf16.msra.mxu1 %v2196_v57 }
  0xf9   :  { %658 = vmatpush.bf16.msra.mxu2 %v2198_v58  ;;  %671 = vmatpush.bf16.msra.mxu3 %v2201_v62 }
  0xfc   :  { %633 = vmatpush.bf16.msra.mxu0 %v2204_v5  ;;  %646 = vmatpush.bf16.msra.mxu1 %v2208_v6 }
  0xfd   :  { %659 = vmatpush.bf16.msra.mxu2 %v2210_v9  ;;  %672 = vmatpush.bf16.msra.mxu3 %v2213_v14 }
 0x100   :  { %634 = vmatpush.bf16.msra.mxu0 %v2216_v23  ;;  %647 = vmatpush.bf16.msra.mxu1 %v2220_v26 }
 0x101   :  { %660 = vmatpush.bf16.msra.mxu2 %v2222_v27  ;;  %673 = vmatpush.bf16.msra.mxu3 %v2225_v32 }
 0x104   :  { %635 = vmatpush.bf16.msra.mxu0 %v2234_v42  ;;  %648 = vmatpush.bf16.msra.mxu1 %v2244_v48 }
 0x105   :  { %661 = vmatpush.bf16.msra.mxu2 %v2246_v49  ;;  %674 = vmatpush.bf16.msra.mxu3 %v2249_v51 }
 0x108   :  { %690 = vmatpush.bf16.msrb.mxu0 %v2251_v52  ;;  %703 = vmatpush.bf16.msrb.mxu1 %v2259_v55 }
 0x109   :  { %729 = vmatpush.bf16.msrb.mxu3 %v2274_v63  ;;  %716 = vmatpush.bf16.msrb.mxu2 %v2270_v61 }
 0x163   :  { %v458_v36 = vpop.f32.mrf.mxu0  ;;  %v471_v1 = vpop.f32.mrf.mxu1 }
 0x16a   :  { %v484_v10 = vpop.f32.mrf.mxu2  ;;  %v497_v13 = vpop.f32.mrf.mxu3 }
 0x16b   :  { %v460_v4 = vpop.f32.mrf.mxu0  ;;  %v473_v24 = vpop.f32.mrf.mxu1 }
 0x172   :  { %v486_v28 = vpop.f32.mrf.mxu2  ;;  %v499_v30 = vpop.f32.mrf.mxu3 }
 0x173   :  { %v513_v35 = vpop.f32.mrf.mxu0  ;;  %v526_v11 = vpop.f32.mrf.mxu1 }
 0x174   :  { %v514_v39 = vadd.f32 %v513_v35, %v2325_v19  ;;  %v527_v41 = vadd.f32 %v526_v11, %v2327_v20 }
 0x176   :  { %v556_v47 = vadd.f32 %v514_v39, %v458_v36  ;;  %v557_v54 = vadd.f32 %v527_v41, %v471_v1  ;;  %v2693_v1 = vld [vmem:[#allocation8_spill] sm:$0xff] }
 0x178   :  { %v1863_v2 = vmul.f32 -1.442695, %v556_v47  ;;  %v1864_v18 = vmul.f32 -1.442695, %v557_v54 }
 0x17a   :  { %1977 = vpow2.f32 %v1863_v2  ;;  %v539_v31 = vpop.f32.mrf.mxu2  ;;  %v552_v53 = vpop.f32.mrf.mxu3 }
 0x17b   :  { %1979 = vpow2.f32 %v1864_v18  ;;  %v553_v59 = vadd.f32 %v552_v53, %v2331_v40  ;;  %v515_v37 = vpop.f32.mrf.mxu0  ;;  %v528_v60 = vpop.f32.mrf.mxu1  ;;  %v540_v35 = vadd.f32 %v539_v31, %v2693_v1 }
 0x17d   :  { %v559_v0 = vadd.f32 %v553_v59, %v497_v13  ;;  %v558_v47 = vadd.f32 %v540_v35, %v484_v10 }
 0x17f   :  { %v1865_v43 = vmul.f32 -1.442695, %v559_v0 }
 0x180   :  { %v1978_v22 = vpop.eup %1977 }
 0x181   :  { %v1980_v4 = vpop.eup %1979  ;;  %v563_v24 = vadd.f32 1.0, %v1978_v22  ;;  %1981 = vpow2.f32 %v1865_v43 }
 0x182   :  { %v582_v28 = vadd.f32 1.0, %v1980_v4  ;;  %v554_v30 = vpop.f32.mrf.mxu3  ;;  %v541_v36 = vpop.f32.mrf.mxu2 }
 0x183   :  { %1983 = vrcp.f32 %v563_v24  ;;  %v575_v59 = vand.u32 2147483648, %v563_v24  ;;  %v573_v0 = vand.u32 2147483647, %v563_v24  ;;  %vm569_vm15 = vweird.f32 %v563_v24 }
 0x184   :  { %1985 = vrcp.f32 %v582_v28  ;;  %v594_v37 = vand.u32 2147483648, %v582_v28  ;;  %v592_v22 = vand.u32 2147483647, %v582_v28  ;;  %vm588_vm1 = vweird.f32 %v582_v28 }
 0x185   :  { %v576_v10 = vor.u32 1.1754944e-38, %v575_v59  ;;  %vm574_vm4 = vcmp.eq.f32.partialorder %v573_v0, 8.507059e+37 }
 0x186   :  { %v595_v35 = vor.u32 1.1754944e-38, %v594_v37  ;;  %vm593_vm5 = vcmp.eq.f32.partialorder %v592_v22, 8.507059e+37 }
 0x187   :  { %v1982_v11 = vpop.eup %1981 }
 0x188   :  { %v602_v39 = vadd.f32 1.0, %v1982_v11 }
 0x189   :  { %v1984_v41 = vpop.eup %1983 }
 0x18a   :  { %v1986_v54 = vpop.eup %1985  ;;  %v565_v2 = vmul.f32 %v1984_v41, %v563_v24  ;;  %1987 = vrcp.f32 %v602_v39  ;;  %vm570_vm13 = vweird.f32 %v1984_v41  ;;  %v614_v59 = vand.u32 2147483648, %v602_v39 }
 0x18b   :  { %v584_v13 = vmul.f32 %v1986_v54, %v582_v28  ;;  %1989 = vtanh.f32 %v558_v47  ;;  %vm589_vm14 = vweird.f32 %v1986_v54  ;;  %vm571_vm2 = vmor %vm569_vm15, %vm570_vm13  ;;  %vm608_vm7 = vweird.f32 %v602_v39 }
 0x18c   :  { %v566_v18 = vsub.f32 1.0, %v565_v2  ;;  %vm590_vm3 = vmor %vm588_vm1, %vm589_vm14  ;;  %v615_v0 = vor.u32 1.1754944e-38, %v614_v59 }
 0x18d   :  { %v585_v53 = vsub.f32 1.0, %v584_v13 }
 0x18e   :  { %v567_v60 = vmul.f32 %v1984_v41, %v566_v18 }
 0x18f   :  { %v586_v43 = vmul.f32 %v1986_v54, %v585_v53 }
 0x190   :  { %v1988_v31 = vpop.eup %1987  ;;  %v568_v4 = vadd.f32 %v1984_v41, %v567_v60 }
 0x191   :  { %v587_v30 = vadd.f32 %v1986_v54, %v586_v43  ;;  %v604_v36 = vmul.f32 %v1988_v31, %v602_v39  ;;  %v1990_v47 = vpop.eup %1989  ;;  %vm609_vm6 = vweird.f32 %v1988_v31 }
 0x192   :  { %v572_v11 = vsel %vm571_vm2, %v1984_v41, %v568_v4  ;;  %v612_v41 = vand.u32 2147483647, %v602_v39  ;;  %vm610_vm8 = vmor %vm608_vm7, %vm609_vm6 }
 0x193   :  { %v577_v2 = vsel %vm574_vm4, %v576_v10, %v572_v11  ;;  %v591_v13 = vsel %vm590_vm3, %v1986_v54, %v587_v30  ;;  %v605_v18 = vsub.f32 1.0, %v604_v36 }
 0x194   :  { %v596_v53 = vsel %vm593_vm5, %v595_v35, %v591_v13  ;;  %v619_v1 = vmul.f32 %v1990_v47, %v577_v2  ;;  %vm613_vm9 = vcmp.eq.f32.partialorder %v612_v41, 8.507059e+37 }
 0x195   :  { %v618_v40 = vmul.f32 %v596_v53, %v2337_v15  ;;  %v606_v60 = vmul.f32 %v1988_v31, %v605_v18 }
 0x197   :  { %v2391_v24 = vadd.f32 %v619_v1, %v618_v40  ;;  %v607_v28 = vadd.f32 %v1988_v31, %v606_v60  ;;  %v1867_v40 = vld [vmem:[%s2682_s0 + $0x8] sm:$0xf] }
 0x199   :  { %1991 = vtanh.f32 %v2391_v24  ;;  %v611_v37 = vsel %vm610_vm8, %v1988_v31, %v607_v28 }
 0x19a   :  { %v616_v43 = vsel %vm613_vm9, %v615_v0, %v611_v37  ;;  %v2694_v37 = vld [vmem:[#allocation7_spill] sm:$0xff] }
 0x19f   :  { %v1992_v54 = vpop.eup %1991 }
 0x1a0   :  { %v622_v22 = vmul.f32 %v1992_v54, %v616_v43 }
 0x1a2   :  { %v623_v4 = vpack.c.bf16 %v622_v22, %v622_v22 }
 0x1a4   :  { %1866 = vst [vmem:[%s2686_s4 + $0x4] sm:$0xf] %v623_v4  ;;  %636 = vmatmul.bf16.vlgmr.msra.gmra.mxu0 %v623_v4  ;;  %649 = vmatmul.bf16.vlgmr.msra.gmra.mxu1 %v623_v4 }
 0x1a5   :  { %662 = vmatmul.bf16.vlgmr.msra.gmra.mxu2 %v623_v4  ;;  %675 = vmatmul.bf16.vlgmr.msra.gmra.mxu3 %v623_v4 }
 0x1a6   :  { %807 = vmatpush.bf16.msra.mxu0 %v2147_v3  ;;  %820 = vmatpush.bf16.msra.mxu1 %v2149_v7 }
 0x1a7   :  { %833 = vmatpush.bf16.msra.mxu2 %v2151_v8  ;;  %846 = vmatpush.bf16.msra.mxu3 %v2154_v12 }
 0x1aa   :  { %808 = vmatpush.bf16.msra.mxu0 %v2158_v16  ;;  %821 = vmatpush.bf16.msra.mxu1 %v2160_v17 }
 0x1ab   :  { %834 = vmatpush.bf16.msra.mxu2 %v2163_v21  ;;  %847 = vmatpush.bf16.msra.mxu3 %v2165_v25 }
 0x1ae   :  { %809 = vmatpush.bf16.msra.mxu0 %v2168_v29  ;;  %822 = vmatpush.bf16.msra.mxu1 %v2172_v33 }
 0x1af   :  { %835 = vmatpush.bf16.msra.mxu2 %v2174_v34  ;;  %848 = vmatpush.bf16.msra.mxu3 %v2177_v38 }
 0x1b2   :  { %810 = vmatpush.bf16.msra.mxu0 %v2180_v44  ;;  %823 = vmatpush.bf16.msra.mxu1 %v2184_v45 }
 0x1b3   :  { %836 = vmatpush.bf16.msra.mxu2 %v2186_v46  ;;  %849 = vmatpush.bf16.msra.mxu3 %v2189_v50 }
 0x1b4   :  { %1868 = vmatmul.msk.bf16.vlgmr.msrb.gmra.mxu0 %vm322_vm0, %v1867_v40  ;;  %1869 = vmatmul.msk.bf16.vlgmr.msrb.gmra.mxu1 %vm322_vm0, %v1867_v40 }
 0x1b5   :  { %1870 = vmatmul.msk.bf16.vlgmr.msrb.gmra.mxu2 %vm322_vm0, %v1867_v40  ;;  %1871 = vmatmul.msk.bf16.vlgmr.msrb.gmra.mxu3 %vm322_vm0, %v1867_v40 }
 0x1b6   :  { %811 = vmatpush.bf16.msra.mxu0 %v2192_v56  ;;  %824 = vmatpush.bf16.msra.mxu1 %v2196_v57 }
 0x1b7   :  { %837 = vmatpush.bf16.msra.mxu2 %v2198_v58  ;;  %850 = vmatpush.bf16.msra.mxu3 %v2201_v62 }
 0x1ba   :  { %812 = vmatpush.bf16.msra.mxu0 %v2204_v5  ;;  %825 = vmatpush.bf16.msra.mxu1 %v2208_v6 }
 0x1bb   :  { %838 = vmatpush.bf16.msra.mxu2 %v2210_v9  ;;  %851 = vmatpush.bf16.msra.mxu3 %v2213_v14 }
 0x1be   :  { %813 = vmatpush.bf16.msra.mxu0 %v2216_v23  ;;  %826 = vmatpush.bf16.msra.mxu1 %v2220_v26 }
 0x1bf   :  { %839 = vmatpush.bf16.msra.mxu2 %v2222_v27  ;;  %852 = vmatpush.bf16.msra.mxu3 %v2225_v32 }
 0x1c2   :  { %814 = vmatpush.bf16.msra.mxu0 %v2234_v42  ;;  %827 = vmatpush.bf16.msra.mxu1 %v2244_v48 }
 0x1c3   :  { %840 = vmatpush.bf16.msra.mxu2 %v2246_v49  ;;  %853 = vmatpush.bf16.msra.mxu3 %v2249_v51 }
 0x1c6   :  { %869 = vmatpush.bf16.msrb.mxu0 %v2251_v52  ;;  %882 = vmatpush.bf16.msrb.mxu1 %v2259_v55 }
 0x1c7   :  { %908 = vmatpush.bf16.msrb.mxu3 %v2274_v63  ;;  %895 = vmatpush.bf16.msrb.mxu2 %v2270_v61 }
 0x221   :  { %v637_v15 = vpop.f32.mrf.mxu0  ;;  %v650_v1 = vpop.f32.mrf.mxu1 }
 0x228   :  { %v663_v39 = vpop.f32.mrf.mxu2  ;;  %v676_v31 = vpop.f32.mrf.mxu3 }
 0x229   :  { %v639_v10 = vpop.f32.mrf.mxu0  ;;  %v652_v30 = vpop.f32.mrf.mxu1 }
 0x230   :  { %v665_v36 = vpop.f32.mrf.mxu2  ;;  %v678_v35 = vpop.f32.mrf.mxu3 }
 0x231   :  { %v692_v11 = vpop.f32.mrf.mxu0  ;;  %v705_v47 = vpop.f32.mrf.mxu1 }
 0x232   :  { %v693_v2 = vadd.f32 %v692_v11, %v2325_v19  ;;  %v706_v13 = vadd.f32 %v705_v47, %v2327_v20 }
 0x234   :  { %v735_v18 = vadd.f32 %v693_v2, %v637_v15  ;;  %v736_v53 = vadd.f32 %v706_v13, %v650_v1  ;;  %v2695_v1 = vld [vmem:[#allocation8_spill] sm:$0xff] }
 0x236   :  { %v1872_v60 = vmul.f32 -1.442695, %v735_v18  ;;  %v1873_v28 = vmul.f32 -1.442695, %v736_v53 }
 0x238   :  { %1993 = vpow2.f32 %v1872_v60  ;;  %v718_v59 = vpop.f32.mrf.mxu2  ;;  %v731_v41 = vpop.f32.mrf.mxu3 }
 0x239   :  { %1995 = vpow2.f32 %v1873_v28  ;;  %v732_v0 = vadd.f32 %v731_v41, %v2694_v37  ;;  %v694_v54 = vpop.f32.mrf.mxu0  ;;  %v707_v43 = vpop.f32.mrf.mxu1  ;;  %v719_v11 = vadd.f32 %v718_v59, %v2695_v1 }
 0x23b   :  { %v738_v22 = vadd.f32 %v732_v0, %v676_v31  ;;  %v737_v18 = vadd.f32 %v719_v11, %v663_v39 }
 0x23d   :  { %v1874_v4 = vmul.f32 -1.442695, %v738_v22 }
 0x23e   :  { %v1994_v40 = vpop.eup %1993 }
 0x23f   :  { %v1996_v10 = vpop.eup %1995  ;;  %v742_v30 = vadd.f32 1.0, %v1994_v40  ;;  %1997 = vpow2.f32 %v1874_v4 }
 0x240   :  { %v761_v36 = vadd.f32 1.0, %v1996_v10  ;;  %v733_v35 = vpop.f32.mrf.mxu3  ;;  %v720_v15 = vpop.f32.mrf.mxu2 }
 0x241   :  { %1999 = vrcp.f32 %v742_v30  ;;  %v754_v0 = vand.u32 2147483648, %v742_v30  ;;  %v752_v22 = vand.u32 2147483647, %v742_v30  ;;  %vm748_vm12 = vweird.f32 %v742_v30 }
 0x242   :  { %2001 = vrcp.f32 %v761_v36  ;;  %v773_v54 = vand.u32 2147483648, %v761_v36  ;;  %v771_v40 = vand.u32 2147483647, %v761_v36  ;;  %vm767_vm13 = vweird.f32 %v761_v36 }
 0x243   :  { %v755_v39 = vor.u32 1.1754944e-38, %v754_v0  ;;  %vm753_vm1 = vcmp.eq.f32.partialorder %v752_v22, 8.507059e+37 }
 0x244   :  { %v774_v11 = vor.u32 1.1754944e-38, %v773_v54  ;;  %vm772_vm2 = vcmp.eq.f32.partialorder %v771_v40, 8.507059e+37 }
 0x245   :  { %v1998_v47 = vpop.eup %1997 }
 0x246   :  { %v781_v2 = vadd.f32 1.0, %v1998_v47 }
 0x247   :  { %v2000_v13 = vpop.eup %1999 }
 0x248   :  { %v2002_v53 = vpop.eup %2001  ;;  %v744_v60 = vmul.f32 %v2000_v13, %v742_v30  ;;  %2003 = vrcp.f32 %v781_v2  ;;  %vm749_vm10 = vweird.f32 %v2000_v13  ;;  %v793_v0 = vand.u32 2147483648, %v781_v2 }
 0x249   :  { %v763_v31 = vmul.f32 %v2002_v53, %v761_v36  ;;  %2005 = vtanh.f32 %v737_v18  ;;  %vm768_vm11 = vweird.f32 %v2002_v53  ;;  %vm750_vm14 = vmor %vm748_vm12, %vm749_vm10  ;;  %vm787_vm4 = vweird.f32 %v781_v2 }
 0x24a   :  { %v745_v28 = vsub.f32 1.0, %v744_v60  ;;  %vm769_vm15 = vmor %vm767_vm13, %vm768_vm11  ;;  %v794_v22 = vor.u32 1.1754944e-38, %v793_v0 }
 0x24b   :  { %v764_v41 = vsub.f32 1.0, %v763_v31 }
 0x24c   :  { %v746_v43 = vmul.f32 %v2000_v13, %v745_v28 }
 0x24d   :  { %v765_v4 = vmul.f32 %v2002_v53, %v764_v41 }
 0x24e   :  { %v2004_v59 = vpop.eup %2003  ;;  %v747_v10 = vadd.f32 %v2000_v13, %v746_v43 }
 0x24f   :  { %v766_v35 = vadd.f32 %v2002_v53, %v765_v4  ;;  %v783_v15 = vmul.f32 %v2004_v59, %v781_v2  ;;  %v2006_v18 = vpop.eup %2005  ;;  %vm788_vm3 = vweird.f32 %v2004_v59 }
 0x250   :  { %v751_v47 = vsel %vm750_vm14, %v2000_v13, %v747_v10  ;;  %v791_v13 = vand.u32 2147483647, %v781_v2  ;;  %vm789_vm5 = vmor %vm787_vm4, %vm788_vm3 }
 0x251   :  { %v756_v60 = vsel %vm753_vm1, %v755_v39, %v751_v47  ;;  %v770_v31 = vsel %vm769_vm15, %v2002_v53, %v766_v35  ;;  %v784_v28 = vsub.f32 1.0, %v783_v15 }
 0x252   :  { %v775_v41 = vsel %vm772_vm2, %v774_v11, %v770_v31  ;;  %v798_v1 = vmul.f32 %v2006_v18, %v756_v60  ;;  %vm792_vm6 = vcmp.eq.f32.partialorder %v791_v13, 8.507059e+37 }
 0x253   :  { %v797_v37 = vmul.f32 %v775_v41, %v2391_v24  ;;  %v785_v43 = vmul.f32 %v2004_v59, %v784_v28  ;;  %v1876_v24 = vld [vmem:[%s2682_s0 + $0xc] sm:$0xf] }
 0x255   :  { %v2445_v30 = vadd.f32 %v798_v1, %v797_v37  ;;  %v786_v36 = vadd.f32 %v2004_v59, %v785_v43 }
 0x257   :  { %2007 = vtanh.f32 %v2445_v30  ;;  %v790_v54 = vsel %vm789_vm5, %v2004_v59, %v786_v36 }
 0x258   :  { %v795_v4 = vsel %vm792_vm6, %v794_v22, %v790_v54  ;;  %v2696_v54 = vld [vmem:[#allocation7_spill] sm:$0xff] }
 0x25d   :  { %v2008_v53 = vpop.eup %2007 }
 0x25e   :  { %v801_v40 = vmul.f32 %v2008_v53, %v795_v4 }
 0x260   :  { %v802_v10 = vpack.c.bf16 %v801_v40, %v801_v40 }
 0x262   :  { %1875 = vst [vmem:[%s2686_s4 + $0x8] sm:$0xf] %v802_v10  ;;  %815 = vmatmul.bf16.vlgmr.msra.gmra.mxu0 %v802_v10  ;;  %828 = vmatmul.bf16.vlgmr.msra.gmra.mxu1 %v802_v10 }
 0x263   :  { %841 = vmatmul.bf16.vlgmr.msra.gmra.mxu2 %v802_v10  ;;  %854 = vmatmul.bf16.vlgmr.msra.gmra.mxu3 %v802_v10 }
 0x264   :  { %986 = vmatpush.bf16.msra.mxu0 %v2147_v3  ;;  %999 = vmatpush.bf16.msra.mxu1 %v2149_v7 }
 0x265   :  { %1012 = vmatpush.bf16.msra.mxu2 %v2151_v8  ;;  %1025 = vmatpush.bf16.msra.mxu3 %v2154_v12 }
 0x268   :  { %987 = vmatpush.bf16.msra.mxu0 %v2158_v16  ;;  %1000 = vmatpush.bf16.msra.mxu1 %v2160_v17 }
 0x269   :  { %1013 = vmatpush.bf16.msra.mxu2 %v2163_v21  ;;  %1026 = vmatpush.bf16.msra.mxu3 %v2165_v25 }
 0x26c   :  { %988 = vmatpush.bf16.msra.mxu0 %v2168_v29  ;;  %1001 = vmatpush.bf16.msra.mxu1 %v2172_v33 }
 0x26d   :  { %1014 = vmatpush.bf16.msra.mxu2 %v2174_v34  ;;  %1027 = vmatpush.bf16.msra.mxu3 %v2177_v38 }
 0x270   :  { %989 = vmatpush.bf16.msra.mxu0 %v2180_v44  ;;  %1002 = vmatpush.bf16.msra.mxu1 %v2184_v45 }
 0x271   :  { %1015 = vmatpush.bf16.msra.mxu2 %v2186_v46  ;;  %1028 = vmatpush.bf16.msra.mxu3 %v2189_v50 }
 0x272   :  { %1877 = vmatmul.msk.bf16.vlgmr.msrb.gmra.mxu0 %vm322_vm0, %v1876_v24  ;;  %1878 = vmatmul.msk.bf16.vlgmr.msrb.gmra.mxu1 %vm322_vm0, %v1876_v24 }
 0x273   :  { %1879 = vmatmul.msk.bf16.vlgmr.msrb.gmra.mxu2 %vm322_vm0, %v1876_v24  ;;  %1880 = vmatmul.msk.bf16.vlgmr.msrb.gmra.mxu3 %vm322_vm0, %v1876_v24 }
 0x274   :  { %990 = vmatpush.bf16.msra.mxu0 %v2192_v56  ;;  %1003 = vmatpush.bf16.msra.mxu1 %v2196_v57 }
 0x275   :  { %1016 = vmatpush.bf16.msra.mxu2 %v2198_v58  ;;  %1029 = vmatpush.bf16.msra.mxu3 %v2201_v62 }
 0x278   :  { %991 = vmatpush.bf16.msra.mxu0 %v2204_v5  ;;  %1004 = vmatpush.bf16.msra.mxu1 %v2208_v6 }
 0x279   :  { %1017 = vmatpush.bf16.msra.mxu2 %v2210_v9  ;;  %1030 = vmatpush.bf16.msra.mxu3 %v2213_v14 }
 0x27c   :  { %992 = vmatpush.bf16.msra.mxu0 %v2216_v23  ;;  %1005 = vmatpush.bf16.msra.mxu1 %v2220_v26 }
 0x27d   :  { %1018 = vmatpush.bf16.msra.mxu2 %v2222_v27  ;;  %1031 = vmatpush.bf16.msra.mxu3 %v2225_v32 }
 0x280   :  { %993 = vmatpush.bf16.msra.mxu0 %v2234_v42  ;;  %1006 = vmatpush.bf16.msra.mxu1 %v2244_v48 }
 0x281   :  { %1019 = vmatpush.bf16.msra.mxu2 %v2246_v49  ;;  %1032 = vmatpush.bf16.msra.mxu3 %v2249_v51 }
 0x284   :  { %1048 = vmatpush.bf16.msrb.mxu0 %v2251_v52  ;;  %1061 = vmatpush.bf16.msrb.mxu1 %v2259_v55 }
 0x285   :  { %1087 = vmatpush.bf16.msrb.mxu3 %v2274_v63  ;;  %1074 = vmatpush.bf16.msrb.mxu2 %v2270_v61 }
 0x2df   :  { %v816_v37 = vpop.f32.mrf.mxu0  ;;  %v829_v1 = vpop.f32.mrf.mxu1 }
 0x2e6   :  { %v842_v2 = vpop.f32.mrf.mxu2  ;;  %v855_v59 = vpop.f32.mrf.mxu3 }
 0x2e7   :  { %v818_v39 = vpop.f32.mrf.mxu0  ;;  %v831_v35 = vpop.f32.mrf.mxu1 }
 0x2ee   :  { %v844_v15 = vpop.f32.mrf.mxu2  ;;  %v857_v11 = vpop.f32.mrf.mxu3 }
 0x2ef   :  { %v871_v47 = vpop.f32.mrf.mxu0  ;;  %v884_v18 = vpop.f32.mrf.mxu1 }
 0x2f0   :  { %v872_v60 = vadd.f32 %v871_v47, %v2325_v19  ;;  %v885_v31 = vadd.f32 %v884_v18, %v2327_v20 }
 0x2f2   :  { %v914_v28 = vadd.f32 %v872_v60, %v816_v37  ;;  %v915_v41 = vadd.f32 %v885_v31, %v829_v1  ;;  %v2697_v1 = vld [vmem:[#allocation8_spill] sm:$0xff] }
 0x2f4   :  { %v1881_v43 = vmul.f32 -1.442695, %v914_v28  ;;  %v1882_v36 = vmul.f32 -1.442695, %v915_v41 }
 0x2f6   :  { %2009 = vpow2.f32 %v1881_v43  ;;  %v897_v0 = vpop.f32.mrf.mxu2  ;;  %v910_v13 = vpop.f32.mrf.mxu3 }
 0x2f7   :  { %2011 = vpow2.f32 %v1882_v36  ;;  %v911_v22 = vadd.f32 %v910_v13, %v2696_v54  ;;  %v873_v53 = vpop.f32.mrf.mxu0  ;;  %v886_v4 = vpop.f32.mrf.mxu1  ;;  %v898_v47 = vadd.f32 %v897_v0, %v2697_v1 }
 0x2f9   :  { %v917_v40 = vadd.f32 %v911_v22, %v855_v59  ;;  %v916_v28 = vadd.f32 %v898_v47, %v842_v2 }
 0x2fb   :  { %v1883_v10 = vmul.f32 -1.442695, %v917_v40 }
 0x2fc   :  { %v2010_v24 = vpop.eup %2009 }
 0x2fd   :  { %v2012_v39 = vpop.eup %2011  ;;  %v921_v35 = vadd.f32 1.0, %v2010_v24  ;;  %2013 = vpow2.f32 %v1883_v10 }
 0x2fe   :  { %v940_v15 = vadd.f32 1.0, %v2012_v39  ;;  %v912_v11 = vpop.f32.mrf.mxu3  ;;  %v899_v37 = vpop.f32.mrf.mxu2 }
 0x2ff   :  { %2015 = vrcp.f32 %v921_v35  ;;  %v933_v22 = vand.u32 2147483648, %v921_v35  ;;  %v931_v40 = vand.u32 2147483647, %v921_v35  ;;  %vm927_vm9 = vweird.f32 %v921_v35 }
 0x300   :  { %2017 = vrcp.f32 %v940_v15  ;;  %v952_v53 = vand.u32 2147483648, %v940_v15  ;;  %v950_v24 = vand.u32 2147483647, %v940_v15  ;;  %vm946_vm10 = vweird.f32 %v940_v15 }
 0x301   :  { %v934_v2 = vor.u32 1.1754944e-38, %v933_v22  ;;  %vm932_vm13 = vcmp.eq.f32.partialorder %v931_v40, 8.507059e+37 }
 0x302   :  { %v953_v47 = vor.u32 1.1754944e-38, %v952_v53  ;;  %vm951_vm14 = vcmp.eq.f32.partialorder %v950_v24, 8.507059e+37 }
 0x303   :  { %v2014_v18 = vpop.eup %2013 }
 0x304   :  { %v960_v60 = vadd.f32 1.0, %v2014_v18 }
 0x305   :  { %v2016_v31 = vpop.eup %2015 }
 0x306   :  { %v2018_v41 = vpop.eup %2017  ;;  %v923_v43 = vmul.f32 %v2016_v31, %v921_v35  ;;  %2019 = vrcp.f32 %v960_v60  ;;  %vm928_vm7 = vweird.f32 %v2016_v31  ;;  %v972_v22 = vand.u32 2147483648, %v960_v60 }
 0x307   :  { %v942_v59 = vmul.f32 %v2018_v41, %v940_v15  ;;  %2021 = vtanh.f32 %v916_v28  ;;  %vm947_vm8 = vweird.f32 %v2018_v41  ;;  %vm929_vm11 = vmor %vm927_vm9, %vm928_vm7  ;;  %vm966_vm1 = vweird.f32 %v960_v60 }
 0x308   :  { %v924_v36 = vsub.f32 1.0, %v923_v43  ;;  %vm948_vm12 = vmor %vm946_vm10, %vm947_vm8  ;;  %v973_v40 = vor.u32 1.1754944e-38, %v972_v22 }
 0x309   :  { %v943_v13 = vsub.f32 1.0, %v942_v59 }
 0x30a   :  { %v925_v4 = vmul.f32 %v2016_v31, %v924_v36 }
 0x30b   :  { %v944_v10 = vmul.f32 %v2018_v41, %v943_v13 }
 0x30c   :  { %v2020_v0 = vpop.eup %2019  ;;  %v926_v39 = vadd.f32 %v2016_v31, %v925_v4 }
 0x30d   :  { %v945_v11 = vadd.f32 %v2018_v41, %v944_v10  ;;  %v962_v37 = vmul.f32 %v2020_v0, %v960_v60  ;;  %v2022_v28 = vpop.eup %2021  ;;  %vm967_vm15 = vweird.f32 %v2020_v0 }
 0x30e   :  { %v930_v18 = vsel %vm929_vm11, %v2016_v31, %v926_v39  ;;  %v970_v31 = vand.u32 2147483647, %v960_v60  ;;  %vm968_vm2 = vmor %vm966_vm1, %vm967_vm15 }
 0x30f   :  { %v935_v43 = vsel %vm932_vm13, %v934_v2, %v930_v18  ;;  %v949_v59 = vsel %vm948_vm12, %v2018_v41, %v945_v11  ;;  %v963_v36 = vsub.f32 1.0, %v962_v37 }
 0x310   :  { %v954_v13 = vsel %vm951_vm14, %v953_v47, %v949_v59  ;;  %v977_v1 = vmul.f32 %v2022_v28, %v935_v43  ;;  %vm971_vm3 = vcmp.eq.f32.partialorder %v970_v31, 8.507059e+37 }
 0x311   :  { %v976_v54 = vmul.f32 %v954_v13, %v2445_v30  ;;  %v964_v4 = vmul.f32 %v2020_v0, %v963_v36  ;;  %v1885_v30 = vld [vmem:[%s2682_s0 + $0x10] sm:$0xf] }
 0x313   :  { %v2499_v35 = vadd.f32 %v977_v1, %v976_v54  ;;  %v965_v15 = vadd.f32 %v2020_v0, %v964_v4 }
 0x315   :  { %2023 = vtanh.f32 %v2499_v35  ;;  %v969_v53 = vsel %vm968_vm2, %v2020_v0, %v965_v15 }
 0x316   :  { %v974_v10 = vsel %vm971_vm3, %v973_v40, %v969_v53  ;;  %v2698_v53 = vld [vmem:[#allocation7_spill] sm:$0xff] }
 0x31b   :  { %v2024_v41 = vpop.eup %2023 }
 0x31c   :  { %v980_v24 = vmul.f32 %v2024_v41, %v974_v10 }
 0x31e   :  { %v981_v39 = vpack.c.bf16 %v980_v24, %v980_v24 }
 0x320   :  { %1884 = vst [vmem:[%s2686_s4 + $0xc] sm:$0xf] %v981_v39  ;;  %994 = vmatmul.bf16.vlgmr.msra.gmra.mxu0 %v981_v39  ;;  %1007 = vmatmul.bf16.vlgmr.msra.gmra.mxu1 %v981_v39 }
 0x321   :  { %1020 = vmatmul.bf16.vlgmr.msra.gmra.mxu2 %v981_v39  ;;  %1033 = vmatmul.bf16.vlgmr.msra.gmra.mxu3 %v981_v39 }
 0x322   :  { %1165 = vmatpush.bf16.msra.mxu0 %v2147_v3  ;;  %1178 = vmatpush.bf16.msra.mxu1 %v2149_v7 }
 0x323   :  { %1191 = vmatpush.bf16.msra.mxu2 %v2151_v8  ;;  %1204 = vmatpush.bf16.msra.mxu3 %v2154_v12 }
 0x326   :  { %1166 = vmatpush.bf16.msra.mxu0 %v2158_v16  ;;  %1179 = vmatpush.bf16.msra.mxu1 %v2160_v17 }
 0x327   :  { %1192 = vmatpush.bf16.msra.mxu2 %v2163_v21  ;;  %1205 = vmatpush.bf16.msra.mxu3 %v2165_v25 }
 0x32a   :  { %1167 = vmatpush.bf16.msra.mxu0 %v2168_v29  ;;  %1180 = vmatpush.bf16.msra.mxu1 %v2172_v33 }
 0x32b   :  { %1193 = vmatpush.bf16.msra.mxu2 %v2174_v34  ;;  %1206 = vmatpush.bf16.msra.mxu3 %v2177_v38 }
 0x32e   :  { %1168 = vmatpush.bf16.msra.mxu0 %v2180_v44  ;;  %1181 = vmatpush.bf16.msra.mxu1 %v2184_v45 }
 0x32f   :  { %1194 = vmatpush.bf16.msra.mxu2 %v2186_v46  ;;  %1207 = vmatpush.bf16.msra.mxu3 %v2189_v50 }
 0x330   :  { %1886 = vmatmul.msk.bf16.vlgmr.msrb.gmra.mxu0 %vm322_vm0, %v1885_v30  ;;  %1887 = vmatmul.msk.bf16.vlgmr.msrb.gmra.mxu1 %vm322_vm0, %v1885_v30 }
 0x331   :  { %1888 = vmatmul.msk.bf16.vlgmr.msrb.gmra.mxu2 %vm322_vm0, %v1885_v30  ;;  %1889 = vmatmul.msk.bf16.vlgmr.msrb.gmra.mxu3 %vm322_vm0, %v1885_v30 }
 0x332   :  { %1169 = vmatpush.bf16.msra.mxu0 %v2192_v56  ;;  %1182 = vmatpush.bf16.msra.mxu1 %v2196_v57 }
 0x333   :  { %1195 = vmatpush.bf16.msra.mxu2 %v2198_v58  ;;  %1208 = vmatpush.bf16.msra.mxu3 %v2201_v62 }
 0x336   :  { %1170 = vmatpush.bf16.msra.mxu0 %v2204_v5  ;;  %1183 = vmatpush.bf16.msra.mxu1 %v2208_v6 }
 0x337   :  { %1196 = vmatpush.bf16.msra.mxu2 %v2210_v9  ;;  %1209 = vmatpush.bf16.msra.mxu3 %v2213_v14 }
 0x33a   :  { %1171 = vmatpush.bf16.msra.mxu0 %v2216_v23  ;;  %1184 = vmatpush.bf16.msra.mxu1 %v2220_v26 }
 0x33b   :  { %1197 = vmatpush.bf16.msra.mxu2 %v2222_v27  ;;  %1210 = vmatpush.bf16.msra.mxu3 %v2225_v32 }
 0x33e   :  { %1172 = vmatpush.bf16.msra.mxu0 %v2234_v42  ;;  %1185 = vmatpush.bf16.msra.mxu1 %v2244_v48 }
 0x33f   :  { %1198 = vmatpush.bf16.msra.mxu2 %v2246_v49  ;;  %1211 = vmatpush.bf16.msra.mxu3 %v2249_v51 }
 0x342   :  { %1227 = vmatpush.bf16.msrb.mxu0 %v2251_v52  ;;  %1240 = vmatpush.bf16.msrb.mxu1 %v2259_v55 }
 0x343   :  { %1266 = vmatpush.bf16.msrb.mxu3 %v2274_v63  ;;  %1253 = vmatpush.bf16.msrb.mxu2 %v2270_v61 }
 0x39d   :  { %v995_v54 = vpop.f32.mrf.mxu0  ;;  %v1008_v1 = vpop.f32.mrf.mxu1 }
 0x3a4   :  { %v1021_v60 = vpop.f32.mrf.mxu2  ;;  %v1034_v0 = vpop.f32.mrf.mxu3 }
 0x3a5   :  { %v997_v2 = vpop.f32.mrf.mxu0  ;;  %v1010_v11 = vpop.f32.mrf.mxu1 }
 0x3ac   :  { %v1023_v37 = vpop.f32.mrf.mxu2  ;;  %v1036_v47 = vpop.f32.mrf.mxu3 }
 0x3ad   :  { %v1050_v18 = vpop.f32.mrf.mxu0  ;;  %v1063_v28 = vpop.f32.mrf.mxu1 }
 0x3ae   :  { %v1051_v43 = vadd.f32 %v1050_v18, %v2325_v19  ;;  %v1064_v59 = vadd.f32 %v1063_v28, %v2327_v20 }
 0x3b0   :  { %v1093_v36 = vadd.f32 %v1051_v43, %v995_v54  ;;  %v1094_v13 = vadd.f32 %v1064_v59, %v1008_v1  ;;  %v2699_v1 = vld [vmem:[#allocation8_spill] sm:$0xff] }
 0x3b2   :  { %v1890_v4 = vmul.f32 -1.442695, %v1093_v36  ;;  %v1891_v15 = vmul.f32 -1.442695, %v1094_v13 }
 0x3b4   :  { %2025 = vpow2.f32 %v1890_v4  ;;  %v1076_v22 = vpop.f32.mrf.mxu2  ;;  %v1089_v31 = vpop.f32.mrf.mxu3 }
 0x3b5   :  { %2027 = vpow2.f32 %v1891_v15  ;;  %v1090_v40 = vadd.f32 %v1089_v31, %v2698_v53  ;;  %v1052_v41 = vpop.f32.mrf.mxu0  ;;  %v1065_v10 = vpop.f32.mrf.mxu1  ;;  %v1077_v18 = vadd.f32 %v1076_v22, %v2699_v1 }
 0x3b7   :  { %v1096_v24 = vadd.f32 %v1090_v40, %v1034_v0  ;;  %v1095_v36 = vadd.f32 %v1077_v18, %v1021_v60 }
 0x3b9   :  { %v1892_v39 = vmul.f32 -1.442695, %v1096_v24 }
 0x3ba   :  { %v2026_v30 = vpop.eup %2025 }
 0x3bb   :  { %v2028_v2 = vpop.eup %2027  ;;  %v1100_v11 = vadd.f32 1.0, %v2026_v30  ;;  %2029 = vpow2.f32 %v1892_v39 }
 0x3bc   :  { %v1119_v37 = vadd.f32 1.0, %v2028_v2  ;;  %v1091_v47 = vpop.f32.mrf.mxu3  ;;  %v1078_v54 = vpop.f32.mrf.mxu2 }
 0x3bd   :  { %2031 = vrcp.f32 %v1100_v11  ;;  %v1112_v40 = vand.u32 2147483648, %v1100_v11  ;;  %v1110_v24 = vand.u32 2147483647, %v1100_v11  ;;  %vm1106_vm6 = vweird.f32 %v1100_v11 }
 0x3be   :  { %2033 = vrcp.f32 %v1119_v37  ;;  %v1131_v41 = vand.u32 2147483648, %v1119_v37  ;;  %v1129_v30 = vand.u32 2147483647, %v1119_v37  ;;  %vm1125_vm7 = vweird.f32 %v1119_v37 }
 0x3bf   :  { %v1113_v60 = vor.u32 1.1754944e-38, %v1112_v40  ;;  %vm1111_vm10 = vcmp.eq.f32.partialorder %v1110_v24, 8.507059e+37 }
 0x3c0   :  { %v1132_v18 = vor.u32 1.1754944e-38, %v1131_v41  ;;  %vm1130_vm11 = vcmp.eq.f32.partialorder %v1129_v30, 8.507059e+37 }
 0x3c1   :  { %v2030_v28 = vpop.eup %2029 }
 0x3c2   :  { %v1139_v43 = vadd.f32 1.0, %v2030_v28 }
 0x3c3   :  { %v2032_v59 = vpop.eup %2031 }
 0x3c4   :  { %v2034_v13 = vpop.eup %2033  ;;  %v1102_v4 = vmul.f32 %v2032_v59, %v1100_v11  ;;  %2035 = vrcp.f32 %v1139_v43  ;;  %vm1107_vm4 = vweird.f32 %v2032_v59  ;;  %v1151_v40 = vand.u32 2147483648, %v1139_v43 }
 0x3c5   :  { %v1121_v0 = vmul.f32 %v2034_v13, %v1119_v37  ;;  %2037 = vtanh.f32 %v1095_v36  ;;  %vm1126_vm5 = vweird.f32 %v2034_v13  ;;  %vm1108_vm8 = vmor %vm1106_vm6, %vm1107_vm4  ;;  %vm1145_vm13 = vweird.f32 %v1139_v43 }
 0x3c6   :  { %v1103_v15 = vsub.f32 1.0, %v1102_v4  ;;  %vm1127_vm9 = vmor %vm1125_vm7, %vm1126_vm5  ;;  %v1152_v24 = vor.u32 1.1754944e-38, %v1151_v40 }
 0x3c7   :  { %v1122_v31 = vsub.f32 1.0, %v1121_v0 }
 0x3c8   :  { %v1104_v10 = vmul.f32 %v2032_v59, %v1103_v15 }
 0x3c9   :  { %v1123_v39 = vmul.f32 %v2034_v13, %v1122_v31 }
 0x3ca   :  { %v2036_v22 = vpop.eup %2035  ;;  %v1105_v2 = vadd.f32 %v2032_v59, %v1104_v10 }
 0x3cb   :  { %v1124_v47 = vadd.f32 %v2034_v13, %v1123_v39  ;;  %v1141_v54 = vmul.f32 %v2036_v22, %v1139_v43  ;;  %v2038_v36 = vpop.eup %2037  ;;  %vm1146_vm12 = vweird.f32 %v2036_v22 }
 0x3cc   :  { %v1109_v28 = vsel %vm1108_vm8, %v2032_v59, %v1105_v2  ;;  %v1149_v59 = vand.u32 2147483647, %v1139_v43  ;;  %vm1147_vm14 = vmor %vm1145_vm13, %vm1146_vm12 }
 0x3cd   :  { %v1114_v4 = vsel %vm1111_vm10, %v1113_v60, %v1109_v28  ;;  %v1128_v0 = vsel %vm1127_vm9, %v2034_v13, %v1124_v47  ;;  %v1142_v15 = vsub.f32 1.0, %v1141_v54 }
 0x3ce   :  { %v1133_v31 = vsel %vm1130_vm11, %v1132_v18, %v1128_v0  ;;  %v1156_v1 = vmul.f32 %v2038_v36, %v1114_v4  ;;  %vm1150_vm15 = vcmp.eq.f32.partialorder %v1149_v59, 8.507059e+37 }
 0x3cf   :  { %v1155_v53 = vmul.f32 %v1133_v31, %v2499_v35  ;;  %v1143_v10 = vmul.f32 %v2036_v22, %v1142_v15  ;;  %v1894_v35 = vld [vmem:[%s2682_s0 + $0x14] sm:$0xf] }
 0x3d1   :  { %v2553_v11 = vadd.f32 %v1156_v1, %v1155_v53  ;;  %v1144_v37 = vadd.f32 %v2036_v22, %v1143_v10 }
 0x3d3   :  { %2039 = vtanh.f32 %v2553_v11  ;;  %v1148_v41 = vsel %vm1147_vm14, %v2036_v22, %v1144_v37 }
 0x3d4   :  { %v1153_v39 = vsel %vm1150_vm15, %v1152_v24, %v1148_v41  ;;  %v2700_v41 = vld [vmem:[#allocation7_spill] sm:$0xff] }
 0x3d9   :  { %v2040_v13 = vpop.eup %2039 }
 0x3da   :  { %v1159_v30 = vmul.f32 %v2040_v13, %v1153_v39 }
 0x3dc   :  { %v1160_v2 = vpack.c.bf16 %v1159_v30, %v1159_v30 }
 0x3de   :  { %1893 = vst [vmem:[%s2686_s4 + $0x10] sm:$0xf] %v1160_v2  ;;  %1173 = vmatmul.bf16.vlgmr.msra.gmra.mxu0 %v1160_v2  ;;  %1186 = vmatmul.bf16.vlgmr.msra.gmra.mxu1 %v1160_v2 }
 0x3df   :  { %1199 = vmatmul.bf16.vlgmr.msra.gmra.mxu2 %v1160_v2  ;;  %1212 = vmatmul.bf16.vlgmr.msra.gmra.mxu3 %v1160_v2 }
 0x3e0   :  { %1344 = vmatpush.bf16.msra.mxu0 %v2147_v3  ;;  %1357 = vmatpush.bf16.msra.mxu1 %v2149_v7 }
 0x3e1   :  { %1370 = vmatpush.bf16.msra.mxu2 %v2151_v8  ;;  %1383 = vmatpush.bf16.msra.mxu3 %v2154_v12 }
 0x3e4   :  { %1345 = vmatpush.bf16.msra.mxu0 %v2158_v16  ;;  %1358 = vmatpush.bf16.msra.mxu1 %v2160_v17 }
 0x3e5   :  { %1371 = vmatpush.bf16.msra.mxu2 %v2163_v21  ;;  %1384 = vmatpush.bf16.msra.mxu3 %v2165_v25 }
 0x3e8   :  { %1346 = vmatpush.bf16.msra.mxu0 %v2168_v29  ;;  %1359 = vmatpush.bf16.msra.mxu1 %v2172_v33 }
 0x3e9   :  { %1372 = vmatpush.bf16.msra.mxu2 %v2174_v34  ;;  %1385 = vmatpush.bf16.msra.mxu3 %v2177_v38 }
 0x3ec   :  { %1347 = vmatpush.bf16.msra.mxu0 %v2180_v44  ;;  %1360 = vmatpush.bf16.msra.mxu1 %v2184_v45 }
 0x3ed   :  { %1373 = vmatpush.bf16.msra.mxu2 %v2186_v46  ;;  %1386 = vmatpush.bf16.msra.mxu3 %v2189_v50 }
 0x3ee   :  { %1895 = vmatmul.msk.bf16.vlgmr.msrb.gmra.mxu0 %vm322_vm0, %v1894_v35  ;;  %1896 = vmatmul.msk.bf16.vlgmr.msrb.gmra.mxu1 %vm322_vm0, %v1894_v35 }
 0x3ef   :  { %1897 = vmatmul.msk.bf16.vlgmr.msrb.gmra.mxu2 %vm322_vm0, %v1894_v35  ;;  %1898 = vmatmul.msk.bf16.vlgmr.msrb.gmra.mxu3 %vm322_vm0, %v1894_v35 }
 0x3f0   :  { %1348 = vmatpush.bf16.msra.mxu0 %v2192_v56  ;;  %1361 = vmatpush.bf16.msra.mxu1 %v2196_v57 }
 0x3f1   :  { %1374 = vmatpush.bf16.msra.mxu2 %v2198_v58  ;;  %1387 = vmatpush.bf16.msra.mxu3 %v2201_v62 }
 0x3f4   :  { %1349 = vmatpush.bf16.msra.mxu0 %v2204_v5  ;;  %1362 = vmatpush.bf16.msra.mxu1 %v2208_v6 }
 0x3f5   :  { %1375 = vmatpush.bf16.msra.mxu2 %v2210_v9  ;;  %1388 = vmatpush.bf16.msra.mxu3 %v2213_v14 }
 0x3f8   :  { %1350 = vmatpush.bf16.msra.mxu0 %v2216_v23  ;;  %1363 = vmatpush.bf16.msra.mxu1 %v2220_v26 }
 0x3f9   :  { %1376 = vmatpush.bf16.msra.mxu2 %v2222_v27  ;;  %1389 = vmatpush.bf16.msra.mxu3 %v2225_v32 }
 0x3fc   :  { %1351 = vmatpush.bf16.msra.mxu0 %v2234_v42  ;;  %1364 = vmatpush.bf16.msra.mxu1 %v2244_v48 }
 0x3fd   :  { %1377 = vmatpush.bf16.msra.mxu2 %v2246_v49  ;;  %1390 = vmatpush.bf16.msra.mxu3 %v2249_v51 }
 0x400   :  { %1406 = vmatpush.bf16.msrb.mxu0 %v2251_v52  ;;  %1419 = vmatpush.bf16.msrb.mxu1 %v2259_v55 }
 0x401   :  { %1445 = vmatpush.bf16.msrb.mxu3 %v2274_v63  ;;  %1432 = vmatpush.bf16.msrb.mxu2 %v2270_v61 }
 0x45b   :  { %v1174_v53 = vpop.f32.mrf.mxu0  ;;  %v1187_v1 = vpop.f32.mrf.mxu1 }
 0x462   :  { %v1200_v43 = vpop.f32.mrf.mxu2  ;;  %v1213_v22 = vpop.f32.mrf.mxu3 }
 0x463   :  { %v1176_v60 = vpop.f32.mrf.mxu0  ;;  %v1189_v47 = vpop.f32.mrf.mxu1 }
 0x46a   :  { %v1202_v54 = vpop.f32.mrf.mxu2  ;;  %v1215_v18 = vpop.f32.mrf.mxu3 }
 0x46b   :  { %v1229_v28 = vpop.f32.mrf.mxu0  ;;  %v1242_v36 = vpop.f32.mrf.mxu1 }
 0x46c   :  { %v1230_v4 = vadd.f32 %v1229_v28, %v2325_v19  ;;  %v1243_v0 = vadd.f32 %v1242_v36, %v2327_v20 }
 0x46e   :  { %v1272_v15 = vadd.f32 %v1230_v4, %v1174_v53  ;;  %v1273_v31 = vadd.f32 %v1243_v0, %v1187_v1  ;;  %v2701_v1 = vld [vmem:[#allocation8_spill] sm:$0xff] }
 0x470   :  { %v1899_v10 = vmul.f32 -1.442695, %v1272_v15  ;;  %v1900_v37 = vmul.f32 -1.442695, %v1273_v31 }
 0x472   :  { %2041 = vpow2.f32 %v1899_v10  ;;  %v1255_v40 = vpop.f32.mrf.mxu2  ;;  %v1268_v59 = vpop.f32.mrf.mxu3 }
 0x473   :  { %2043 = vpow2.f32 %v1900_v37  ;;  %v1269_v24 = vadd.f32 %v1268_v59, %v2700_v41  ;;  %v1231_v13 = vpop.f32.mrf.mxu0  ;;  %v1244_v39 = vpop.f32.mrf.mxu1  ;;  %v1256_v28 = vadd.f32 %v1255_v40, %v2701_v1 }
 0x475   :  { %v1275_v30 = vadd.f32 %v1269_v24, %v1213_v22  ;;  %v1274_v15 = vadd.f32 %v1256_v28, %v1200_v43 }
 0x477   :  { %v1901_v2 = vmul.f32 -1.442695, %v1275_v30 }
 0x478   :  { %v2042_v35 = vpop.eup %2041 }
 0x479   :  { %v2044_v60 = vpop.eup %2043  ;;  %v1279_v47 = vadd.f32 1.0, %v2042_v35  ;;  %2045 = vpow2.f32 %v1901_v2 }
 0x47a   :  { %v1298_v54 = vadd.f32 1.0, %v2044_v60  ;;  %v1270_v18 = vpop.f32.mrf.mxu3  ;;  %v1257_v53 = vpop.f32.mrf.mxu2 }
 0x47b   :  { %2047 = vrcp.f32 %v1279_v47  ;;  %v1291_v24 = vand.u32 2147483648, %v1279_v47  ;;  %v1289_v30 = vand.u32 2147483647, %v1279_v47  ;;  %vm1285_vm3 = vweird.f32 %v1279_v47 }
 0x47c   :  { %2049 = vrcp.f32 %v1298_v54  ;;  %v1310_v13 = vand.u32 2147483648, %v1298_v54  ;;  %v1308_v35 = vand.u32 2147483647, %v1298_v54  ;;  %vm1304_vm4 = vweird.f32 %v1298_v54 }
 0x47d   :  { %v1292_v43 = vor.u32 1.1754944e-38, %v1291_v24  ;;  %vm1290_vm7 = vcmp.eq.f32.partialorder %v1289_v30, 8.507059e+37 }
 0x47e   :  { %v1311_v28 = vor.u32 1.1754944e-38, %v1310_v13  ;;  %vm1309_vm8 = vcmp.eq.f32.partialorder %v1308_v35, 8.507059e+37 }
 0x47f   :  { %v2046_v36 = vpop.eup %2045 }
 0x480   :  { %v1318_v4 = vadd.f32 1.0, %v2046_v36 }
 0x481   :  { %v2048_v0 = vpop.eup %2047 }
 0x482   :  { %v2050_v31 = vpop.eup %2049  ;;  %v1281_v10 = vmul.f32 %v2048_v0, %v1279_v47  ;;  %2051 = vrcp.f32 %v1318_v4  ;;  %vm1286_vm1 = vweird.f32 %v2048_v0  ;;  %v1330_v24 = vand.u32 2147483648, %v1318_v4 }
 0x483   :  { %v1300_v22 = vmul.f32 %v2050_v31, %v1298_v54  ;;  %2053 = vtanh.f32 %v1274_v15  ;;  %vm1305_vm2 = vweird.f32 %v2050_v31  ;;  %vm1287_vm5 = vmor %vm1285_vm3, %vm1286_vm1  ;;  %vm1324_vm10 = vweird.f32 %v1318_v4 }
 0x484   :  { %v1282_v37 = vsub.f32 1.0, %v1281_v10  ;;  %vm1306_vm6 = vmor %vm1304_vm4, %vm1305_vm2  ;;  %v1331_v30 = vor.u32 1.1754944e-38, %v1330_v24 }
 0x485   :  { %v1301_v59 = vsub.f32 1.0, %v1300_v22 }
 0x486   :  { %v1283_v39 = vmul.f32 %v2048_v0, %v1282_v37 }
 0x487   :  { %v1302_v2 = vmul.f32 %v2050_v31, %v1301_v59 }
 0x488   :  { %v2052_v40 = vpop.eup %2051  ;;  %v1284_v60 = vadd.f32 %v2048_v0, %v1283_v39 }
 0x489   :  { %v1303_v18 = vadd.f32 %v2050_v31, %v1302_v2  ;;  %v1320_v53 = vmul.f32 %v2052_v40, %v1318_v4  ;;  %v2054_v15 = vpop.eup %2053  ;;  %vm1325_vm9 = vweird.f32 %v2052_v40 }
 0x48a   :  { %v1288_v36 = vsel %vm1287_vm5, %v2048_v0, %v1284_v60  ;;  %v1328_v0 = vand.u32 2147483647, %v1318_v4  ;;  %vm1326_vm11 = vmor %vm1324_vm10, %vm1325_vm9 }
 0x48b   :  { %v1293_v10 = vsel %vm1290_vm7, %v1292_v43, %v1288_v36  ;;  %v1307_v22 = vsel %vm1306_vm6, %v2050_v31, %v1303_v18  ;;  %v1321_v37 = vsub.f32 1.0, %v1320_v53 }
 0x48c   :  { %v1312_v59 = vsel %vm1309_vm8, %v1311_v28, %v1307_v22  ;;  %v1335_v1 = vmul.f32 %v2054_v15, %v1293_v10  ;;  %vm1329_vm12 = vcmp.eq.f32.partialorder %v1328_v0, 8.507059e+37 }
 0x48d   :  { %v1334_v41 = vmul.f32 %v1312_v59, %v2553_v11  ;;  %v1322_v39 = vmul.f32 %v2052_v40, %v1321_v37 }
 0x48f   :  { %v2607_v47 = vadd.f32 %v1335_v1, %v1334_v41  ;;  %v1323_v54 = vadd.f32 %v2052_v40, %v1322_v39 }
 0x491   :  { %2055 = vtanh.f32 %v2607_v47  ;;  %v1327_v13 = vsel %vm1326_vm11, %v2052_v40, %v1323_v54 }
 0x492   :  { %v1332_v2 = vsel %vm1329_vm12, %v1331_v30, %v1327_v13 }
 0x497   :  { %v2056_v31 = vpop.eup %2055 }
 0x498   :  { %v1338_v35 = vmul.f32 %v2056_v31, %v1332_v2 }
 0x49a   :  { %v1339_v60 = vpack.c.bf16 %v1338_v35, %v1338_v35 }
 0x49c   :  { %1902 = vst [vmem:[%s2686_s4 + $0x14] sm:$0xf] %v1339_v60  ;;  %1352 = vmatmul.bf16.vlgmr.msra.gmra.mxu0 %v1339_v60  ;;  %1365 = vmatmul.bf16.vlgmr.msra.gmra.mxu1 %v1339_v60 }
 0x49d   :  { %1378 = vmatmul.bf16.vlgmr.msra.gmra.mxu2 %v1339_v60  ;;  %1391 = vmatmul.bf16.vlgmr.msra.gmra.mxu3 %v1339_v60 }
 0x49e   :  { %1523 = vmatpush.bf16.msra.mxu0 %v2147_v3  ;;  %1536 = vmatpush.bf16.msra.mxu1 %v2149_v7  ;;  %v1903_v3 = vld [vmem:[%s2682_s0 + $0x18] sm:$0xf] }
 0x49f   :  { %1549 = vmatpush.bf16.msra.mxu2 %v2151_v8  ;;  %1562 = vmatpush.bf16.msra.mxu3 %v2154_v12 }
 0x4a2   :  { %1524 = vmatpush.bf16.msra.mxu0 %v2158_v16  ;;  %1537 = vmatpush.bf16.msra.mxu1 %v2160_v17 }
 0x4a3   :  { %1550 = vmatpush.bf16.msra.mxu2 %v2163_v21  ;;  %1563 = vmatpush.bf16.msra.mxu3 %v2165_v25 }
 0x4a6   :  { %1525 = vmatpush.bf16.msra.mxu0 %v2168_v29  ;;  %1538 = vmatpush.bf16.msra.mxu1 %v2172_v33 }
 0x4a7   :  { %1551 = vmatpush.bf16.msra.mxu2 %v2174_v34  ;;  %1564 = vmatpush.bf16.msra.mxu3 %v2177_v38 }
 0x4aa   :  { %1526 = vmatpush.bf16.msra.mxu0 %v2180_v44  ;;  %1539 = vmatpush.bf16.msra.mxu1 %v2184_v45 }
 0x4ab   :  { %1552 = vmatpush.bf16.msra.mxu2 %v2186_v46  ;;  %1565 = vmatpush.bf16.msra.mxu3 %v2189_v50 }
 0x4ac   :  { %1904 = vmatmul.msk.bf16.vlgmr.msrb.gmra.mxu0 %vm322_vm0, %v1903_v3  ;;  %1905 = vmatmul.msk.bf16.vlgmr.msrb.gmra.mxu1 %vm322_vm0, %v1903_v3 }
 0x4ad   :  { %1906 = vmatmul.msk.bf16.vlgmr.msrb.gmra.mxu2 %vm322_vm0, %v1903_v3  ;;  %1907 = vmatmul.msk.bf16.vlgmr.msrb.gmra.mxu3 %vm322_vm0, %v1903_v3 }
 0x4ae   :  { %1527 = vmatpush.bf16.msra.mxu0 %v2192_v56  ;;  %1540 = vmatpush.bf16.msra.mxu1 %v2196_v57 }
 0x4af   :  { %1553 = vmatpush.bf16.msra.mxu2 %v2198_v58  ;;  %1566 = vmatpush.bf16.msra.mxu3 %v2201_v62  ;;  %v2702_v62 = vld [vmem:[#allocation7_spill] sm:$0xff] }
 0x4b2   :  { %1528 = vmatpush.bf16.msra.mxu0 %v2204_v5  ;;  %1541 = vmatpush.bf16.msra.mxu1 %v2208_v6 }
 0x4b3   :  { %1554 = vmatpush.bf16.msra.mxu2 %v2210_v9  ;;  %1567 = vmatpush.bf16.msra.mxu3 %v2213_v14 }
 0x4b6   :  { %1529 = vmatpush.bf16.msra.mxu0 %v2216_v23  ;;  %1542 = vmatpush.bf16.msra.mxu1 %v2220_v26 }
 0x4b7   :  { %1555 = vmatpush.bf16.msra.mxu2 %v2222_v27  ;;  %1568 = vmatpush.bf16.msra.mxu3 %v2225_v32 }
 0x4ba   :  { %1530 = vmatpush.bf16.msra.mxu0 %v2234_v42  ;;  %1543 = vmatpush.bf16.msra.mxu1 %v2244_v48 }
 0x4bb   :  { %1556 = vmatpush.bf16.msra.mxu2 %v2246_v49  ;;  %1569 = vmatpush.bf16.msra.mxu3 %v2249_v51  ;;  %v2703_v51 = vld [vmem:[#allocation8_spill] sm:$0xff] }
 0x4be   :  { %1585 = vmatpush.bf16.msrb.mxu0 %v2251_v52  ;;  %1598 = vmatpush.bf16.msrb.mxu1 %v2259_v55 }
 0x4bf   :  { %1624 = vmatpush.bf16.msrb.mxu3 %v2274_v63  ;;  %1611 = vmatpush.bf16.msrb.mxu2 %v2270_v61 }
 0x519   :  { %v1353_v7 = vpop.f32.mrf.mxu0  ;;  %v1366_v8 = vpop.f32.mrf.mxu1 }
 0x520   :  { %v1379_v12 = vpop.f32.mrf.mxu2  ;;  %v1392_v16 = vpop.f32.mrf.mxu3 }
 0x521   :  { %v1355_v17 = vpop.f32.mrf.mxu0  ;;  %v1368_v21 = vpop.f32.mrf.mxu1 }
 0x528   :  { %v1381_v25 = vpop.f32.mrf.mxu2  ;;  %v1394_v29 = vpop.f32.mrf.mxu3 }
 0x529   :  { %v1408_v33 = vpop.f32.mrf.mxu0  ;;  %v1421_v34 = vpop.f32.mrf.mxu1 }
 0x52a   :  { %v1409_v38 = vadd.f32 %v1408_v33, %v2325_v19  ;;  %v1422_v44 = vadd.f32 %v1421_v34, %v2327_v20 }
 0x52c   :  { %v1451_v45 = vadd.f32 %v1409_v38, %v1353_v7  ;;  %v1452_v46 = vadd.f32 %v1422_v44, %v1366_v8 }
 0x52e   :  { %v1908_v50 = vmul.f32 -1.442695, %v1451_v45  ;;  %v1909_v56 = vmul.f32 -1.442695, %v1452_v46 }
 0x530   :  { %2057 = vpow2.f32 %v1908_v50  ;;  %v1434_v57 = vpop.f32.mrf.mxu2  ;;  %v1447_v58 = vpop.f32.mrf.mxu3 }
 0x531   :  { %2059 = vpow2.f32 %v1909_v56  ;;  %v1448_v5 = vadd.f32 %v1447_v58, %v2702_v62  ;;  %v1410_v6 = vpop.f32.mrf.mxu0  ;;  %v1423_v9 = vpop.f32.mrf.mxu1  ;;  %v1435_v52 = vadd.f32 %v1434_v57, %v2703_v51 }
 0x533   :  { %v1454_v14 = vadd.f32 %v1448_v5, %v1392_v16  ;;  %v1453_v11 = vadd.f32 %v1435_v52, %v1379_v12 }
 0x535   :  { %v1910_v23 = vmul.f32 -1.442695, %v1454_v14 }
 0x536   :  { %v2058_v26 = vpop.eup %2057 }
 0x537   :  { %v2060_v27 = vpop.eup %2059  ;;  %v1458_v32 = vadd.f32 1.0, %v2058_v26  ;;  %2061 = vpow2.f32 %v1910_v23 }
 0x538   :  { %v1477_v42 = vadd.f32 1.0, %v2060_v27  ;;  %v1449_v48 = vpop.f32.mrf.mxu3  ;;  %v1436_v49 = vpop.f32.mrf.mxu2 }
 0x539   :  { %2063 = vrcp.f32 %v1458_v32  ;;  %v1470_v18 = vand.u32 2147483648, %v1458_v32  ;;  %v1468_v36 = vand.u32 2147483647, %v1458_v32  ;;  %vm1464_vm15 = vweird.f32 %v1458_v32 }
 0x53a   :  { %2065 = vrcp.f32 %v1477_v42  ;;  %v1489_v53 = vand.u32 2147483648, %v1477_v42  ;;  %v1487_v10 = vand.u32 2147483647, %v1477_v42  ;;  %vm1483_vm1 = vweird.f32 %v1477_v42 }
 0x53b   :  { %v1471_v59 = vor.u32 1.1754944e-38, %v1470_v18  ;;  %vm1469_vm4 = vcmp.eq.f32.partialorder %v1468_v36, 8.507059e+37 }
 0x53c   :  { %v1490_v24 = vor.u32 1.1754944e-38, %v1489_v53  ;;  %vm1488_vm5 = vcmp.eq.f32.partialorder %v1487_v10, 8.507059e+37 }
 0x53d   :  { %v2062_v55 = vpop.eup %2061 }
 0x53e   :  { %v1497_v61 = vadd.f32 1.0, %v2062_v55 }
 0x53f   :  { %v2064_v63 = vpop.eup %2063 }
 0x540   :  { %v2066_v41 = vpop.eup %2065  ;;  %v1460_v1 = vmul.f32 %v2064_v63, %v1458_v32  ;;  %2067 = vrcp.f32 %v1497_v61  ;;  %vm1465_vm13 = vweird.f32 %v2064_v63  ;;  %v1509_v16 = vand.u32 2147483648, %v1497_v61 }
 0x541   :  { %v1479_v4 = vmul.f32 %v2066_v41, %v1477_v42  ;;  %2069 = vtanh.f32 %v1453_v11  ;;  %vm1484_vm14 = vweird.f32 %v2066_v41  ;;  %vm1466_vm2 = vmor %vm1464_vm15, %vm1465_vm13  ;;  %vm1503_vm7 = vweird.f32 %v1497_v61 }
 0x542   :  { %v1461_v40 = vsub.f32 1.0, %v1460_v1  ;;  %vm1485_vm3 = vmor %vm1483_vm1, %vm1484_vm14  ;;  %v1507_v17 = vand.u32 2147483647, %v1497_v61  ;;  %v1510_v25 = vor.u32 1.1754944e-38, %v1509_v16 }
 0x543   :  { %v1480_v43 = vsub.f32 1.0, %v1479_v4 }
 0x544   :  { %v1462_v28 = vmul.f32 %v2064_v63, %v1461_v40  ;;  %vm1508_vm9 = vcmp.eq.f32.partialorder %v1507_v17, 8.507059e+37 }
 0x545   :  { %v1481_v15 = vmul.f32 %v2066_v41, %v1480_v43 }
 0x546   :  { %v2068_v22 = vpop.eup %2067  ;;  %v1463_v37 = vadd.f32 %v2064_v63, %v1462_v28 }
 0x547   :  { %v1482_v39 = vadd.f32 %v2066_v41, %v1481_v15  ;;  %v1499_v54 = vmul.f32 %v2068_v22, %v1497_v61  ;;  %v2070_v13 = vpop.eup %2069  ;;  %vm1504_vm6 = vweird.f32 %v2068_v22 }
 0x548   :  { %v1467_v0 = vsel %vm1466_vm2, %v2064_v63, %v1463_v37  ;;  %vm1505_vm8 = vmor %vm1503_vm7, %vm1504_vm6 }
 0x549   :  { %v1472_v30 = vsel %vm1469_vm4, %v1471_v59, %v1467_v0  ;;  %v1486_v31 = vsel %vm1485_vm3, %v2066_v41, %v1482_v39  ;;  %v1500_v2 = vsub.f32 1.0, %v1499_v54 }
 0x54a   :  { %v1491_v35 = vsel %vm1488_vm5, %v1490_v24, %v1486_v31  ;;  %v1514_v60 = vmul.f32 %v2070_v13, %v1472_v30 }
 0x54b   :  { %v1513_v3 = vmul.f32 %v1491_v35, %v2607_v47  ;;  %v1501_v7 = vmul.f32 %v2068_v22, %v1500_v2  ;;  %v1912_v47 = vld [vmem:[%s2682_s0 + $0x1c] sm:$0xf] }
 0x54d   :  { %v2661_v8 = vadd.f32 %v1514_v60, %v1513_v3  ;;  %v1502_v12 = vadd.f32 %v2068_v22, %v1501_v7 }
 0x54f   :  { %2071 = vtanh.f32 %v2661_v8  ;;  %v1506_v21 = vsel %vm1505_vm8, %v2068_v22, %v1502_v12 }
 0x550   :  { %v1511_v33 = vsel %vm1508_vm9, %v1510_v25, %v1506_v21 }
 0x555   :  { %v2072_v29 = vpop.eup %2071 }
 0x556   :  { %v1517_v34 = vmul.f32 %v2072_v29, %v1511_v33 }
 0x558   :  { %v1518_v38 = vpack.c.bf16 %v1517_v34, %v1517_v34 }
 0x55a   :  { %1911 = vst [vmem:[%s2686_s4 + $0x18] sm:$0xf] %v1518_v38  ;;  %1531 = vmatmul.bf16.vlgmr.msra.gmra.mxu0 %v1518_v38  ;;  %1544 = vmatmul.bf16.vlgmr.msra.gmra.mxu1 %v1518_v38 }
 0x55b   :  { %1557 = vmatmul.bf16.vlgmr.msra.gmra.mxu2 %v1518_v38  ;;  %1570 = vmatmul.bf16.vlgmr.msra.gmra.mxu3 %v1518_v38 }
 0x56a   :  { %1913 = vmatmul.msk.bf16.vlgmr.msrb.gmra.mxu0 %vm322_vm0, %v1912_v47  ;;  %1914 = vmatmul.msk.bf16.vlgmr.msrb.gmra.mxu1 %vm322_vm0, %v1912_v47 }
 0x56b   :  { %1915 = vmatmul.msk.bf16.vlgmr.msrb.gmra.mxu2 %vm322_vm0, %v1912_v47  ;;  %1916 = vmatmul.msk.bf16.vlgmr.msrb.gmra.mxu3 %vm322_vm0, %v1912_v47 }
 0x5d7   :  { %v1532_v44 = vpop.f32.mrf.mxu0  ;;  %v1545_v45 = vpop.f32.mrf.mxu1 }
 0x5de   :  { %v1558_v46 = vpop.f32.mrf.mxu2  ;;  %v1571_v50 = vpop.f32.mrf.mxu3 }
 0x5df   :  { %v1534_v56 = vpop.f32.mrf.mxu0  ;;  %v1547_v57 = vpop.f32.mrf.mxu1 }
 0x5e6   :  { %v1560_v58 = vpop.f32.mrf.mxu2  ;;  %v1573_v5 = vpop.f32.mrf.mxu3 }
 0x5e7   :  { %v1587_v6 = vpop.f32.mrf.mxu0  ;;  %v1600_v9 = vpop.f32.mrf.mxu1 }
 0x5e8   :  { %v1588_v14 = vadd.f32 %v1587_v6, %v2325_v19  ;;  %v1601_v23 = vadd.f32 %v1600_v9, %v2327_v20 }
 0x5ea   :  { %v1630_v26 = vadd.f32 %v1588_v14, %v1532_v44  ;;  %v1631_v27 = vadd.f32 %v1601_v23, %v1545_v45 }
 0x5ec   :  { %v1917_v32 = vmul.f32 -1.442695, %v1630_v26  ;;  %v1918_v42 = vmul.f32 -1.442695, %v1631_v27 }
 0x5ee   :  { %2073 = vpow2.f32 %v1917_v32  ;;  %v1613_v48 = vpop.f32.mrf.mxu2  ;;  %v1626_v49 = vpop.f32.mrf.mxu3 }
 0x5ef   :  { %2075 = vpow2.f32 %v1918_v42  ;;  %v1627_v52 = vadd.f32 %v1626_v49, %v2702_v62  ;;  %v1589_v55 = vpop.f32.mrf.mxu0  ;;  %v1602_v61 = vpop.f32.mrf.mxu1  ;;  %v1614_v43 = vadd.f32 %v1613_v48, %v2703_v51 }
 0x5f1   :  { %v1633_v63 = vadd.f32 %v1627_v52, %v1571_v50  ;;  %v1632_v36 = vadd.f32 %v1614_v43, %v1558_v46 }
 0x5f3   :  { %v1919_v11 = vmul.f32 -1.442695, %v1633_v63 }
 0x5f4   :  { %v2074_v41 = vpop.eup %2073 }
 0x5f5   :  { %v2076_v1 = vpop.eup %2075  ;;  %v1637_v4 = vadd.f32 1.0, %v2074_v41  ;;  %2077 = vpow2.f32 %v1919_v11 }
 0x5f6   :  { %v1656_v19 = vadd.f32 1.0, %v2076_v1  ;;  %v1628_v20 = vpop.f32.mrf.mxu3  ;;  %v1615_v40 = vpop.f32.mrf.mxu2 }
 0x5f7   :  { %2079 = vrcp.f32 %v1637_v4  ;;  %v1649_v59 = vand.u32 2147483648, %v1637_v4  ;;  %v1647_v24 = vand.u32 2147483647, %v1637_v4  ;;  %vm1643_vm11 = vweird.f32 %v1637_v4 }
 0x5f8   :  { %2081 = vrcp.f32 %v1656_v19  ;;  %v1668_v39 = vand.u32 2147483648, %v1656_v19  ;;  %v1666_v13 = vand.u32 2147483647, %v1656_v19  ;;  %vm1662_vm12 = vweird.f32 %v1656_v19 }
 0x5f9   :  { %v1650_v31 = vor.u32 1.1754944e-38, %v1649_v59  ;;  %vm1648_vm15 = vcmp.eq.f32.partialorder %v1647_v24, 8.507059e+37 }
 0x5fa   :  { %v1669_v60 = vor.u32 1.1754944e-38, %v1668_v39  ;;  %vm1667_vm1 = vcmp.eq.f32.partialorder %v1666_v13, 8.507059e+37 }
 0x5fb   :  { %v2078_v18 = vpop.eup %2077 }
 0x5fc   :  { %v1676_v53 = vadd.f32 1.0, %v2078_v18 }
 0x5fd   :  { %v2080_v28 = vpop.eup %2079 }
 0x5fe   :  { %v2082_v62 = vpop.eup %2081  ;;  %v1639_v15 = vmul.f32 %v2080_v28, %v1637_v4  ;;  %2083 = vrcp.f32 %v1676_v53  ;;  %vm1644_vm0 = vweird.f32 %v2080_v28  ;;  %v1688_v47 = vand.u32 2147483648, %v1676_v53 }
 0x5ff   :  { %v1658_v10 = vmul.f32 %v2082_v62, %v1656_v19  ;;  %2085 = vtanh.f32 %v1632_v36  ;;  %vm1663_vm10 = vweird.f32 %v2082_v62  ;;  %vm1645_vm13 = vmor %vm1643_vm11, %vm1644_vm0  ;;  %vm1682_vm3 = vweird.f32 %v1676_v53 }
 0x600   :  { %v1640_v22 = vsub.f32 1.0, %v1639_v15  ;;  %vm1664_vm14 = vmor %vm1662_vm12, %vm1663_vm10  ;;  %v1686_v44 = vand.u32 2147483647, %v1676_v53  ;;  %v1689_v46 = vor.u32 1.1754944e-38, %v1688_v47 }
 0x601   :  { %v1659_v37 = vsub.f32 1.0, %v1658_v10 }
 0x602   :  { %v1641_v54 = vmul.f32 %v2080_v28, %v1640_v22  ;;  %vm1687_vm5 = vcmp.eq.f32.partialorder %v1686_v44, 8.507059e+37 }
 0x603   :  { %v1660_v0 = vmul.f32 %v2082_v62, %v1659_v37 }
 0x604   :  { %v2084_v51 = vpop.eup %2083  ;;  %v1642_v30 = vadd.f32 %v2080_v28, %v1641_v54 }
 0x605   :  { %v1661_v2 = vadd.f32 %v2082_v62, %v1660_v0  ;;  %v1678_v35 = vmul.f32 %v2084_v51, %v1676_v53  ;;  %v2086_v7 = vpop.eup %2085  ;;  %vm1683_vm2 = vweird.f32 %v2084_v51 }
 0x606   :  { %v1646_v3 = vsel %vm1645_vm13, %v2080_v28, %v1642_v30  ;;  %vm1684_vm4 = vmor %vm1682_vm3, %vm1683_vm2 }
 0x607   :  { %v1651_v12 = vsel %vm1648_vm15, %v1650_v31, %v1646_v3  ;;  %v1665_v16 = vsel %vm1664_vm14, %v2082_v62, %v1661_v2  ;;  %v1679_v17 = vsub.f32 1.0, %v1678_v35 }
 0x608   :  { %v1670_v21 = vsel %vm1667_vm1, %v1669_v60, %v1665_v16  ;;  %v1693_v25 = vmul.f32 %v2086_v7, %v1651_v12 }
 0x609   :  { %v1692_v29 = vmul.f32 %v1670_v21, %v2661_v8  ;;  %v1680_v33 = vmul.f32 %v2084_v51, %v1679_v17 }
 0x60b   :  { %v1694_v34 = vadd.f32 %v1693_v25, %v1692_v29  ;;  %v1681_v38 = vadd.f32 %v2084_v51, %v1680_v33 }
 0x60d   :  { %2087 = vtanh.f32 %v1694_v34  ;;  %v1685_v45 = vsel %vm1684_vm4, %v2084_v51, %v1681_v38 }
 0x60e   :  { %v1690_v56 = vsel %vm1687_vm5, %v1689_v46, %v1685_v45 }
 0x613   :  { %v2088_v50 = vpop.eup %2087 }
 0x614   :  { %v1696_v57 = vmul.f32 %v2088_v50, %v1690_v56 }
 0x616   :  { %v1697_v58 = vpack.c.bf16 %v1696_v57, %v1696_v57 }
 0x618   :  { %1920 = vst [vmem:[%s2686_s4 + $0x1c] sm:$0xf] %v1697_v58 }
 0x619   :  { %1706 = vsyncpa [#allocation5], 1 }

// kernel: encoder_lstm_forward.3
= control target key start
LH: loop header
LB: loop body
LE: loop exit
PB: predicated region body
PF: predicated region fallthrough
CT: control target
= control target key end

     0   :  { %9 = vsyncpa [#allocation5], 0  ;;  %s3204_s0 = inlined_call_operand.vmem [shape: bf16[8,8,128], index: 0, kind: input, shape index: {}]   ;;  %s3205_s1 = inlined_call_operand.hbm [shape: bf16[128,512], index: 1, kind: input, shape index: {}]   ;;  %s3206_s2 = inlined_call_operand.hbm [shape: bf16[128,512], index: 2, kind: input, shape index: {}]   ;;  %s3207_s3 = inlined_call_operand.vmem [shape: f32[1,512], index: 3, kind: input, shape index: {}]   ;;  %s3208_s4 = inlined_call_operand.vmem [shape: bf16[8,8,128], index: 4, kind: output, shape index: {}]  }
   0x1   :  { %s17_s17 = sshll.u32 %s3205_s1, 4  ;;  %s18_s17 = int_to_ptr.hbm [resolvable:$true] %s17_s17 }
   0x2   :  { %10 = vsyncpa [#allocation7], 0  ;;  %s2409_s18 = smov [#allocation4]   ;;  %s30_s22 = sshll.u32 %s3206_s2, 4  ;;  %s31_s22 = int_to_ptr.hbm [resolvable:$true] %s30_s22 }
   0x3   :  { %s19_s19 = sshll.u32 %s2409_s18, 4  ;;  %s2410_s23 = smov 256   ;;  %s20_s19 = int_to_ptr.vmem [resolvable:$true] %s19_s19 }
   0x4   :  { %s2411_s24 = smov 16   ;;  %s2412_s25 = smov [#allocation6]  }
   0x5   :  { %25 = dma.hbm_to_vmem [thread:$0]  %s18_s17, 4096, %s20_s19, [#allocation5], %s2410_s23, %s2410_s23, %s2411_s24  }
   0x6   :  { %s32_s26 = sshll.u32 %s2412_s25, 4  ;;  %s33_s26 = int_to_ptr.vmem [resolvable:$true] %s32_s26 }
   0x7   :  { %38 = dma.hbm_to_vmem [thread:$0]  %s31_s22, 4096, %s33_s26, [#allocation7], %s2410_s23, %s2410_s23, %s2411_s24  }
   0x8   :  { %2405 = dma.done.wait [#allocation5], 4096  }
   0x9   :  { %2406 = vsyncadd [#allocation5], 4294963200 }
   0xa   :  { %2407 = dma.done.wait [#allocation7], 4096  }
   0xb   :  { %2408 = vsyncadd [#allocation7], 4294963200  ;;  %v1980_v0 = vld [vmem:[#allocation6 + $0xe0] sm:$0xf]  ;;  %v2222_v1 = vld [vmem:[#allocation6 + $0xec] sm:$0xf0] }
   0xc   :  { %v2220_v2 = vld [vmem:[#allocation6 + $0xe4] sm:$0xf]  ;;  %v2445_v3 = vor.u32 %v2222_v1, %v1980_v0  ;;  %v1982_v4 = vld [vmem:[#allocation6 + $0xf0] sm:$0xf0]  ;;  %v1988_v5 = vld [vmem:[#allocation6 + $0xe8] sm:$0xf] }
   0xd   :  { %v2223_v6 = vld [vmem:[#allocation6 + $0xf4] sm:$0xf0]  ;;  %v2447_v7 = vor.u32 %v2220_v2, %v1982_v4  ;;  %v2221_v9 = vld [vmem:[#allocation6 + $0xec] sm:$0xf]  ;;  %v1990_v10 = vld [vmem:[#allocation6 + $0xf8] sm:$0xf0] }
   0xe   :  { %v2449_v8 = vor.u32 %v2223_v6, %v1988_v5  ;;  %v1964_v11 = vld [vmem:[#allocation6 + $0xc0] sm:$0xf]  ;;  %293 = vmatpush.bf16.msra.mxu0 %v2445_v3  ;;  %v2452_v12 = vor.u32 %v2221_v9, %v1990_v10  ;;  %v2218_v13 = vld [vmem:[#allocation6 + $0xcc] sm:$0xf0]  ;;  %v2216_v14 = vld [vmem:[#allocation6 + $0xc4] sm:$0xf] }
   0xf   :  { %v1966_v15 = vld [vmem:[#allocation6 + $0xd0] sm:$0xf0]  ;;  %306 = vmatpush.bf16.msra.mxu1 %v2447_v7  ;;  %v2456_v16 = vor.u32 %v2218_v13, %v1964_v11  ;;  %v1972_v18 = vld [vmem:[#allocation6 + $0xc8] sm:$0xf]  ;;  %v2219_v19 = vld [vmem:[#allocation6 + $0xd4] sm:$0xf0] }
  0x10   :  { %319 = vmatpush.bf16.msra.mxu2 %v2449_v8  ;;  %v2458_v17 = vor.u32 %v2216_v14, %v1966_v15  ;;  %v2217_v20 = vld [vmem:[#allocation6 + $0xcc] sm:$0xf]  ;;  %332 = vmatpush.bf16.msra.mxu3 %v2452_v12  ;;  %v2461_v21 = vor.u32 %v2219_v19, %v1972_v18  ;;  %v1974_v22 = vld [vmem:[#allocation6 + $0xd8] sm:$0xf0]  ;;  %v1948_v23 = vld [vmem:[#allocation6 + $0xa0] sm:$0xf] }
  0x11   :  { %v2214_v24 = vld [vmem:[#allocation6 + $0xac] sm:$0xf0]  ;;  %v2463_v25 = vor.u32 %v2217_v20, %v1974_v22  ;;  %v2212_v26 = vld [vmem:[#allocation6 + $0xa4] sm:$0xf]  ;;  %v1950_v27 = vld [vmem:[#allocation6 + $0xb0] sm:$0xf0] }
  0x12   :  { %v1956_v28 = vld [vmem:[#allocation6 + $0xa8] sm:$0xf]  ;;  %294 = vmatpush.bf16.msra.mxu0 %v2456_v16  ;;  %v2466_v29 = vor.u32 %v2214_v24, %v1948_v23  ;;  %v2215_v30 = vld [vmem:[#allocation6 + $0xb4] sm:$0xf0]  ;;  %v2213_v31 = vld [vmem:[#allocation6 + $0xac] sm:$0xf]  ;;  %v2470_v33 = vor.u32 %v2212_v26, %v1950_v27 }
  0x13   :  { %v1958_v32 = vld [vmem:[#allocation6 + $0xb8] sm:$0xf0]  ;;  %307 = vmatpush.bf16.msra.mxu1 %v2458_v17  ;;  %v2472_v34 = vor.u32 %v2215_v30, %v1956_v28  ;;  %v1932_v35 = vld [vmem:[#allocation6 + $0x80] sm:$0xf]  ;;  %v2210_v36 = vld [vmem:[#allocation6 + $0x8c] sm:$0xf0] }
  0x14   :  { %320 = vmatpush.bf16.msra.mxu2 %v2461_v21  ;;  %v2208_v37 = vld [vmem:[#allocation6 + $0x84] sm:$0xf]  ;;  %333 = vmatpush.bf16.msra.mxu3 %v2463_v25  ;;  %v2475_v38 = vor.u32 %v2213_v31, %v1958_v32  ;;  %v1934_v39 = vld [vmem:[#allocation6 + $0x90] sm:$0xf0]  ;;  %v1940_v40 = vld [vmem:[#allocation6 + $0x88] sm:$0xf]  ;;  %v2478_v44 = vor.u32 %v2210_v36, %v1932_v35 }
  0x15   :  { %v2211_v41 = vld [vmem:[#allocation6 + $0x94] sm:$0xf0]  ;;  %v2209_v42 = vld [vmem:[#allocation6 + $0x8c] sm:$0xf]  ;;  %v1942_v43 = vld [vmem:[#allocation6 + $0x98] sm:$0xf0]  ;;  %v2482_v45 = vor.u32 %v2208_v37, %v1934_v39 }
  0x16   :  { %295 = vmatpush.bf16.msra.mxu0 %v2466_v29  ;;  %v2484_v46 = vor.u32 %v2211_v41, %v1940_v40  ;;  %v1916_v47 = vld [vmem:[#allocation6 + $0x60] sm:$0xf]  ;;  %v2206_v48 = vld [vmem:[#allocation6 + $0x6c] sm:$0xf0]  ;;  %v2204_v49 = vld [vmem:[#allocation6 + $0x64] sm:$0xf]  ;;  %v2487_v50 = vor.u32 %v2209_v42, %v1942_v43 }
  0x17   :  { %308 = vmatpush.bf16.msra.mxu1 %v2470_v33  ;;  %v1918_v51 = vld [vmem:[#allocation6 + $0x70] sm:$0xf0]  ;;  %v1924_v52 = vld [vmem:[#allocation6 + $0x68] sm:$0xf]  ;;  %v2207_v53 = vld [vmem:[#allocation6 + $0x74] sm:$0xf0]  ;;  %v2490_v56 = vor.u32 %v2206_v48, %v1916_v47 }
  0x18   :  { %321 = vmatpush.bf16.msra.mxu2 %v2472_v34  ;;  %334 = vmatpush.bf16.msra.mxu3 %v2475_v38  ;;  %v2205_v54 = vld [vmem:[#allocation6 + $0x6c] sm:$0xf]  ;;  %v1926_v55 = vld [vmem:[#allocation6 + $0x78] sm:$0xf0]  ;;  %v2494_v57 = vor.u32 %v2204_v49, %v1918_v51  ;;  %v2496_v58 = vor.u32 %v2207_v53, %v1924_v52  ;;  %v1900_v59 = vld [vmem:[#allocation6 + $0x40] sm:$0xf] }
  0x19   :  { %v2202_v60 = vld [vmem:[#allocation6 + $0x4c] sm:$0xf0]  ;;  %v2200_v61 = vld [vmem:[#allocation6 + $0x44] sm:$0xf]  ;;  %v2499_v62 = vor.u32 %v2205_v54, %v1926_v55  ;;  %v1902_v63 = vld [vmem:[#allocation6 + $0x50] sm:$0xf0] }
  0x1a   :  { %296 = vmatpush.bf16.msra.mxu0 %v2478_v44  ;;  %v1908_v0 = vld [vmem:[#allocation6 + $0x48] sm:$0xf]  ;;  %v2203_v1 = vld [vmem:[#allocation6 + $0x54] sm:$0xf0]  ;;  %v2201_v2 = vld [vmem:[#allocation6 + $0x4c] sm:$0xf]  ;;  %v2502_v5 = vor.u32 %v2202_v60, %v1900_v59  ;;  %v2506_v6 = vor.u32 %v2200_v61, %v1902_v63 }
  0x1b   :  { %309 = vmatpush.bf16.msra.mxu1 %v2482_v45  ;;  %v1910_v4 = vld [vmem:[#allocation6 + $0x58] sm:$0xf0]  ;;  %v2508_v9 = vor.u32 %v2203_v1, %v1908_v0  ;;  %v1884_v10 = vld [vmem:[#allocation6 + $0x20] sm:$0xf]  ;;  %v2198_v11 = vld [vmem:[#allocation6 + $0x2c] sm:$0xf0] }
  0x1c   :  { %322 = vmatpush.bf16.msra.mxu2 %v2484_v46  ;;  %335 = vmatpush.bf16.msra.mxu3 %v2487_v50  ;;  %v2196_v13 = vld [vmem:[#allocation6 + $0x24] sm:$0xf]  ;;  %v2511_v14 = vor.u32 %v2201_v2, %v1910_v4  ;;  %v1886_v15 = vld [vmem:[#allocation6 + $0x30] sm:$0xf0]  ;;  %v1892_v18 = vld [vmem:[#allocation6 + $0x28] sm:$0xf]  ;;  %v2514_v23 = vor.u32 %v2198_v11, %v1884_v10 }
  0x1d   :  { %v2199_v19 = vld [vmem:[#allocation6 + $0x34] sm:$0xf0]  ;;  %v2197_v20 = vld [vmem:[#allocation6 + $0x2c] sm:$0xf]  ;;  %v1894_v22 = vld [vmem:[#allocation6 + $0x38] sm:$0xf0]  ;;  %v2518_v27 = vor.u32 %v2196_v13, %v1886_v15 }
  0x1e   :  { %297 = vmatpush.bf16.msra.mxu0 %v2490_v56  ;;  %v1868_v24 = vld [vmem:[#allocation6] sm:$0xf]  ;;  %v2194_v26 = vld [vmem:[#allocation6 + $0xc] sm:$0xf0]  ;;  %v2520_v28 = vor.u32 %v2199_v19, %v1892_v18  ;;  %v2192_v30 = vld [vmem:[#allocation6 + $0x4] sm:$0xf]  ;;  %v2523_v35 = vor.u32 %v2197_v20, %v1894_v22 }
  0x1f   :  { %310 = vmatpush.bf16.msra.mxu1 %v2494_v57  ;;  %v1870_v31 = vld [vmem:[#allocation6 + $0x10] sm:$0xf0]  ;;  %v1876_v32 = vld [vmem:[#allocation6 + $0x8] sm:$0xf]  ;;  %v2195_v36 = vld [vmem:[#allocation6 + $0x14] sm:$0xf0]  ;;  %v2526_v43 = vor.u32 %v2194_v26, %v1868_v24 }
  0x20   :  { %323 = vmatpush.bf16.msra.mxu2 %v2496_v58  ;;  %336 = vmatpush.bf16.msra.mxu3 %v2499_v62  ;;  %v2193_v37 = vld [vmem:[#allocation6 + $0xc] sm:$0xf]  ;;  %v1878_v39 = vld [vmem:[#allocation6 + $0x18] sm:$0xf0]  ;;  %v2108_v40 = vld [vmem:[#allocation4 + $0xe0] sm:$0xf]  ;;  %v2530_v51 = vor.u32 %v2192_v30, %v1870_v31  ;;  %v2532_v52 = vor.u32 %v2195_v36, %v1876_v32 }
  0x21   :  { %v2190_v41 = vld [vmem:[#allocation4 + $0xec] sm:$0xf0]  ;;  %v2188_v42 = vld [vmem:[#allocation4 + $0xe4] sm:$0xf]  ;;  %v2110_v47 = vld [vmem:[#allocation4 + $0xf0] sm:$0xf0]  ;;  %v2535_v55 = vor.u32 %v2193_v37, %v1878_v39 }
  0x22   :  { %298 = vmatpush.bf16.msra.mxu0 %v2502_v5  ;;  %v2116_v48 = vld [vmem:[#allocation4 + $0xe8] sm:$0xf]  ;;  %v2191_v49 = vld [vmem:[#allocation4 + $0xf4] sm:$0xf0]  ;;  %v2189_v53 = vld [vmem:[#allocation4 + $0xec] sm:$0xf]  ;;  %v2537_v59 = vor.u32 %v2190_v41, %v2108_v40  ;;  %v2539_v60 = vor.u32 %v2188_v42, %v2110_v47 }
  0x23   :  { %311 = vmatpush.bf16.msra.mxu1 %v2506_v6  ;;  %v2118_v54 = vld [vmem:[#allocation4 + $0xf8] sm:$0xf0]  ;;  %v2541_v61 = vor.u32 %v2191_v49, %v2116_v48  ;;  %v2092_v63 = vld [vmem:[#allocation4 + $0xc0] sm:$0xf]  ;;  %v2186_v0 = vld [vmem:[#allocation4 + $0xcc] sm:$0xf0] }
  0x24   :  { %324 = vmatpush.bf16.msra.mxu2 %v2508_v9  ;;  %337 = vmatpush.bf16.msra.mxu3 %v2511_v14  ;;  %v2184_v1 = vld [vmem:[#allocation4 + $0xc4] sm:$0xf]  ;;  %v2544_v2 = vor.u32 %v2189_v53, %v2118_v54  ;;  %v2094_v4 = vld [vmem:[#allocation4 + $0xd0] sm:$0xf0]  ;;  %v2100_v10 = vld [vmem:[#allocation4 + $0xc8] sm:$0xf]  ;;  %v2550_v18 = vor.u32 %v2186_v0, %v2092_v63 }
  0x25   :  { %v2187_v11 = vld [vmem:[#allocation4 + $0xd4] sm:$0xf0]  ;;  %v2185_v13 = vld [vmem:[#allocation4 + $0xcc] sm:$0xf]  ;;  %v2102_v15 = vld [vmem:[#allocation4 + $0xd8] sm:$0xf0]  ;;  %v2554_v19 = vor.u32 %v2184_v1, %v2094_v4 }
  0x26   :  { %299 = vmatpush.bf16.msra.mxu0 %v2514_v23  ;;  %v2556_v20 = vor.u32 %v2187_v11, %v2100_v10  ;;  %v2076_v22 = vld [vmem:[#allocation4 + $0xa0] sm:$0xf]  ;;  %v2182_v24 = vld [vmem:[#allocation4 + $0xac] sm:$0xf0]  ;;  %v2180_v26 = vld [vmem:[#allocation4 + $0xa4] sm:$0xf]  ;;  %v2559_v30 = vor.u32 %v2185_v13, %v2102_v15 }
  0x27   :  { %312 = vmatpush.bf16.msra.mxu1 %v2518_v27  ;;  %v2413_v31 = vmov 0.0|0.0   ;;  %v2078_v32 = vld [vmem:[#allocation4 + $0xb0] sm:$0xf0]  ;;  %v2084_v36 = vld [vmem:[#allocation4 + $0xa8] sm:$0xf]  ;;  %v2562_v41 = vor.u32 %v2182_v24, %v2076_v22 }
  0x28   :  { %325 = vmatpush.bf16.msra.mxu2 %v2520_v28  ;;  %338 = vmatpush.bf16.msra.mxu3 %v2523_v35  ;;  %3269 = vst [vmem:[#allocation10_spill] sm:$0xff] %v2556_v20  ;;  %v2183_v37 = vld [vmem:[#allocation4 + $0xb4] sm:$0xf0]  ;;  %v2181_v39 = vld [vmem:[#allocation4 + $0xac] sm:$0xf]  ;;  %v2566_v42 = vor.u32 %v2180_v26, %v2078_v32 }
  0x29   :  { %3270 = vst [vmem:[#allocation11_spill] sm:$0xff] %v2559_v30  ;;  %v2086_v40 = vld [vmem:[#allocation4 + $0xb8] sm:$0xf0]  ;;  %v2568_v47 = vor.u32 %v2183_v37, %v2084_v36  ;;  %v2060_v48 = vld [vmem:[#allocation4 + $0x80] sm:$0xf] }
  0x2a   :  { %300 = vmatpush.bf16.msra.mxu0 %v2526_v43  ;;  %3271 = vst [vmem:[#allocation12_spill] sm:$0xff] %v2562_v41  ;;  %v2178_v49 = vld [vmem:[#allocation4 + $0x8c] sm:$0xf0]  ;;  %v2176_v53 = vld [vmem:[#allocation4 + $0x84] sm:$0xf]  ;;  %v2571_v54 = vor.u32 %v2181_v39, %v2086_v40 }
  0x2b   :  { %313 = vmatpush.bf16.msra.mxu1 %v2530_v51  ;;  %3272 = vst [vmem:[#allocation13_spill] sm:$0xff] %v2566_v42  ;;  %v2062_v63 = vld [vmem:[#allocation4 + $0x90] sm:$0xf0]  ;;  %v2068_v0 = vld [vmem:[#allocation4 + $0x88] sm:$0xf]  ;;  %v2574_v11 = vor.u32 %v2178_v49, %v2060_v48 }
  0x2c   :  { %326 = vmatpush.bf16.msra.mxu2 %v2532_v52  ;;  %339 = vmatpush.bf16.msra.mxu3 %v2535_v55  ;;  %3273 = vst [vmem:[#allocation14_spill] sm:$0xff] %v2568_v47  ;;  %v2179_v1 = vld [vmem:[#allocation4 + $0x94] sm:$0xf0]  ;;  %v2177_v4 = vld [vmem:[#allocation4 + $0x8c] sm:$0xf]  ;;  %v2578_v13 = vor.u32 %v2176_v53, %v2062_v63 }
  0x2d   :  { %301 = vmatmul.bf16.vlgmr.msra.gmra.mxu0 %v2413_v31  ;;  %3274 = vst [vmem:[#allocation15_spill] sm:$0xff] %v2571_v54  ;;  %v2070_v10 = vld [vmem:[#allocation4 + $0x98] sm:$0xf0]  ;;  %v2580_v15 = vor.u32 %v2179_v1, %v2068_v0  ;;  %v2044_v22 = vld [vmem:[#allocation4 + $0x60] sm:$0xf] }
  0x2e   :  { %505 = vmatpush.bf16.msrb.mxu0 %v2537_v59  ;;  %314 = vmatmul.bf16.vlgmr.msra.gmra.mxu1 %v2413_v31  ;;  %3275 = vst [vmem:[#allocation16_spill] sm:$0xff] %v2574_v11  ;;  %v2174_v24 = vld [vmem:[#allocation4 + $0x6c] sm:$0xf0]  ;;  %v2172_v26 = vld [vmem:[#allocation4 + $0x64] sm:$0xf] }
  0x2f   :  { %518 = vmatpush.bf16.msrb.mxu1 %v2539_v60  ;;  %340 = vmatmul.bf16.vlgmr.msra.gmra.mxu3 %v2413_v31  ;;  %3276 = vst [vmem:[#allocation17_spill] sm:$0xff] %v2578_v13  ;;  %v2046_v32 = vld [vmem:[#allocation4 + $0x70] sm:$0xf0]  ;;  %v2052_v36 = vld [vmem:[#allocation4 + $0x68] sm:$0xf]  ;;  %v2586_v48 = vor.u32 %v2174_v24, %v2044_v22 }
  0x30   :  { %531 = vmatpush.bf16.msrb.mxu2 %v2541_v61  ;;  %544 = vmatpush.bf16.msrb.mxu3 %v2544_v2  ;;  %3277 = vst [vmem:[#allocation18_spill] sm:$0xff] %v2580_v15  ;;  %v2175_v37 = vld [vmem:[#allocation4 + $0x74] sm:$0xf0]  ;;  %v2173_v39 = vld [vmem:[#allocation4 + $0x6c] sm:$0xf]  ;;  %v2590_v49 = vor.u32 %v2172_v26, %v2046_v32 }
  0x31   :  { %327 = vmatmul.bf16.vlgmr.msra.gmra.mxu2 %v2413_v31  ;;  %v2583_v31 = vor.u32 %v2177_v4, %v2070_v10  ;;  %v2054_v40 = vld [vmem:[#allocation4 + $0x78] sm:$0xf0]  ;;  %3279 = vst [vmem:[#allocation20_spill] sm:$0xff] %v2586_v48  ;;  %v2592_v53 = vor.u32 %v2175_v37, %v2052_v36  ;;  %v2028_v63 = vld [vmem:[#allocation4 + $0x40] sm:$0xf] }
  0x32   :  { %506 = vmatpush.bf16.msrb.mxu0 %v2550_v18  ;;  %3280 = vst [vmem:[#allocation21_spill] sm:$0xff] %v2590_v49  ;;  %v2170_v0 = vld [vmem:[#allocation4 + $0x4c] sm:$0xf0]  ;;  %v2168_v1 = vld [vmem:[#allocation4 + $0x44] sm:$0xf]  ;;  %v2595_v4 = vor.u32 %v2173_v39, %v2054_v40 }
  0x33   :  { %519 = vmatpush.bf16.msrb.mxu1 %v2554_v19  ;;  %3278 = vst [vmem:[#allocation19_spill] sm:$0xff] %v2583_v31  ;;  %v2030_v10 = vld [vmem:[#allocation4 + $0x50] sm:$0xf0]  ;;  %v2169_v22 = vld [vmem:[#allocation4 + $0x4c] sm:$0xf] }
  0x34   :  { %532 = vmatpush.bf16.msrb.mxu2 %v2556_v20  ;;  %545 = vmatpush.bf16.msrb.mxu3 %v2559_v30  ;;  %3281 = vst [vmem:[#allocation22_spill] sm:$0xff] %v2592_v53  ;;  %v2038_v24 = vld [vmem:[#allocation4 + $0x58] sm:$0xf0]  ;;  %v2602_v26 = vor.u32 %v2168_v1, %v2030_v10  ;;  %v2012_v36 = vld [vmem:[#allocation4 + $0x20] sm:$0xf] }
  0x35   :  { %3282 = vst [vmem:[#allocation23_spill] sm:$0xff] %v2595_v4  ;;  %v2166_v37 = vld [vmem:[#allocation4 + $0x2c] sm:$0xf0]  ;;  %v2164_v39 = vld [vmem:[#allocation4 + $0x24] sm:$0xf]  ;;  %v2607_v40 = vor.u32 %v2169_v22, %v2038_v24 }
  0x36   :  { %507 = vmatpush.bf16.msrb.mxu0 %v2562_v41  ;;  %3284 = vst [vmem:[#allocation25_spill] sm:$0xff] %v2602_v26  ;;  %v1996_v1 = vld [vmem:[#allocation4] sm:$0xf]  ;;  %v2162_v10 = vld [vmem:[#allocation4 + $0xc] sm:$0xf0] }
  0x37   :  { %520 = vmatpush.bf16.msrb.mxu1 %v2566_v42  ;;  %3286 = vst [vmem:[#allocation27_spill] sm:$0xff] %v2607_v40  ;;  %v2160_v22 = vld [vmem:[#allocation4 + $0x4] sm:$0xf] }
  0x38   :  { %533 = vmatpush.bf16.msrb.mxu2 %v2568_v47  ;;  %546 = vmatpush.bf16.msrb.mxu3 %v2571_v54  ;;  %v2036_v54 = vld [vmem:[#allocation4 + $0x48] sm:$0xf] }
  0x3a   :  { %508 = vmatpush.bf16.msrb.mxu0 %v2574_v11  ;;  %v2171_v11 = vld [vmem:[#allocation4 + $0x54] sm:$0xf0] }
  0x3b   :  { %521 = vmatpush.bf16.msrb.mxu1 %v2578_v13  ;;  %v2598_v13 = vor.u32 %v2170_v0, %v2028_v63  ;;  %v2604_v32 = vor.u32 %v2171_v11, %v2036_v54  ;;  %v2165_v63 = vld [vmem:[#allocation4 + $0x2c] sm:$0xf]  ;;  %v2022_v0 = vld [vmem:[#allocation4 + $0x38] sm:$0xf0] }
  0x3c   :  { %534 = vmatpush.bf16.msrb.mxu2 %v2580_v15  ;;  %547 = vmatpush.bf16.msrb.mxu3 %v2583_v31  ;;  %v2014_v31 = vld [vmem:[#allocation4 + $0x30] sm:$0xf0]  ;;  %v2020_v15 = vld [vmem:[#allocation4 + $0x28] sm:$0xf]  ;;  %v2619_v24 = vor.u32 %v2165_v63, %v2022_v0  ;;  %v3298_v63 = vld [vmem:[#allocation18_spill] sm:$0xff] }
  0x3d   :  { %3283 = vst [vmem:[#allocation24_spill] sm:$0xff] %v2598_v13  ;;  %v2614_v54 = vor.u32 %v2164_v39, %v2014_v31  ;;  %v131_v39 = vld [vmem:[%s3204_s0] sm:$0xf]  ;;  %v3299_v0 = vld [vmem:[#allocation19_spill] sm:$0xff] }
  0x3e   :  { %509 = vmatpush.bf16.msrb.mxu0 %v2586_v48  ;;  %3285 = vst [vmem:[#allocation26_spill] sm:$0xff] %v2604_v32  ;;  %v2167_v48 = vld [vmem:[#allocation4 + $0x34] sm:$0xf0] }
  0x3f   :  { %522 = vmatpush.bf16.msrb.mxu1 %v2590_v49  ;;  %v2610_v49 = vor.u32 %v2166_v37, %v2012_v36  ;;  %3288 = vst [vmem:[#allocation29_spill] sm:$0xff] %v2614_v54  ;;  %v2616_v11 = vor.u32 %v2167_v48, %v2020_v15  ;;  %v2161_v36 = vld [vmem:[#allocation4 + $0xc] sm:$0xf]  ;;  %v2006_v37 = vld [vmem:[#allocation4 + $0x18] sm:$0xf0] }
  0x40   :  { %535 = vmatpush.bf16.msrb.mxu2 %v2592_v53  ;;  %548 = vmatpush.bf16.msrb.mxu3 %v2595_v4  ;;  %3290 = vst [vmem:[#allocation31_spill] sm:$0xff] %v2619_v24  ;;  %v1998_v4 = vld [vmem:[#allocation4 + $0x10] sm:$0xf0]  ;;  %v2004_v53 = vld [vmem:[#allocation4 + $0x8] sm:$0xf]  ;;  %v2631_v48 = vor.u32 %v2161_v36, %v2006_v37 }
  0x41   :  { %3287 = vst [vmem:[#allocation28_spill] sm:$0xff] %v2610_v49  ;;  %v2626_v15 = vor.u32 %v2160_v22, %v1998_v4  ;;  %v3297_v4 = vld [vmem:[#allocation17_spill] sm:$0xff]  ;;  %v3302_v22 = vld [vmem:[#allocation22_spill] sm:$0xff]  ;;  %v3303_v36 = vld [vmem:[#allocation23_spill] sm:$0xff] }
  0x42   :  { %510 = vmatpush.bf16.msrb.mxu0 %v2598_v13  ;;  %3289 = vst [vmem:[#allocation30_spill] sm:$0xff] %v2616_v11  ;;  %v2163_v13 = vld [vmem:[#allocation4 + $0x14] sm:$0xf0] }
  0x43   :  { %523 = vmatpush.bf16.msrb.mxu1 %v2602_v26  ;;  %v2622_v26 = vor.u32 %v2162_v10, %v1996_v1  ;;  %3292 = vst [vmem:[#allocation33_spill] sm:$0xff] %v2626_v15  ;;  %v2628_v31 = vor.u32 %v2163_v13, %v2004_v53  ;;  %v3295_v13 = vld [vmem:[#allocation15_spill] sm:$0xff]  ;;  %v3296_v53 = vld [vmem:[#allocation16_spill] sm:$0xff]  ;;  %v3301_v10 = vld [vmem:[#allocation21_spill] sm:$0xff] }
  0x44   :  { %536 = vmatpush.bf16.msrb.mxu2 %v2604_v32  ;;  %549 = vmatpush.bf16.msrb.mxu3 %v2607_v40  ;;  %3294 = vst [vmem:[#allocation35_spill] sm:$0xff] %v2631_v48  ;;  %v3300_v1 = vld [vmem:[#allocation20_spill] sm:$0xff] }
  0x45   :  { %3291 = vst [vmem:[#allocation32_spill] sm:$0xff] %v2622_v26  ;;  %v3304_v37 = vld [vmem:[#allocation24_spill] sm:$0xff] }
  0x46   :  { %511 = vmatpush.bf16.msrb.mxu0 %v2610_v49  ;;  %3293 = vst [vmem:[#allocation34_spill] sm:$0xff] %v2628_v31 }
  0x47   :  { %524 = vmatpush.bf16.msrb.mxu1 %v2614_v54 }
  0x48   :  { %537 = vmatpush.bf16.msrb.mxu2 %v2616_v11  ;;  %550 = vmatpush.bf16.msrb.mxu3 %v2619_v24 }
  0x4a   :  { %512 = vmatpush.bf16.msrb.mxu0 %v2622_v26 }
  0x4b   :  { %525 = vmatpush.bf16.msrb.mxu1 %v2626_v15 }
  0x4c   :  { %538 = vmatpush.bf16.msrb.mxu2 %v2628_v31  ;;  %551 = vmatpush.bf16.msrb.mxu3 %v2631_v48 }
  0x4d   :  { %513 = vmatmul.bf16.vlgmr.msrb.gmra.mxu0 %v131_v39 }
  0x4e   :  { %628 = vmatpush.bf16.msra.mxu0 %v2445_v3  ;;  %526 = vmatmul.bf16.vlgmr.msrb.gmra.mxu1 %v131_v39 }
  0x4f   :  { %641 = vmatpush.bf16.msra.mxu1 %v2447_v7  ;;  %539 = vmatmul.bf16.vlgmr.msrb.gmra.mxu2 %v131_v39 }
  0x50   :  { %552 = vmatmul.bf16.vlgmr.msrb.gmra.mxu3 %v131_v39  ;;  %654 = vmatpush.bf16.msra.mxu2 %v2449_v8  ;;  %v3305_v39 = vld [vmem:[#allocation25_spill] sm:$0xff] }
  0x51   :  { %667 = vmatpush.bf16.msra.mxu3 %v2452_v12 }
  0x52   :  { %629 = vmatpush.bf16.msra.mxu0 %v2456_v16 }
  0x53   :  { %642 = vmatpush.bf16.msra.mxu1 %v2458_v17 }
  0x54   :  { %655 = vmatpush.bf16.msra.mxu2 %v2461_v21 }
  0x55   :  { %668 = vmatpush.bf16.msra.mxu3 %v2463_v25 }
  0x56   :  { %630 = vmatpush.bf16.msra.mxu0 %v2466_v29 }
  0x57   :  { %643 = vmatpush.bf16.msra.mxu1 %v2470_v33 }
  0x58   :  { %656 = vmatpush.bf16.msra.mxu2 %v2472_v34 }
  0x59   :  { %669 = vmatpush.bf16.msra.mxu3 %v2475_v38 }
  0x5a   :  { %631 = vmatpush.bf16.msra.mxu0 %v2478_v44 }
  0x5b   :  { %644 = vmatpush.bf16.msra.mxu1 %v2482_v45 }
  0x5c   :  { %657 = vmatpush.bf16.msra.mxu2 %v2484_v46 }
  0x5d   :  { %670 = vmatpush.bf16.msra.mxu3 %v2487_v50 }
  0x5e   :  { %632 = vmatpush.bf16.msra.mxu0 %v2490_v56 }
  0x5f   :  { %645 = vmatpush.bf16.msra.mxu1 %v2494_v57 }
  0x60   :  { %658 = vmatpush.bf16.msra.mxu2 %v2496_v58 }
  0x61   :  { %671 = vmatpush.bf16.msra.mxu3 %v2499_v62 }
  0x62   :  { %633 = vmatpush.bf16.msra.mxu0 %v2502_v5 }
  0x63   :  { %646 = vmatpush.bf16.msra.mxu1 %v2506_v6 }
  0x64   :  { %659 = vmatpush.bf16.msra.mxu2 %v2508_v9 }
  0x65   :  { %672 = vmatpush.bf16.msra.mxu3 %v2511_v14 }
  0x66   :  { %634 = vmatpush.bf16.msra.mxu0 %v2514_v23 }
  0x67   :  { %647 = vmatpush.bf16.msra.mxu1 %v2518_v27 }
  0x68   :  { %660 = vmatpush.bf16.msra.mxu2 %v2520_v28 }
  0x69   :  { %673 = vmatpush.bf16.msra.mxu3 %v2523_v35 }
  0x6a   :  { %635 = vmatpush.bf16.msra.mxu0 %v2526_v43 }
  0x6b   :  { %648 = vmatpush.bf16.msra.mxu1 %v2530_v51 }
  0x6c   :  { %661 = vmatpush.bf16.msra.mxu2 %v2532_v52 }
  0x6d   :  { %674 = vmatpush.bf16.msra.mxu3 %v2535_v55 }
  0x6e   :  { %680 = vmatpush.bf16.msrb.mxu0 %v2537_v59 }
  0x6f   :  { %693 = vmatpush.bf16.msrb.mxu1 %v2539_v60 }
  0x70   :  { %706 = vmatpush.bf16.msrb.mxu2 %v2541_v61 }
  0x71   :  { %719 = vmatpush.bf16.msrb.mxu3 %v2544_v2 }
  0x72   :  { %681 = vmatpush.bf16.msrb.mxu0 %v2550_v18 }
  0x73   :  { %694 = vmatpush.bf16.msrb.mxu1 %v2554_v19 }
  0x74   :  { %707 = vmatpush.bf16.msrb.mxu2 %v2556_v20 }
  0x75   :  { %720 = vmatpush.bf16.msrb.mxu3 %v2559_v30 }
  0x76   :  { %682 = vmatpush.bf16.msrb.mxu0 %v2562_v41 }
  0x77   :  { %695 = vmatpush.bf16.msrb.mxu1 %v2566_v42 }
  0x78   :  { %708 = vmatpush.bf16.msrb.mxu2 %v2568_v47 }
  0x79   :  { %721 = vmatpush.bf16.msrb.mxu3 %v3295_v13 }
  0x7a   :  { %683 = vmatpush.bf16.msrb.mxu0 %v3296_v53 }
  0x7b   :  { %696 = vmatpush.bf16.msrb.mxu1 %v3297_v4 }
  0x7c   :  { %709 = vmatpush.bf16.msrb.mxu2 %v3298_v63 }
  0x7d   :  { %722 = vmatpush.bf16.msrb.mxu3 %v3299_v0 }
  0x7e   :  { %684 = vmatpush.bf16.msrb.mxu0 %v3300_v1 }
  0x7f   :  { %697 = vmatpush.bf16.msrb.mxu1 %v3301_v10 }
  0x80   :  { %710 = vmatpush.bf16.msrb.mxu2 %v3302_v22 }
  0x81   :  { %723 = vmatpush.bf16.msrb.mxu3 %v3303_v36 }
  0x82   :  { %685 = vmatpush.bf16.msrb.mxu0 %v3304_v37 }
  0x83   :  { %698 = vmatpush.bf16.msrb.mxu1 %v3305_v39 }
  0x84   :  { %711 = vmatpush.bf16.msrb.mxu2 %v2604_v32 }
  0x85   :  { %724 = vmatpush.bf16.msrb.mxu3 %v2607_v40 }
  0x86   :  { %686 = vmatpush.bf16.msrb.mxu0 %v2610_v49 }
  0x87   :  { %699 = vmatpush.bf16.msrb.mxu1 %v2614_v54 }
  0x88   :  { %712 = vmatpush.bf16.msrb.mxu2 %v2616_v11 }
  0x89   :  { %725 = vmatpush.bf16.msrb.mxu3 %v2619_v24  ;;  %v119_v24 = vld [vmem:[%s3207_s3] sm:$0xf] }
  0x8a   :  { %687 = vmatpush.bf16.msrb.mxu0 %v2622_v26  ;;  %v2707_v11 = vperm.slane %v119_v24, 0  ;;  %v2709_v26 = vperm.slane %v119_v24, 1 }
  0x8b   :  { %700 = vmatpush.bf16.msrb.mxu1 %v2626_v15 }
  0x8c   :  { %713 = vmatpush.bf16.msrb.mxu2 %v2628_v31  ;;  %3306 = vst [vmem:[#allocation36_spill] sm:$0xff] %v2707_v11 }
  0x8d   :  { %726 = vmatpush.bf16.msrb.mxu3 %v2631_v48  ;;  %3307 = vst [vmem:[#allocation37_spill] sm:$0xff] %v2709_v26 }
  0xaa   :  { %v302_v39 = vpop.f32.mrf.mxu0 }
  0xab   :  { %v315_v32 = vpop.f32.mrf.mxu1 }
  0xb2   :  { %v341_v37 = vpop.f32.mrf.mxu3  ;;  %v304_v40 = vpop.f32.mrf.mxu0 }
  0xb3   :  { %v317_v49 = vpop.f32.mrf.mxu1 }
  0xb4   :  { %v328_v36 = vpop.f32.mrf.mxu2  ;;  %v2713_v49 = vperm.slane %v119_v24, 3 }
  0xb6   :  { %3308 = vst [vmem:[#allocation38_spill] sm:$0xff] %v2713_v49 }
  0xba   :  { %v343_v22 = vpop.f32.mrf.mxu3 }
  0xbc   :  { %v330_v54 = vpop.f32.mrf.mxu2 }
  0xca   :  { %v514_v15 = vpop.f32.mrf.mxu0 }
  0xcb   :  { %v515_v31 = vadd.f32 %v514_v15, %v2707_v11  ;;  %v527_v48 = vpop.f32.mrf.mxu1 }
  0xcc   :  { %v528_v10 = vadd.f32 %v527_v48, %v2709_v26  ;;  %v2716_v48 = vperm.slane %v119_v24, 2 }
  0xcd   :  { %v557_v1 = vadd.f32 %v515_v31, %v302_v39 }
  0xce   :  { %v558_v40 = vadd.f32 %v528_v10, %v315_v32  ;;  %3309 = vst [vmem:[#allocation39_spill] sm:$0xff] %v2716_v48 }
  0xcf   :  { %v2122_v0 = vmul.f32 -1.442695, %v557_v1 }
  0xd0   :  { %v2123_v54 = vmul.f32 -1.442695, %v558_v40 }
  0xd1   :  { %2229 = vpow2.f32 %v2122_v0 }
  0xd2   :  { %v540_v22 = vpop.f32.mrf.mxu2  ;;  %2231 = vpow2.f32 %v2123_v54  ;;  %v516_v4 = vpop.f32.mrf.mxu0 }
  0xd3   :  { %v553_v63 = vpop.f32.mrf.mxu3  ;;  %v529_v13 = vpop.f32.mrf.mxu1  ;;  %v541_v0 = vadd.f32 %v540_v22, %v2716_v48 }
  0xd4   :  { %v554_v53 = vadd.f32 %v553_v63, %v2713_v49 }
  0xd5   :  { %v559_v39 = vadd.f32 %v541_v0, %v328_v36 }
  0xd6   :  { %v560_v47 = vadd.f32 %v554_v53, %v341_v37 }
  0xd7   :  { %v2230_v42 = vpop.eup %2229 }
  0xd8   :  { %v2124_v15 = vmul.f32 -1.442695, %v560_v47  ;;  %v2232_v11 = vpop.eup %2231  ;;  %v564_v41 = vadd.f32 1.0, %v2230_v42 }
  0xd9   :  { %v583_v32 = vadd.f32 1.0, %v2232_v11 }
  0xda   :  { %2233 = vpow2.f32 %v2124_v15  ;;  %v542_v31 = vpop.f32.mrf.mxu2  ;;  %v576_v24 = vand.u32 2147483648, %v564_v41  ;;  %v574_v54 = vand.u32 2147483647, %v564_v41  ;;  %vm570_vm2 = vweird.f32 %v564_v41 }
  0xdb   :  { %2235 = vrcp.f32 %v564_v41  ;;  %v555_v1 = vpop.f32.mrf.mxu3  ;;  %v595_v11 = vand.u32 2147483648, %v583_v32  ;;  %v593_v31 = vand.u32 2147483647, %v583_v32  ;;  %vm589_vm3 = vweird.f32 %v583_v32 }
  0xdc   :  { %2237 = vrcp.f32 %v583_v32  ;;  %v577_v36 = vor.u32 1.1754944e-38, %v576_v24  ;;  %vm575_vm5 = vcmp.eq.f32.partialorder %v574_v54, 8.507059e+37 }
  0xdd   :  { %vm594_vm7 = vcmp.eq.f32.partialorder %v593_v31, 8.507059e+37 }
  0xe0   :  { %v2234_v10 = vpop.eup %2233 }
  0xe1   :  { %v2236_v4 = vpop.eup %2235  ;;  %v603_v63 = vadd.f32 1.0, %v2234_v10  ;;  %v596_v10 = vor.u32 1.1754944e-38, %v595_v11 }
  0xe2   :  { %v2238_v13 = vpop.eup %2237  ;;  %v566_v53 = vmul.f32 %v2236_v4, %v564_v41  ;;  %vm571_vm0 = vweird.f32 %v2236_v4 }
  0xe3   :  { %v585_v37 = vmul.f32 %v2238_v13, %v583_v32  ;;  %2239 = vrcp.f32 %v603_v63  ;;  %vm590_vm1 = vweird.f32 %v2238_v13  ;;  %vm572_vm4 = vmor %vm570_vm2, %vm571_vm0  ;;  %v615_v24 = vand.u32 2147483648, %v603_v63 }
  0xe4   :  { %v567_v47 = vsub.f32 1.0, %v566_v53  ;;  %2241 = vtanh.f32 %v559_v39  ;;  %vm591_vm6 = vmor %vm589_vm3, %vm590_vm1  ;;  %vm609_vm9 = vweird.f32 %v603_v63 }
  0xe5   :  { %v586_v42 = vsub.f32 1.0, %v585_v37  ;;  %v616_v54 = vor.u32 1.1754944e-38, %v615_v24  ;;  %v3325_v24 = vld [vmem:[#allocation26_spill] sm:$0xff] }
  0xe6   :  { %v568_v40 = vmul.f32 %v2236_v4, %v567_v47 }
  0xe7   :  { %v587_v15 = vmul.f32 %v2238_v13, %v586_v42 }
  0xe8   :  { %v569_v22 = vadd.f32 %v2236_v4, %v568_v40 }
  0xe9   :  { %v2240_v1 = vpop.eup %2239  ;;  %v588_v0 = vadd.f32 %v2238_v13, %v587_v15 }
  0xea   :  { %v573_v48 = vsel %vm572_vm4, %v2236_v4, %v569_v22  ;;  %v605_v53 = vmul.f32 %v2240_v1, %v603_v63  ;;  %v2242_v39 = vpop.eup %2241  ;;  %vm610_vm8 = vweird.f32 %v2240_v1  ;;  %v613_v4 = vand.u32 2147483647, %v603_v63  ;;  %v3312_v63 = vld [vmem:[#allocation13_spill] sm:$0xff]  ;;  %v3313_v22 = vld [vmem:[#allocation14_spill] sm:$0xff] }
  0xeb   :  { %v578_v37 = vsel %vm575_vm5, %v577_v36, %v573_v48  ;;  %v592_v47 = vsel %vm591_vm6, %v2238_v13, %v588_v0  ;;  %vm611_vm10 = vmor %vm609_vm9, %vm610_vm8  ;;  %v3315_v36 = vld [vmem:[#allocation16_spill] sm:$0xff]  ;;  %v3316_v0 = vld [vmem:[#allocation17_spill] sm:$0xff] }
  0xec   :  { %v597_v49 = vsel %vm594_vm7, %v596_v10, %v592_v47  ;;  %v620_v42 = vmul.f32 %v2242_v39, %v578_v37  ;;  %v606_v26 = vsub.f32 1.0, %v605_v53  ;;  %vm614_vm11 = vcmp.eq.f32.partialorder %v613_v4, 8.507059e+37  ;;  %v3317_v10 = vld [vmem:[#allocation18_spill] sm:$0xff]  ;;  %v3318_v53 = vld [vmem:[#allocation19_spill] sm:$0xff]  ;;  %v3319_v39 = vld [vmem:[#allocation20_spill] sm:$0xff] }
  0xed   :  { %v619_v30 = vmul.f32 0.0, %v597_v49  ;;  %v3311_v49 = vld [vmem:[#allocation12_spill] sm:$0xff]  ;;  %v3320_v37 = vld [vmem:[#allocation21_spill] sm:$0xff]  ;;  %v3321_v47 = vld [vmem:[#allocation22_spill] sm:$0xff] }
  0xee   :  { %v607_v40 = vmul.f32 %v2240_v1, %v606_v26  ;;  %v3310_v26 = vld [vmem:[#allocation11_spill] sm:$0xff] }
  0xef   :  { %v2719_v41 = vadd.f32 %v620_v42, %v619_v30  ;;  %v2125_v30 = vld [vmem:[%s3204_s0 + $0x4] sm:$0xf]  ;;  %v3322_v42 = vld [vmem:[#allocation23_spill] sm:$0xff] }
  0xf0   :  { %v608_v32 = vadd.f32 %v2240_v1, %v607_v40  ;;  %v3323_v40 = vld [vmem:[#allocation24_spill] sm:$0xff]  ;;  %v3326_v4 = vld [vmem:[#allocation27_spill] sm:$0xff] }
  0xf1   :  { %2243 = vtanh.f32 %v2719_v41 }
  0xf2   :  { %v612_v11 = vsel %vm611_vm10, %v2240_v1, %v608_v32  ;;  %v3314_v1 = vld [vmem:[#allocation15_spill] sm:$0xff]  ;;  %v3324_v32 = vld [vmem:[#allocation25_spill] sm:$0xff] }
  0xf3   :  { %v617_v13 = vsel %vm614_vm11, %v616_v54, %v612_v11  ;;  %v3327_v11 = vld [vmem:[#allocation28_spill] sm:$0xff]  ;;  %v3328_v54 = vld [vmem:[#allocation29_spill] sm:$0xff] }
  0xf7   :  { %v2244_v48 = vpop.eup %2243 }
  0xf8   :  { %v623_v15 = vmul.f32 %v2244_v48, %v617_v13  ;;  %v3329_v48 = vld [vmem:[#allocation30_spill] sm:$0xff]  ;;  %v3330_v13 = vld [vmem:[#allocation31_spill] sm:$0xff] }
  0xfa   :  { %v624_v31 = vpack.c.bf16 %v623_v15, %v623_v15  ;;  %v3331_v15 = vld [vmem:[#allocation32_spill] sm:$0xff] }
  0xfc   :  { %625 = vst [vmem:[%s3208_s4] sm:$0xf] %v624_v31  ;;  %636 = vmatmul.bf16.vlgmr.msra.gmra.mxu0 %v624_v31  ;;  %649 = vmatmul.bf16.vlgmr.msra.gmra.mxu1 %v624_v31 }
  0xfd   :  { %662 = vmatmul.bf16.vlgmr.msra.gmra.mxu2 %v624_v31  ;;  %675 = vmatmul.bf16.vlgmr.msra.gmra.mxu3 %v624_v31  ;;  %v3332_v31 = vld [vmem:[#allocation33_spill] sm:$0xff] }
  0xfe   :  { %804 = vmatpush.bf16.msra.mxu0 %v2445_v3  ;;  %817 = vmatpush.bf16.msra.mxu1 %v2447_v7 }
  0xff   :  { %830 = vmatpush.bf16.msra.mxu2 %v2449_v8  ;;  %843 = vmatpush.bf16.msra.mxu3 %v2452_v12 }
 0x102   :  { %805 = vmatpush.bf16.msra.mxu0 %v2456_v16  ;;  %818 = vmatpush.bf16.msra.mxu1 %v2458_v17 }
 0x103   :  { %831 = vmatpush.bf16.msra.mxu2 %v2461_v21  ;;  %844 = vmatpush.bf16.msra.mxu3 %v2463_v25 }
 0x106   :  { %806 = vmatpush.bf16.msra.mxu0 %v2466_v29  ;;  %819 = vmatpush.bf16.msra.mxu1 %v2470_v33 }
 0x107   :  { %832 = vmatpush.bf16.msra.mxu2 %v2472_v34  ;;  %845 = vmatpush.bf16.msra.mxu3 %v2475_v38 }
 0x10a   :  { %807 = vmatpush.bf16.msra.mxu0 %v2478_v44  ;;  %820 = vmatpush.bf16.msra.mxu1 %v2482_v45 }
 0x10b   :  { %833 = vmatpush.bf16.msra.mxu2 %v2484_v46  ;;  %846 = vmatpush.bf16.msra.mxu3 %v2487_v50 }
 0x10c   :  { %688 = vmatmul.bf16.vlgmr.msrb.gmra.mxu0 %v2125_v30  ;;  %701 = vmatmul.bf16.vlgmr.msrb.gmra.mxu1 %v2125_v30 }
 0x10d   :  { %714 = vmatmul.bf16.vlgmr.msrb.gmra.mxu2 %v2125_v30  ;;  %727 = vmatmul.bf16.vlgmr.msrb.gmra.mxu3 %v2125_v30  ;;  %v3333_v30 = vld [vmem:[#allocation34_spill] sm:$0xff] }
 0x10e   :  { %808 = vmatpush.bf16.msra.mxu0 %v2490_v56  ;;  %821 = vmatpush.bf16.msra.mxu1 %v2494_v57 }
 0x10f   :  { %834 = vmatpush.bf16.msra.mxu2 %v2496_v58  ;;  %847 = vmatpush.bf16.msra.mxu3 %v2499_v62 }
 0x112   :  { %809 = vmatpush.bf16.msra.mxu0 %v2502_v5  ;;  %822 = vmatpush.bf16.msra.mxu1 %v2506_v6 }
 0x113   :  { %835 = vmatpush.bf16.msra.mxu2 %v2508_v9  ;;  %848 = vmatpush.bf16.msra.mxu3 %v2511_v14 }
 0x116   :  { %810 = vmatpush.bf16.msra.mxu0 %v2514_v23  ;;  %823 = vmatpush.bf16.msra.mxu1 %v2518_v27 }
 0x117   :  { %836 = vmatpush.bf16.msra.mxu2 %v2520_v28  ;;  %849 = vmatpush.bf16.msra.mxu3 %v2523_v35 }
 0x11a   :  { %811 = vmatpush.bf16.msra.mxu0 %v2526_v43  ;;  %824 = vmatpush.bf16.msra.mxu1 %v2530_v51 }
 0x11b   :  { %837 = vmatpush.bf16.msra.mxu2 %v2532_v52  ;;  %850 = vmatpush.bf16.msra.mxu3 %v2535_v55 }
 0x11e   :  { %856 = vmatpush.bf16.msrb.mxu0 %v2537_v59  ;;  %869 = vmatpush.bf16.msrb.mxu1 %v2539_v60 }
 0x11f   :  { %882 = vmatpush.bf16.msrb.mxu2 %v2541_v61  ;;  %895 = vmatpush.bf16.msrb.mxu3 %v2544_v2 }
 0x122   :  { %857 = vmatpush.bf16.msrb.mxu0 %v2550_v18  ;;  %870 = vmatpush.bf16.msrb.mxu1 %v2554_v19 }
 0x123   :  { %883 = vmatpush.bf16.msrb.mxu2 %v2556_v20  ;;  %896 = vmatpush.bf16.msrb.mxu3 %v3310_v26 }
 0x126   :  { %858 = vmatpush.bf16.msrb.mxu0 %v3311_v49  ;;  %871 = vmatpush.bf16.msrb.mxu1 %v3312_v63 }
 0x127   :  { %884 = vmatpush.bf16.msrb.mxu2 %v3313_v22  ;;  %897 = vmatpush.bf16.msrb.mxu3 %v3314_v1  ;;  %v3337_v22 = vld [vmem:[#allocation38_spill] sm:$0xff] }
 0x12a   :  { %859 = vmatpush.bf16.msrb.mxu0 %v3315_v36  ;;  %872 = vmatpush.bf16.msrb.mxu1 %v3316_v0 }
 0x12b   :  { %885 = vmatpush.bf16.msrb.mxu2 %v3317_v10  ;;  %898 = vmatpush.bf16.msrb.mxu3 %v3318_v53  ;;  %v3335_v53 = vld [vmem:[#allocation36_spill] sm:$0xff]  ;;  %v3336_v10 = vld [vmem:[#allocation37_spill] sm:$0xff] }
 0x12e   :  { %860 = vmatpush.bf16.msrb.mxu0 %v3319_v39  ;;  %873 = vmatpush.bf16.msrb.mxu1 %v3320_v37 }
 0x12f   :  { %886 = vmatpush.bf16.msrb.mxu2 %v3321_v47  ;;  %899 = vmatpush.bf16.msrb.mxu3 %v3322_v42 }
 0x132   :  { %861 = vmatpush.bf16.msrb.mxu0 %v3323_v40  ;;  %874 = vmatpush.bf16.msrb.mxu1 %v3324_v32  ;;  %v3334_v40 = vld [vmem:[#allocation35_spill] sm:$0xff] }
 0x133   :  { %887 = vmatpush.bf16.msrb.mxu2 %v3325_v24  ;;  %900 = vmatpush.bf16.msrb.mxu3 %v3326_v4 }
 0x136   :  { %862 = vmatpush.bf16.msrb.mxu0 %v3327_v11  ;;  %875 = vmatpush.bf16.msrb.mxu1 %v3328_v54 }
 0x137   :  { %888 = vmatpush.bf16.msrb.mxu2 %v3329_v48  ;;  %901 = vmatpush.bf16.msrb.mxu3 %v3330_v13 }
 0x13a   :  { %863 = vmatpush.bf16.msrb.mxu0 %v3331_v15  ;;  %876 = vmatpush.bf16.msrb.mxu1 %v3332_v31 }
 0x13b   :  { %889 = vmatpush.bf16.msrb.mxu2 %v3333_v30  ;;  %902 = vmatpush.bf16.msrb.mxu3 %v3334_v40 }
 0x179   :  { %v637_v32 = vpop.f32.mrf.mxu0  ;;  %v650_v24 = vpop.f32.mrf.mxu1 }
 0x180   :  { %v663_v42 = vpop.f32.mrf.mxu2  ;;  %v676_v4 = vpop.f32.mrf.mxu3 }
 0x181   :  { %v639_v47 = vpop.f32.mrf.mxu0  ;;  %v652_v11 = vpop.f32.mrf.mxu1 }
 0x188   :  { %v665_v37 = vpop.f32.mrf.mxu2  ;;  %v678_v54 = vpop.f32.mrf.mxu3 }
 0x189   :  { %v689_v39 = vpop.f32.mrf.mxu0  ;;  %v702_v48 = vpop.f32.mrf.mxu1 }
 0x18a   :  { %v690_v13 = vadd.f32 %v689_v39, %v3335_v53  ;;  %v703_v15 = vadd.f32 %v702_v48, %v3336_v10 }
 0x18c   :  { %v732_v0 = vadd.f32 %v690_v13, %v637_v32  ;;  %v733_v31 = vadd.f32 %v703_v15, %v650_v24 }
 0x18e   :  { %v2126_v36 = vmul.f32 -1.442695, %v732_v0  ;;  %v2127_v30 = vmul.f32 -1.442695, %v733_v31  ;;  %v3338_v0 = vld [vmem:[#allocation39_spill] sm:$0xff] }
 0x190   :  { %2245 = vpow2.f32 %v2126_v36  ;;  %v715_v40 = vpop.f32.mrf.mxu2  ;;  %v728_v1 = vpop.f32.mrf.mxu3 }
 0x191   :  { %2247 = vpow2.f32 %v2127_v30  ;;  %v729_v63 = vadd.f32 %v728_v1, %v3337_v22  ;;  %v691_v47 = vpop.f32.mrf.mxu0  ;;  %v704_v11 = vpop.f32.mrf.mxu1  ;;  %v716_v36 = vadd.f32 %v715_v40, %v3338_v0 }
 0x193   :  { %v735_v37 = vadd.f32 %v729_v63, %v676_v4  ;;  %v734_v31 = vadd.f32 %v716_v36, %v663_v42 }
 0x195   :  { %v2128_v54 = vmul.f32 -1.442695, %v735_v37 }
 0x196   :  { %v2246_v49 = vpop.eup %2245 }
 0x197   :  { %v2248_v26 = vpop.eup %2247  ;;  %v739_v20 = vadd.f32 1.0, %v2246_v49  ;;  %2249 = vpow2.f32 %v2128_v54 }
 0x198   :  { %v758_v39 = vadd.f32 1.0, %v2248_v26  ;;  %v730_v48 = vpop.f32.mrf.mxu3  ;;  %v717_v32 = vpop.f32.mrf.mxu2 }
 0x199   :  { %2251 = vrcp.f32 %v739_v20  ;;  %v751_v11 = vand.u32 2147483648, %v739_v20  ;;  %v749_v37 = vand.u32 2147483647, %v739_v20  ;;  %vm745_vm14 = vweird.f32 %v739_v20 }
 0x19a   :  { %2253 = vrcp.f32 %v758_v39  ;;  %v770_v49 = vand.u32 2147483648, %v758_v39  ;;  %v768_v48 = vand.u32 2147483647, %v758_v39  ;;  %vm764_vm15 = vweird.f32 %v758_v39 }
 0x19b   :  { %v752_v42 = vor.u32 1.1754944e-38, %v751_v11  ;;  %vm750_vm2 = vcmp.eq.f32.partialorder %v749_v37, 8.507059e+37 }
 0x19c   :  { %vm769_vm3 = vcmp.eq.f32.partialorder %v768_v48, 8.507059e+37 }
 0x19d   :  { %v2250_v24 = vpop.eup %2249 }
 0x19e   :  { %v778_v13 = vadd.f32 1.0, %v2250_v24 }
 0x19f   :  { %v2252_v15 = vpop.eup %2251 }
 0x1a0   :  { %v2254_v1 = vpop.eup %2253  ;;  %v741_v30 = vmul.f32 %v2252_v15, %v739_v20  ;;  %2255 = vrcp.f32 %v778_v13  ;;  %vm746_vm12 = vweird.f32 %v2252_v15  ;;  %v790_v11 = vand.u32 2147483648, %v778_v13 }
 0x1a1   :  { %v760_v63 = vmul.f32 %v2254_v1, %v758_v39  ;;  %2257 = vtanh.f32 %v734_v31  ;;  %vm765_vm13 = vweird.f32 %v2254_v1  ;;  %vm747_vm0 = vmor %vm745_vm14, %vm746_vm12  ;;  %vm784_vm5 = vweird.f32 %v778_v13 }
 0x1a2   :  { %v742_v4 = vsub.f32 1.0, %v741_v30  ;;  %vm766_vm1 = vmor %vm764_vm15, %vm765_vm13  ;;  %v771_v30 = vor.u32 1.1754944e-38, %v770_v49  ;;  %v791_v37 = vor.u32 1.1754944e-38, %v790_v11  ;;  %v3355_v11 = vld [vmem:[#allocation26_spill] sm:$0xff] }
 0x1a3   :  { %v761_v47 = vsub.f32 1.0, %v760_v63 }
 0x1a4   :  { %v743_v26 = vmul.f32 %v2252_v15, %v742_v4 }
 0x1a5   :  { %v762_v54 = vmul.f32 %v2254_v1, %v761_v47 }
 0x1a6   :  { %v2256_v40 = vpop.eup %2255  ;;  %v744_v32 = vadd.f32 %v2252_v15, %v743_v26 }
 0x1a7   :  { %v763_v36 = vadd.f32 %v2254_v1, %v762_v54  ;;  %v780_v24 = vmul.f32 %v2256_v40, %v778_v13  ;;  %v2258_v31 = vpop.eup %2257  ;;  %vm785_vm4 = vweird.f32 %v2256_v40 }
 0x1a8   :  { %v748_v63 = vsel %vm747_vm0, %v2252_v15, %v744_v32  ;;  %v788_v15 = vand.u32 2147483647, %v778_v13  ;;  %vm786_vm6 = vmor %vm784_vm5, %vm785_vm4  ;;  %v3342_v13 = vld [vmem:[#allocation13_spill] sm:$0xff]  ;;  %v3344_v32 = vld [vmem:[#allocation15_spill] sm:$0xff] }
 0x1a9   :  { %v753_v0 = vsel %vm750_vm2, %v752_v42, %v748_v63  ;;  %v767_v4 = vsel %vm766_vm1, %v2254_v1, %v763_v36  ;;  %v781_v22 = vsub.f32 1.0, %v780_v24  ;;  %v3345_v42 = vld [vmem:[#allocation16_spill] sm:$0xff]  ;;  %v3346_v36 = vld [vmem:[#allocation17_spill] sm:$0xff]  ;;  %v3347_v24 = vld [vmem:[#allocation18_spill] sm:$0xff] }
 0x1aa   :  { %v772_v47 = vsel %vm769_vm3, %v771_v30, %v767_v4  ;;  %v795_v10 = vmul.f32 %v2258_v31, %v753_v0  ;;  %vm789_vm7 = vcmp.eq.f32.partialorder %v788_v15, 8.507059e+37  ;;  %v3348_v30 = vld [vmem:[#allocation19_spill] sm:$0xff]  ;;  %v3349_v63 = vld [vmem:[#allocation20_spill] sm:$0xff]  ;;  %v3350_v31 = vld [vmem:[#allocation21_spill] sm:$0xff] }
 0x1ab   :  { %v794_v53 = vmul.f32 %v772_v47, %v2719_v41  ;;  %v782_v26 = vmul.f32 %v2256_v40, %v781_v22  ;;  %v2130_v41 = vld [vmem:[%s3204_s0 + $0x8] sm:$0xf]  ;;  %v3339_v22 = vld [vmem:[#allocation10_spill] sm:$0xff] }
 0x1ac   :  { %v3351_v4 = vld [vmem:[#allocation22_spill] sm:$0xff]  ;;  %v3352_v47 = vld [vmem:[#allocation23_spill] sm:$0xff] }
 0x1ad   :  { %v2797_v20 = vadd.f32 %v795_v10, %v794_v53  ;;  %v783_v39 = vadd.f32 %v2256_v40, %v782_v26  ;;  %v3340_v10 = vld [vmem:[#allocation11_spill] sm:$0xff]  ;;  %v3341_v53 = vld [vmem:[#allocation12_spill] sm:$0xff] }
 0x1ae   :  { %v3353_v26 = vld [vmem:[#allocation24_spill] sm:$0xff]  ;;  %v3356_v15 = vld [vmem:[#allocation27_spill] sm:$0xff] }
 0x1af   :  { %2259 = vtanh.f32 %v2797_v20  ;;  %v787_v49 = vsel %vm786_vm6, %v2256_v40, %v783_v39  ;;  %v3343_v40 = vld [vmem:[#allocation14_spill] sm:$0xff]  ;;  %v3354_v39 = vld [vmem:[#allocation25_spill] sm:$0xff] }
 0x1b0   :  { %v792_v54 = vsel %vm789_vm7, %v791_v37, %v787_v49  ;;  %v3357_v49 = vld [vmem:[#allocation28_spill] sm:$0xff]  ;;  %v3358_v37 = vld [vmem:[#allocation29_spill] sm:$0xff] }
 0x1b5   :  { %v2260_v1 = vpop.eup %2259 }
 0x1b6   :  { %v798_v48 = vmul.f32 %v2260_v1, %v792_v54  ;;  %v3359_v1 = vld [vmem:[#allocation30_spill] sm:$0xff]  ;;  %v3360_v54 = vld [vmem:[#allocation31_spill] sm:$0xff] }
 0x1b8   :  { %v799_v0 = vpack.c.bf16 %v798_v48, %v798_v48  ;;  %v3361_v48 = vld [vmem:[#allocation32_spill] sm:$0xff] }
 0x1ba   :  { %2129 = vst [vmem:[%s3208_s4 + $0x4] sm:$0xf] %v799_v0  ;;  %812 = vmatmul.bf16.vlgmr.msra.gmra.mxu0 %v799_v0  ;;  %825 = vmatmul.bf16.vlgmr.msra.gmra.mxu1 %v799_v0 }
 0x1bb   :  { %838 = vmatmul.bf16.vlgmr.msra.gmra.mxu2 %v799_v0  ;;  %851 = vmatmul.bf16.vlgmr.msra.gmra.mxu3 %v799_v0  ;;  %v3362_v0 = vld [vmem:[#allocation33_spill] sm:$0xff] }
 0x1bc   :  { %980 = vmatpush.bf16.msra.mxu0 %v2445_v3  ;;  %993 = vmatpush.bf16.msra.mxu1 %v2447_v7 }
 0x1bd   :  { %1006 = vmatpush.bf16.msra.mxu2 %v2449_v8  ;;  %1019 = vmatpush.bf16.msra.mxu3 %v2452_v12 }
 0x1c0   :  { %981 = vmatpush.bf16.msra.mxu0 %v2456_v16  ;;  %994 = vmatpush.bf16.msra.mxu1 %v2458_v17 }
 0x1c1   :  { %1007 = vmatpush.bf16.msra.mxu2 %v2461_v21  ;;  %1020 = vmatpush.bf16.msra.mxu3 %v2463_v25 }
 0x1c4   :  { %982 = vmatpush.bf16.msra.mxu0 %v2466_v29  ;;  %995 = vmatpush.bf16.msra.mxu1 %v2470_v33 }
 0x1c5   :  { %1008 = vmatpush.bf16.msra.mxu2 %v2472_v34  ;;  %1021 = vmatpush.bf16.msra.mxu3 %v2475_v38 }
 0x1c8   :  { %983 = vmatpush.bf16.msra.mxu0 %v2478_v44  ;;  %996 = vmatpush.bf16.msra.mxu1 %v2482_v45 }
 0x1c9   :  { %1009 = vmatpush.bf16.msra.mxu2 %v2484_v46  ;;  %1022 = vmatpush.bf16.msra.mxu3 %v2487_v50 }
 0x1ca   :  { %864 = vmatmul.bf16.vlgmr.msrb.gmra.mxu0 %v2130_v41  ;;  %877 = vmatmul.bf16.vlgmr.msrb.gmra.mxu1 %v2130_v41 }
 0x1cb   :  { %890 = vmatmul.bf16.vlgmr.msrb.gmra.mxu2 %v2130_v41  ;;  %903 = vmatmul.bf16.vlgmr.msrb.gmra.mxu3 %v2130_v41  ;;  %v3363_v41 = vld [vmem:[#allocation34_spill] sm:$0xff] }
 0x1cc   :  { %984 = vmatpush.bf16.msra.mxu0 %v2490_v56  ;;  %997 = vmatpush.bf16.msra.mxu1 %v2494_v57 }
 0x1cd   :  { %1010 = vmatpush.bf16.msra.mxu2 %v2496_v58  ;;  %1023 = vmatpush.bf16.msra.mxu3 %v2499_v62 }
 0x1d0   :  { %985 = vmatpush.bf16.msra.mxu0 %v2502_v5  ;;  %998 = vmatpush.bf16.msra.mxu1 %v2506_v6 }
 0x1d1   :  { %1011 = vmatpush.bf16.msra.mxu2 %v2508_v9  ;;  %1024 = vmatpush.bf16.msra.mxu3 %v2511_v14 }
 0x1d4   :  { %986 = vmatpush.bf16.msra.mxu0 %v2514_v23  ;;  %999 = vmatpush.bf16.msra.mxu1 %v2518_v27 }
 0x1d5   :  { %1012 = vmatpush.bf16.msra.mxu2 %v2520_v28  ;;  %1025 = vmatpush.bf16.msra.mxu3 %v2523_v35 }
 0x1d8   :  { %987 = vmatpush.bf16.msra.mxu0 %v2526_v43  ;;  %1000 = vmatpush.bf16.msra.mxu1 %v2530_v51 }
 0x1d9   :  { %1013 = vmatpush.bf16.msra.mxu2 %v2532_v52  ;;  %1026 = vmatpush.bf16.msra.mxu3 %v2535_v55 }
 0x1dc   :  { %1032 = vmatpush.bf16.msrb.mxu0 %v2537_v59  ;;  %1045 = vmatpush.bf16.msrb.mxu1 %v2539_v60 }
 0x1dd   :  { %1058 = vmatpush.bf16.msrb.mxu2 %v2541_v61  ;;  %1071 = vmatpush.bf16.msrb.mxu3 %v2544_v2 }
 0x1e0   :  { %1033 = vmatpush.bf16.msrb.mxu0 %v2550_v18  ;;  %1046 = vmatpush.bf16.msrb.mxu1 %v2554_v19 }
 0x1e1   :  { %1059 = vmatpush.bf16.msrb.mxu2 %v3339_v22  ;;  %1072 = vmatpush.bf16.msrb.mxu3 %v3340_v10 }
 0x1e4   :  { %1034 = vmatpush.bf16.msrb.mxu0 %v3341_v53  ;;  %1047 = vmatpush.bf16.msrb.mxu1 %v3342_v13 }
 0x1e5   :  { %1060 = vmatpush.bf16.msrb.mxu2 %v3343_v40  ;;  %1073 = vmatpush.bf16.msrb.mxu3 %v3344_v32  ;;  %v3367_v40 = vld [vmem:[#allocation38_spill] sm:$0xff] }
 0x1e8   :  { %1035 = vmatpush.bf16.msrb.mxu0 %v3345_v42  ;;  %1048 = vmatpush.bf16.msrb.mxu1 %v3346_v36 }
 0x1e9   :  { %1061 = vmatpush.bf16.msrb.mxu2 %v3347_v24  ;;  %1074 = vmatpush.bf16.msrb.mxu3 %v3348_v30  ;;  %v3365_v30 = vld [vmem:[#allocation36_spill] sm:$0xff]  ;;  %v3366_v24 = vld [vmem:[#allocation37_spill] sm:$0xff] }
 0x1ec   :  { %1036 = vmatpush.bf16.msrb.mxu0 %v3349_v63  ;;  %1049 = vmatpush.bf16.msrb.mxu1 %v3350_v31 }
 0x1ed   :  { %1062 = vmatpush.bf16.msrb.mxu2 %v3351_v4  ;;  %1075 = vmatpush.bf16.msrb.mxu3 %v3352_v47 }
 0x1f0   :  { %1037 = vmatpush.bf16.msrb.mxu0 %v3353_v26  ;;  %1050 = vmatpush.bf16.msrb.mxu1 %v3354_v39  ;;  %v3364_v26 = vld [vmem:[#allocation35_spill] sm:$0xff] }
 0x1f1   :  { %1063 = vmatpush.bf16.msrb.mxu2 %v3355_v11  ;;  %1076 = vmatpush.bf16.msrb.mxu3 %v3356_v15 }
 0x1f4   :  { %1038 = vmatpush.bf16.msrb.mxu0 %v3357_v49  ;;  %1051 = vmatpush.bf16.msrb.mxu1 %v3358_v37 }
 0x1f5   :  { %1064 = vmatpush.bf16.msrb.mxu2 %v3359_v1  ;;  %1077 = vmatpush.bf16.msrb.mxu3 %v3360_v54 }
 0x1f8   :  { %1039 = vmatpush.bf16.msrb.mxu0 %v3361_v48  ;;  %1052 = vmatpush.bf16.msrb.mxu1 %v3362_v0 }
 0x1f9   :  { %1065 = vmatpush.bf16.msrb.mxu2 %v3363_v41  ;;  %1078 = vmatpush.bf16.msrb.mxu3 %v3364_v26 }
 0x237   :  { %v813_v39 = vpop.f32.mrf.mxu0  ;;  %v826_v11 = vpop.f32.mrf.mxu1 }
 0x23e   :  { %v839_v47 = vpop.f32.mrf.mxu2  ;;  %v852_v15 = vpop.f32.mrf.mxu3 }
 0x23f   :  { %v815_v4 = vpop.f32.mrf.mxu0  ;;  %v828_v49 = vpop.f32.mrf.mxu1 }
 0x246   :  { %v841_v31 = vpop.f32.mrf.mxu2  ;;  %v854_v37 = vpop.f32.mrf.mxu3 }
 0x247   :  { %v865_v63 = vpop.f32.mrf.mxu0  ;;  %v878_v1 = vpop.f32.mrf.mxu1 }
 0x248   :  { %v866_v54 = vadd.f32 %v865_v63, %v3365_v30  ;;  %v879_v48 = vadd.f32 %v878_v1, %v3366_v24 }
 0x24a   :  { %v908_v36 = vadd.f32 %v866_v54, %v813_v39  ;;  %v909_v0 = vadd.f32 %v879_v48, %v826_v11 }
 0x24c   :  { %v2131_v42 = vmul.f32 -1.442695, %v908_v36  ;;  %v2132_v41 = vmul.f32 -1.442695, %v909_v0  ;;  %v3368_v36 = vld [vmem:[#allocation39_spill] sm:$0xff] }
 0x24e   :  { %2261 = vpow2.f32 %v2131_v42  ;;  %v891_v26 = vpop.f32.mrf.mxu2  ;;  %v904_v32 = vpop.f32.mrf.mxu3 }
 0x24f   :  { %2263 = vpow2.f32 %v2132_v41  ;;  %v905_v13 = vadd.f32 %v904_v32, %v3367_v40  ;;  %v867_v4 = vpop.f32.mrf.mxu0  ;;  %v880_v49 = vpop.f32.mrf.mxu1  ;;  %v892_v42 = vadd.f32 %v891_v26, %v3368_v36 }
 0x251   :  { %v911_v31 = vadd.f32 %v905_v13, %v852_v15  ;;  %v910_v0 = vadd.f32 %v892_v42, %v839_v47 }
 0x253   :  { %v2133_v37 = vmul.f32 -1.442695, %v911_v31 }
 0x254   :  { %v2262_v53 = vpop.eup %2261 }
 0x255   :  { %v2264_v10 = vpop.eup %2263  ;;  %v915_v22 = vadd.f32 1.0, %v2262_v53  ;;  %2265 = vpow2.f32 %v2133_v37 }
 0x256   :  { %v934_v63 = vadd.f32 1.0, %v2264_v10  ;;  %v906_v1 = vpop.f32.mrf.mxu3  ;;  %v893_v39 = vpop.f32.mrf.mxu2 }
 0x257   :  { %2267 = vrcp.f32 %v915_v22  ;;  %v927_v49 = vand.u32 2147483648, %v915_v22  ;;  %v925_v31 = vand.u32 2147483647, %v915_v22  ;;  %vm921_vm10 = vweird.f32 %v915_v22 }
 0x258   :  { %2269 = vrcp.f32 %v934_v63  ;;  %v946_v53 = vand.u32 2147483648, %v934_v63  ;;  %v944_v1 = vand.u32 2147483647, %v934_v63  ;;  %vm940_vm11 = vweird.f32 %v934_v63 }
 0x259   :  { %v928_v47 = vor.u32 1.1754944e-38, %v927_v49  ;;  %vm926_vm14 = vcmp.eq.f32.partialorder %v925_v31, 8.507059e+37 }
 0x25a   :  { %vm945_vm15 = vcmp.eq.f32.partialorder %v944_v1, 8.507059e+37 }
 0x25b   :  { %v2266_v11 = vpop.eup %2265 }
 0x25c   :  { %v954_v54 = vadd.f32 1.0, %v2266_v11 }
 0x25d   :  { %v2268_v48 = vpop.eup %2267 }
 0x25e   :  { %v2270_v32 = vpop.eup %2269  ;;  %v917_v41 = vmul.f32 %v2268_v48, %v915_v22  ;;  %2271 = vrcp.f32 %v954_v54  ;;  %vm922_vm8 = vweird.f32 %v2268_v48  ;;  %v966_v49 = vand.u32 2147483648, %v954_v54 }
 0x25f   :  { %v936_v13 = vmul.f32 %v2270_v32, %v934_v63  ;;  %2273 = vtanh.f32 %v910_v0  ;;  %vm941_vm9 = vweird.f32 %v2270_v32  ;;  %vm923_vm12 = vmor %vm921_vm10, %vm922_vm8  ;;  %vm960_vm1 = vweird.f32 %v954_v54 }
 0x260   :  { %v918_v15 = vsub.f32 1.0, %v917_v41  ;;  %vm942_vm13 = vmor %vm940_vm11, %vm941_vm9  ;;  %v947_v41 = vor.u32 1.1754944e-38, %v946_v53  ;;  %v967_v31 = vor.u32 1.1754944e-38, %v966_v49  ;;  %v3385_v49 = vld [vmem:[#allocation26_spill] sm:$0xff] }
 0x261   :  { %v937_v4 = vsub.f32 1.0, %v936_v13 }
 0x262   :  { %v919_v10 = vmul.f32 %v2268_v48, %v918_v15 }
 0x263   :  { %v938_v37 = vmul.f32 %v2270_v32, %v937_v4 }
 0x264   :  { %v2272_v26 = vpop.eup %2271  ;;  %v920_v39 = vadd.f32 %v2268_v48, %v919_v10 }
 0x265   :  { %v939_v42 = vadd.f32 %v2270_v32, %v938_v37  ;;  %v956_v11 = vmul.f32 %v2272_v26, %v954_v54  ;;  %v2274_v0 = vpop.eup %2273  ;;  %vm961_vm0 = vweird.f32 %v2272_v26 }
 0x266   :  { %v924_v13 = vsel %vm923_vm12, %v2268_v48, %v920_v39  ;;  %v964_v48 = vand.u32 2147483647, %v954_v54  ;;  %vm962_vm2 = vmor %vm960_vm1, %vm961_vm0  ;;  %v3372_v54 = vld [vmem:[#allocation13_spill] sm:$0xff]  ;;  %v3374_v39 = vld [vmem:[#allocation15_spill] sm:$0xff] }
 0x267   :  { %v929_v36 = vsel %vm926_vm14, %v928_v47, %v924_v13  ;;  %v943_v15 = vsel %vm942_vm13, %v2270_v32, %v939_v42  ;;  %v957_v40 = vsub.f32 1.0, %v956_v11  ;;  %v3375_v47 = vld [vmem:[#allocation16_spill] sm:$0xff]  ;;  %v3376_v42 = vld [vmem:[#allocation17_spill] sm:$0xff]  ;;  %v3377_v11 = vld [vmem:[#allocation18_spill] sm:$0xff] }
 0x268   :  { %v948_v4 = vsel %vm945_vm15, %v947_v41, %v943_v15  ;;  %v971_v24 = vmul.f32 %v2274_v0, %v929_v36  ;;  %vm965_vm3 = vcmp.eq.f32.partialorder %v964_v48, 8.507059e+37  ;;  %v3378_v41 = vld [vmem:[#allocation19_spill] sm:$0xff]  ;;  %v3379_v13 = vld [vmem:[#allocation20_spill] sm:$0xff]  ;;  %v3380_v0 = vld [vmem:[#allocation21_spill] sm:$0xff] }
 0x269   :  { %v970_v30 = vmul.f32 %v948_v4, %v2797_v20  ;;  %v958_v10 = vmul.f32 %v2272_v26, %v957_v40  ;;  %v2135_v20 = vld [vmem:[%s3204_s0 + $0xc] sm:$0xf]  ;;  %v3369_v40 = vld [vmem:[#allocation10_spill] sm:$0xff] }
 0x26a   :  { %v3381_v15 = vld [vmem:[#allocation22_spill] sm:$0xff]  ;;  %v3382_v4 = vld [vmem:[#allocation23_spill] sm:$0xff] }
 0x26b   :  { %v2875_v22 = vadd.f32 %v971_v24, %v970_v30  ;;  %v959_v63 = vadd.f32 %v2272_v26, %v958_v10  ;;  %v3370_v24 = vld [vmem:[#allocation11_spill] sm:$0xff]  ;;  %v3371_v30 = vld [vmem:[#allocation12_spill] sm:$0xff] }
 0x26c   :  { %v3383_v10 = vld [vmem:[#allocation24_spill] sm:$0xff]  ;;  %v3386_v48 = vld [vmem:[#allocation27_spill] sm:$0xff] }
 0x26d   :  { %2275 = vtanh.f32 %v2875_v22  ;;  %v963_v53 = vsel %vm962_vm2, %v2272_v26, %v959_v63  ;;  %v3373_v26 = vld [vmem:[#allocation14_spill] sm:$0xff]  ;;  %v3384_v63 = vld [vmem:[#allocation25_spill] sm:$0xff] }
 0x26e   :  { %v968_v37 = vsel %vm965_vm3, %v967_v31, %v963_v53  ;;  %v3387_v53 = vld [vmem:[#allocation28_spill] sm:$0xff]  ;;  %v3388_v31 = vld [vmem:[#allocation29_spill] sm:$0xff] }
 0x273   :  { %v2276_v32 = vpop.eup %2275 }
 0x274   :  { %v974_v1 = vmul.f32 %v2276_v32, %v968_v37  ;;  %v3389_v32 = vld [vmem:[#allocation30_spill] sm:$0xff]  ;;  %v3390_v37 = vld [vmem:[#allocation31_spill] sm:$0xff] }
 0x276   :  { %v975_v36 = vpack.c.bf16 %v974_v1, %v974_v1  ;;  %v3391_v1 = vld [vmem:[#allocation32_spill] sm:$0xff] }
 0x278   :  { %2134 = vst [vmem:[%s3208_s4 + $0x8] sm:$0xf] %v975_v36  ;;  %988 = vmatmul.bf16.vlgmr.msra.gmra.mxu0 %v975_v36  ;;  %1001 = vmatmul.bf16.vlgmr.msra.gmra.mxu1 %v975_v36 }
 0x279   :  { %1014 = vmatmul.bf16.vlgmr.msra.gmra.mxu2 %v975_v36  ;;  %1027 = vmatmul.bf16.vlgmr.msra.gmra.mxu3 %v975_v36  ;;  %v3392_v36 = vld [vmem:[#allocation33_spill] sm:$0xff] }
 0x27a   :  { %1156 = vmatpush.bf16.msra.mxu0 %v2445_v3  ;;  %1169 = vmatpush.bf16.msra.mxu1 %v2447_v7 }
 0x27b   :  { %1182 = vmatpush.bf16.msra.mxu2 %v2449_v8  ;;  %1195 = vmatpush.bf16.msra.mxu3 %v2452_v12 }
 0x27e   :  { %1157 = vmatpush.bf16.msra.mxu0 %v2456_v16  ;;  %1170 = vmatpush.bf16.msra.mxu1 %v2458_v17 }
 0x27f   :  { %1183 = vmatpush.bf16.msra.mxu2 %v2461_v21  ;;  %1196 = vmatpush.bf16.msra.mxu3 %v2463_v25 }
 0x282   :  { %1158 = vmatpush.bf16.msra.mxu0 %v2466_v29  ;;  %1171 = vmatpush.bf16.msra.mxu1 %v2470_v33 }
 0x283   :  { %1184 = vmatpush.bf16.msra.mxu2 %v2472_v34  ;;  %1197 = vmatpush.bf16.msra.mxu3 %v2475_v38 }
 0x286   :  { %1159 = vmatpush.bf16.msra.mxu0 %v2478_v44  ;;  %1172 = vmatpush.bf16.msra.mxu1 %v2482_v45 }
 0x287   :  { %1185 = vmatpush.bf16.msra.mxu2 %v2484_v46  ;;  %1198 = vmatpush.bf16.msra.mxu3 %v2487_v50 }
 0x288   :  { %1040 = vmatmul.bf16.vlgmr.msrb.gmra.mxu0 %v2135_v20  ;;  %1053 = vmatmul.bf16.vlgmr.msrb.gmra.mxu1 %v2135_v20 }
 0x289   :  { %1066 = vmatmul.bf16.vlgmr.msrb.gmra.mxu2 %v2135_v20  ;;  %1079 = vmatmul.bf16.vlgmr.msrb.gmra.mxu3 %v2135_v20  ;;  %v3393_v20 = vld [vmem:[#allocation34_spill] sm:$0xff] }
 0x28a   :  { %1160 = vmatpush.bf16.msra.mxu0 %v2490_v56  ;;  %1173 = vmatpush.bf16.msra.mxu1 %v2494_v57 }
 0x28b   :  { %1186 = vmatpush.bf16.msra.mxu2 %v2496_v58  ;;  %1199 = vmatpush.bf16.msra.mxu3 %v2499_v62 }
 0x28e   :  { %1161 = vmatpush.bf16.msra.mxu0 %v2502_v5  ;;  %1174 = vmatpush.bf16.msra.mxu1 %v2506_v6 }
 0x28f   :  { %1187 = vmatpush.bf16.msra.mxu2 %v2508_v9  ;;  %1200 = vmatpush.bf16.msra.mxu3 %v2511_v14 }
 0x292   :  { %1162 = vmatpush.bf16.msra.mxu0 %v2514_v23  ;;  %1175 = vmatpush.bf16.msra.mxu1 %v2518_v27 }
 0x293   :  { %1188 = vmatpush.bf16.msra.mxu2 %v2520_v28  ;;  %1201 = vmatpush.bf16.msra.mxu3 %v2523_v35 }
 0x296   :  { %1163 = vmatpush.bf16.msra.mxu0 %v2526_v43  ;;  %1176 = vmatpush.bf16.msra.mxu1 %v2530_v51 }
 0x297   :  { %1189 = vmatpush.bf16.msra.mxu2 %v2532_v52  ;;  %1202 = vmatpush.bf16.msra.mxu3 %v2535_v55 }
 0x29a   :  { %1208 = vmatpush.bf16.msrb.mxu0 %v2537_v59  ;;  %1221 = vmatpush.bf16.msrb.mxu1 %v2539_v60 }
 0x29b   :  { %1234 = vmatpush.bf16.msrb.mxu2 %v2541_v61  ;;  %1247 = vmatpush.bf16.msrb.mxu3 %v2544_v2 }
 0x29e   :  { %1209 = vmatpush.bf16.msrb.mxu0 %v2550_v18  ;;  %1222 = vmatpush.bf16.msrb.mxu1 %v2554_v19 }
 0x29f   :  { %1235 = vmatpush.bf16.msrb.mxu2 %v3369_v40  ;;  %1248 = vmatpush.bf16.msrb.mxu3 %v3370_v24 }
 0x2a2   :  { %1210 = vmatpush.bf16.msrb.mxu0 %v3371_v30  ;;  %1223 = vmatpush.bf16.msrb.mxu1 %v3372_v54 }
 0x2a3   :  { %1236 = vmatpush.bf16.msrb.mxu2 %v3373_v26  ;;  %1249 = vmatpush.bf16.msrb.mxu3 %v3374_v39  ;;  %v3397_v26 = vld [vmem:[#allocation38_spill] sm:$0xff] }
 0x2a6   :  { %1211 = vmatpush.bf16.msrb.mxu0 %v3375_v47  ;;  %1224 = vmatpush.bf16.msrb.mxu1 %v3376_v42 }
 0x2a7   :  { %1237 = vmatpush.bf16.msrb.mxu2 %v3377_v11  ;;  %1250 = vmatpush.bf16.msrb.mxu3 %v3378_v41  ;;  %v3395_v41 = vld [vmem:[#allocation36_spill] sm:$0xff]  ;;  %v3396_v11 = vld [vmem:[#allocation37_spill] sm:$0xff] }
 0x2aa   :  { %1212 = vmatpush.bf16.msrb.mxu0 %v3379_v13  ;;  %1225 = vmatpush.bf16.msrb.mxu1 %v3380_v0 }
 0x2ab   :  { %1238 = vmatpush.bf16.msrb.mxu2 %v3381_v15  ;;  %1251 = vmatpush.bf16.msrb.mxu3 %v3382_v4 }
 0x2ae   :  { %1213 = vmatpush.bf16.msrb.mxu0 %v3383_v10  ;;  %1226 = vmatpush.bf16.msrb.mxu1 %v3384_v63  ;;  %v3394_v10 = vld [vmem:[#allocation35_spill] sm:$0xff] }
 0x2af   :  { %1239 = vmatpush.bf16.msrb.mxu2 %v3385_v49  ;;  %1252 = vmatpush.bf16.msrb.mxu3 %v3386_v48 }
 0x2b2   :  { %1214 = vmatpush.bf16.msrb.mxu0 %v3387_v53  ;;  %1227 = vmatpush.bf16.msrb.mxu1 %v3388_v31 }
 0x2b3   :  { %1240 = vmatpush.bf16.msrb.mxu2 %v3389_v32  ;;  %1253 = vmatpush.bf16.msrb.mxu3 %v3390_v37 }
 0x2b6   :  { %1215 = vmatpush.bf16.msrb.mxu0 %v3391_v1  ;;  %1228 = vmatpush.bf16.msrb.mxu1 %v3392_v36 }
 0x2b7   :  { %1241 = vmatpush.bf16.msrb.mxu2 %v3393_v20  ;;  %1254 = vmatpush.bf16.msrb.mxu3 %v3394_v10 }
 0x2f5   :  { %v989_v63 = vpop.f32.mrf.mxu0  ;;  %v1002_v49 = vpop.f32.mrf.mxu1 }
 0x2fc   :  { %v1015_v4 = vpop.f32.mrf.mxu2  ;;  %v1028_v48 = vpop.f32.mrf.mxu3 }
 0x2fd   :  { %v991_v15 = vpop.f32.mrf.mxu0  ;;  %v1004_v53 = vpop.f32.mrf.mxu1 }
 0x304   :  { %v1017_v0 = vpop.f32.mrf.mxu2  ;;  %v1030_v31 = vpop.f32.mrf.mxu3 }
 0x305   :  { %v1041_v13 = vpop.f32.mrf.mxu0  ;;  %v1054_v32 = vpop.f32.mrf.mxu1 }
 0x306   :  { %v1042_v37 = vadd.f32 %v1041_v13, %v3395_v41  ;;  %v1055_v1 = vadd.f32 %v1054_v32, %v3396_v11 }
 0x308   :  { %v1084_v42 = vadd.f32 %v1042_v37, %v989_v63  ;;  %v1085_v36 = vadd.f32 %v1055_v1, %v1002_v49 }
 0x30a   :  { %v2136_v47 = vmul.f32 -1.442695, %v1084_v42  ;;  %v2137_v20 = vmul.f32 -1.442695, %v1085_v36  ;;  %v3398_v42 = vld [vmem:[#allocation39_spill] sm:$0xff] }
 0x30c   :  { %2277 = vpow2.f32 %v2136_v47  ;;  %v1067_v10 = vpop.f32.mrf.mxu2  ;;  %v1080_v39 = vpop.f32.mrf.mxu3 }
 0x30d   :  { %2279 = vpow2.f32 %v2137_v20  ;;  %v1081_v54 = vadd.f32 %v1080_v39, %v3397_v26  ;;  %v1043_v15 = vpop.f32.mrf.mxu0  ;;  %v1056_v53 = vpop.f32.mrf.mxu1  ;;  %v1068_v47 = vadd.f32 %v1067_v10, %v3398_v42 }
 0x30f   :  { %v1087_v0 = vadd.f32 %v1081_v54, %v1028_v48  ;;  %v1086_v36 = vadd.f32 %v1068_v47, %v1015_v4 }
 0x311   :  { %v2138_v31 = vmul.f32 -1.442695, %v1087_v0 }
 0x312   :  { %v2278_v30 = vpop.eup %2277 }
 0x313   :  { %v2280_v24 = vpop.eup %2279  ;;  %v1091_v40 = vadd.f32 1.0, %v2278_v30  ;;  %2281 = vpow2.f32 %v2138_v31 }
 0x314   :  { %v1110_v13 = vadd.f32 1.0, %v2280_v24  ;;  %v1082_v32 = vpop.f32.mrf.mxu3  ;;  %v1069_v63 = vpop.f32.mrf.mxu2 }
 0x315   :  { %2283 = vrcp.f32 %v1091_v40  ;;  %v1103_v53 = vand.u32 2147483648, %v1091_v40  ;;  %v1101_v0 = vand.u32 2147483647, %v1091_v40  ;;  %vm1097_vm6 = vweird.f32 %v1091_v40 }
 0x316   :  { %2285 = vrcp.f32 %v1110_v13  ;;  %v1122_v30 = vand.u32 2147483648, %v1110_v13  ;;  %v1120_v32 = vand.u32 2147483647, %v1110_v13  ;;  %vm1116_vm7 = vweird.f32 %v1110_v13 }
 0x317   :  { %v1104_v4 = vor.u32 1.1754944e-38, %v1103_v53  ;;  %vm1102_vm10 = vcmp.eq.f32.partialorder %v1101_v0, 8.507059e+37 }
 0x318   :  { %vm1121_vm11 = vcmp.eq.f32.partialorder %v1120_v32, 8.507059e+37 }
 0x319   :  { %v2282_v49 = vpop.eup %2281 }
 0x31a   :  { %v1130_v37 = vadd.f32 1.0, %v2282_v49 }
 0x31b   :  { %v2284_v1 = vpop.eup %2283 }
 0x31c   :  { %v2286_v39 = vpop.eup %2285  ;;  %v1093_v20 = vmul.f32 %v2284_v1, %v1091_v40  ;;  %2287 = vrcp.f32 %v1130_v37  ;;  %vm1098_vm4 = vweird.f32 %v2284_v1  ;;  %v1142_v53 = vand.u32 2147483648, %v1130_v37 }
 0x31d   :  { %v1112_v54 = vmul.f32 %v2286_v39, %v1110_v13  ;;  %2289 = vtanh.f32 %v1086_v36  ;;  %vm1117_vm5 = vweird.f32 %v2286_v39  ;;  %vm1099_vm8 = vmor %vm1097_vm6, %vm1098_vm4  ;;  %vm1136_vm13 = vweird.f32 %v1130_v37 }
 0x31e   :  { %v1094_v48 = vsub.f32 1.0, %v1093_v20  ;;  %vm1118_vm9 = vmor %vm1116_vm7, %vm1117_vm5  ;;  %v1123_v20 = vor.u32 1.1754944e-38, %v1122_v30  ;;  %v1143_v0 = vor.u32 1.1754944e-38, %v1142_v53  ;;  %v3415_v53 = vld [vmem:[#allocation26_spill] sm:$0xff] }
 0x31f   :  { %v1113_v15 = vsub.f32 1.0, %v1112_v54 }
 0x320   :  { %v1095_v24 = vmul.f32 %v2284_v1, %v1094_v48 }
 0x321   :  { %v1114_v31 = vmul.f32 %v2286_v39, %v1113_v15 }
 0x322   :  { %v2288_v10 = vpop.eup %2287  ;;  %v1096_v63 = vadd.f32 %v2284_v1, %v1095_v24 }
 0x323   :  { %v1115_v47 = vadd.f32 %v2286_v39, %v1114_v31  ;;  %v1132_v49 = vmul.f32 %v2288_v10, %v1130_v37  ;;  %v2290_v36 = vpop.eup %2289  ;;  %vm1137_vm12 = vweird.f32 %v2288_v10 }
 0x324   :  { %v1100_v54 = vsel %vm1099_vm8, %v2284_v1, %v1096_v63  ;;  %v1140_v1 = vand.u32 2147483647, %v1130_v37  ;;  %vm1138_vm14 = vmor %vm1136_vm13, %vm1137_vm12  ;;  %v3402_v37 = vld [vmem:[#allocation13_spill] sm:$0xff]  ;;  %v3404_v63 = vld [vmem:[#allocation15_spill] sm:$0xff] }
 0x325   :  { %v1105_v42 = vsel %vm1102_vm10, %v1104_v4, %v1100_v54  ;;  %v1119_v48 = vsel %vm1118_vm9, %v2286_v39, %v1115_v47  ;;  %v1133_v26 = vsub.f32 1.0, %v1132_v49  ;;  %v3405_v4 = vld [vmem:[#allocation16_spill] sm:$0xff]  ;;  %v3406_v47 = vld [vmem:[#allocation17_spill] sm:$0xff]  ;;  %v3407_v49 = vld [vmem:[#allocation18_spill] sm:$0xff] }
 0x326   :  { %v1124_v15 = vsel %vm1121_vm11, %v1123_v20, %v1119_v48  ;;  %v1147_v11 = vmul.f32 %v2290_v36, %v1105_v42  ;;  %vm1141_vm15 = vcmp.eq.f32.partialorder %v1140_v1, 8.507059e+37  ;;  %v3408_v20 = vld [vmem:[#allocation19_spill] sm:$0xff]  ;;  %v3409_v54 = vld [vmem:[#allocation20_spill] sm:$0xff]  ;;  %v3410_v36 = vld [vmem:[#allocation21_spill] sm:$0xff] }
 0x327   :  { %v1146_v41 = vmul.f32 %v1124_v15, %v2875_v22  ;;  %v1134_v24 = vmul.f32 %v2288_v10, %v1133_v26  ;;  %v2140_v22 = vld [vmem:[%s3204_s0 + $0x10] sm:$0xf]  ;;  %v3399_v26 = vld [vmem:[#allocation10_spill] sm:$0xff]  ;;  %v3412_v15 = vld [vmem:[#allocation23_spill] sm:$0xff] }
 0x328   :  { %v3411_v48 = vld [vmem:[#allocation22_spill] sm:$0xff]  ;;  %v3416_v1 = vld [vmem:[#allocation27_spill] sm:$0xff] }
 0x329   :  { %v2953_v40 = vadd.f32 %v1147_v11, %v1146_v41  ;;  %v1135_v13 = vadd.f32 %v2288_v10, %v1134_v24  ;;  %v3400_v11 = vld [vmem:[#allocation11_spill] sm:$0xff]  ;;  %v3401_v41 = vld [vmem:[#allocation12_spill] sm:$0xff] }
 0x32a   :  { %v3413_v24 = vld [vmem:[#allocation24_spill] sm:$0xff] }
 0x32b   :  { %2291 = vtanh.f32 %v2953_v40  ;;  %v1139_v30 = vsel %vm1138_vm14, %v2288_v10, %v1135_v13  ;;  %v3403_v10 = vld [vmem:[#allocation14_spill] sm:$0xff]  ;;  %v3414_v13 = vld [vmem:[#allocation25_spill] sm:$0xff] }
 0x32c   :  { %v1144_v31 = vsel %vm1141_vm15, %v1143_v0, %v1139_v30  ;;  %v3417_v30 = vld [vmem:[#allocation28_spill] sm:$0xff]  ;;  %v3418_v0 = vld [vmem:[#allocation29_spill] sm:$0xff] }
 0x331   :  { %v2292_v39 = vpop.eup %2291 }
 0x332   :  { %v1150_v32 = vmul.f32 %v2292_v39, %v1144_v31  ;;  %v3419_v39 = vld [vmem:[#allocation30_spill] sm:$0xff]  ;;  %v3420_v31 = vld [vmem:[#allocation31_spill] sm:$0xff] }
 0x334   :  { %v1151_v42 = vpack.c.bf16 %v1150_v32, %v1150_v32  ;;  %v3421_v32 = vld [vmem:[#allocation32_spill] sm:$0xff] }
 0x336   :  { %2139 = vst [vmem:[%s3208_s4 + $0xc] sm:$0xf] %v1151_v42  ;;  %1164 = vmatmul.bf16.vlgmr.msra.gmra.mxu0 %v1151_v42  ;;  %1177 = vmatmul.bf16.vlgmr.msra.gmra.mxu1 %v1151_v42 }
 0x337   :  { %1190 = vmatmul.bf16.vlgmr.msra.gmra.mxu2 %v1151_v42  ;;  %1203 = vmatmul.bf16.vlgmr.msra.gmra.mxu3 %v1151_v42  ;;  %v3422_v42 = vld [vmem:[#allocation33_spill] sm:$0xff] }
 0x338   :  { %1332 = vmatpush.bf16.msra.mxu0 %v2445_v3  ;;  %1345 = vmatpush.bf16.msra.mxu1 %v2447_v7 }
 0x339   :  { %1358 = vmatpush.bf16.msra.mxu2 %v2449_v8  ;;  %1371 = vmatpush.bf16.msra.mxu3 %v2452_v12 }
 0x33c   :  { %1333 = vmatpush.bf16.msra.mxu0 %v2456_v16  ;;  %1346 = vmatpush.bf16.msra.mxu1 %v2458_v17 }
 0x33d   :  { %1359 = vmatpush.bf16.msra.mxu2 %v2461_v21  ;;  %1372 = vmatpush.bf16.msra.mxu3 %v2463_v25 }
 0x340   :  { %1334 = vmatpush.bf16.msra.mxu0 %v2466_v29  ;;  %1347 = vmatpush.bf16.msra.mxu1 %v2470_v33 }
 0x341   :  { %1360 = vmatpush.bf16.msra.mxu2 %v2472_v34  ;;  %1373 = vmatpush.bf16.msra.mxu3 %v2475_v38 }
 0x344   :  { %1335 = vmatpush.bf16.msra.mxu0 %v2478_v44  ;;  %1348 = vmatpush.bf16.msra.mxu1 %v2482_v45 }
 0x345   :  { %1361 = vmatpush.bf16.msra.mxu2 %v2484_v46  ;;  %1374 = vmatpush.bf16.msra.mxu3 %v2487_v50 }
 0x346   :  { %1216 = vmatmul.bf16.vlgmr.msrb.gmra.mxu0 %v2140_v22  ;;  %1229 = vmatmul.bf16.vlgmr.msrb.gmra.mxu1 %v2140_v22 }
 0x347   :  { %1242 = vmatmul.bf16.vlgmr.msrb.gmra.mxu2 %v2140_v22  ;;  %1255 = vmatmul.bf16.vlgmr.msrb.gmra.mxu3 %v2140_v22  ;;  %v3423_v22 = vld [vmem:[#allocation34_spill] sm:$0xff] }
 0x348   :  { %1336 = vmatpush.bf16.msra.mxu0 %v2490_v56  ;;  %1349 = vmatpush.bf16.msra.mxu1 %v2494_v57 }
 0x349   :  { %1362 = vmatpush.bf16.msra.mxu2 %v2496_v58  ;;  %1375 = vmatpush.bf16.msra.mxu3 %v2499_v62 }
 0x34c   :  { %1337 = vmatpush.bf16.msra.mxu0 %v2502_v5  ;;  %1350 = vmatpush.bf16.msra.mxu1 %v2506_v6 }
 0x34d   :  { %1363 = vmatpush.bf16.msra.mxu2 %v2508_v9  ;;  %1376 = vmatpush.bf16.msra.mxu3 %v2511_v14 }
 0x350   :  { %1338 = vmatpush.bf16.msra.mxu0 %v2514_v23  ;;  %1351 = vmatpush.bf16.msra.mxu1 %v2518_v27 }
 0x351   :  { %1364 = vmatpush.bf16.msra.mxu2 %v2520_v28  ;;  %1377 = vmatpush.bf16.msra.mxu3 %v2523_v35 }
 0x354   :  { %1339 = vmatpush.bf16.msra.mxu0 %v2526_v43  ;;  %1352 = vmatpush.bf16.msra.mxu1 %v2530_v51 }
 0x355   :  { %1365 = vmatpush.bf16.msra.mxu2 %v2532_v52  ;;  %1378 = vmatpush.bf16.msra.mxu3 %v2535_v55 }
 0x358   :  { %1384 = vmatpush.bf16.msrb.mxu0 %v2537_v59  ;;  %1397 = vmatpush.bf16.msrb.mxu1 %v2539_v60 }
 0x359   :  { %1410 = vmatpush.bf16.msrb.mxu2 %v2541_v61  ;;  %1423 = vmatpush.bf16.msrb.mxu3 %v2544_v2 }
 0x35c   :  { %1385 = vmatpush.bf16.msrb.mxu0 %v2550_v18  ;;  %1398 = vmatpush.bf16.msrb.mxu1 %v2554_v19 }
 0x35d   :  { %1411 = vmatpush.bf16.msrb.mxu2 %v3399_v26  ;;  %1424 = vmatpush.bf16.msrb.mxu3 %v3400_v11 }
 0x360   :  { %1386 = vmatpush.bf16.msrb.mxu0 %v3401_v41  ;;  %1399 = vmatpush.bf16.msrb.mxu1 %v3402_v37 }
 0x361   :  { %1412 = vmatpush.bf16.msrb.mxu2 %v3403_v10  ;;  %1425 = vmatpush.bf16.msrb.mxu3 %v3404_v63  ;;  %v3427_v10 = vld [vmem:[#allocation38_spill] sm:$0xff] }
 0x364   :  { %1387 = vmatpush.bf16.msrb.mxu0 %v3405_v4  ;;  %1400 = vmatpush.bf16.msrb.mxu1 %v3406_v47 }
 0x365   :  { %1413 = vmatpush.bf16.msrb.mxu2 %v3407_v49  ;;  %1426 = vmatpush.bf16.msrb.mxu3 %v3408_v20  ;;  %v3425_v20 = vld [vmem:[#allocation36_spill] sm:$0xff]  ;;  %v3426_v49 = vld [vmem:[#allocation37_spill] sm:$0xff] }
 0x368   :  { %1388 = vmatpush.bf16.msrb.mxu0 %v3409_v54  ;;  %1401 = vmatpush.bf16.msrb.mxu1 %v3410_v36 }
 0x369   :  { %1414 = vmatpush.bf16.msrb.mxu2 %v3411_v48  ;;  %1427 = vmatpush.bf16.msrb.mxu3 %v3412_v15 }
 0x36c   :  { %1389 = vmatpush.bf16.msrb.mxu0 %v3413_v24  ;;  %1402 = vmatpush.bf16.msrb.mxu1 %v3414_v13  ;;  %v3424_v24 = vld [vmem:[#allocation35_spill] sm:$0xff] }
 0x36d   :  { %1415 = vmatpush.bf16.msrb.mxu2 %v3415_v53  ;;  %1428 = vmatpush.bf16.msrb.mxu3 %v3416_v1 }
 0x370   :  { %1390 = vmatpush.bf16.msrb.mxu0 %v3417_v30  ;;  %1403 = vmatpush.bf16.msrb.mxu1 %v3418_v0 }
 0x371   :  { %1416 = vmatpush.bf16.msrb.mxu2 %v3419_v39  ;;  %1429 = vmatpush.bf16.msrb.mxu3 %v3420_v31 }
 0x374   :  { %1391 = vmatpush.bf16.msrb.mxu0 %v3421_v32  ;;  %1404 = vmatpush.bf16.msrb.mxu1 %v3422_v42 }
 0x375   :  { %1417 = vmatpush.bf16.msrb.mxu2 %v3423_v22  ;;  %1430 = vmatpush.bf16.msrb.mxu3 %v3424_v24 }
 0x3b3   :  { %v1165_v13 = vpop.f32.mrf.mxu0  ;;  %v1178_v53 = vpop.f32.mrf.mxu1 }
 0x3ba   :  { %v1191_v15 = vpop.f32.mrf.mxu2  ;;  %v1204_v1 = vpop.f32.mrf.mxu3 }
 0x3bb   :  { %v1167_v48 = vpop.f32.mrf.mxu0  ;;  %v1180_v30 = vpop.f32.mrf.mxu1 }
 0x3c2   :  { %v1193_v36 = vpop.f32.mrf.mxu2  ;;  %v1206_v0 = vpop.f32.mrf.mxu3 }
 0x3c3   :  { %v1217_v54 = vpop.f32.mrf.mxu0  ;;  %v1230_v39 = vpop.f32.mrf.mxu1 }
 0x3c4   :  { %v1218_v31 = vadd.f32 %v1217_v54, %v3425_v20  ;;  %v1231_v32 = vadd.f32 %v1230_v39, %v3426_v49 }
 0x3c6   :  { %v1260_v47 = vadd.f32 %v1218_v31, %v1165_v13  ;;  %v1261_v42 = vadd.f32 %v1231_v32, %v1178_v53 }
 0x3c8   :  { %v2141_v4 = vmul.f32 -1.442695, %v1260_v47  ;;  %v2142_v22 = vmul.f32 -1.442695, %v1261_v42  ;;  %v3428_v47 = vld [vmem:[#allocation39_spill] sm:$0xff] }
 0x3ca   :  { %2293 = vpow2.f32 %v2141_v4  ;;  %v1243_v24 = vpop.f32.mrf.mxu2  ;;  %v1256_v63 = vpop.f32.mrf.mxu3 }
 0x3cb   :  { %2295 = vpow2.f32 %v2142_v22  ;;  %v1257_v37 = vadd.f32 %v1256_v63, %v3427_v10  ;;  %v1219_v48 = vpop.f32.mrf.mxu0  ;;  %v1232_v30 = vpop.f32.mrf.mxu1  ;;  %v1244_v4 = vadd.f32 %v1243_v24, %v3428_v47 }
 0x3cd   :  { %v1263_v36 = vadd.f32 %v1257_v37, %v1204_v1  ;;  %v1262_v42 = vadd.f32 %v1244_v4, %v1191_v15 }
 0x3cf   :  { %v2143_v0 = vmul.f32 -1.442695, %v1263_v36 }
 0x3d0   :  { %v2294_v41 = vpop.eup %2293 }
 0x3d1   :  { %v2296_v11 = vpop.eup %2295  ;;  %v1267_v26 = vadd.f32 1.0, %v2294_v41  ;;  %2297 = vpow2.f32 %v2143_v0 }
 0x3d2   :  { %v1286_v54 = vadd.f32 1.0, %v2296_v11  ;;  %v1258_v39 = vpop.f32.mrf.mxu3  ;;  %v1245_v13 = vpop.f32.mrf.mxu2 }
 0x3d3   :  { %2299 = vrcp.f32 %v1267_v26  ;;  %v1279_v30 = vand.u32 2147483648, %v1267_v26  ;;  %v1277_v36 = vand.u32 2147483647, %v1267_v26  ;;  %vm1273_vm2 = vweird.f32 %v1267_v26 }
 0x3d4   :  { %2301 = vrcp.f32 %v1286_v54  ;;  %v1298_v41 = vand.u32 2147483648, %v1286_v54  ;;  %v1296_v39 = vand.u32 2147483647, %v1286_v54  ;;  %vm1292_vm3 = vweird.f32 %v1286_v54 }
 0x3d5   :  { %v1280_v15 = vor.u32 1.1754944e-38, %v1279_v30  ;;  %vm1278_vm6 = vcmp.eq.f32.partialorder %v1277_v36, 8.507059e+37 }
 0x3d6   :  { %vm1297_vm7 = vcmp.eq.f32.partialorder %v1296_v39, 8.507059e+37 }
 0x3d7   :  { %v2298_v53 = vpop.eup %2297 }
 0x3d8   :  { %v1306_v31 = vadd.f32 1.0, %v2298_v53 }
 0x3d9   :  { %v2300_v32 = vpop.eup %2299 }
 0x3da   :  { %v2302_v63 = vpop.eup %2301  ;;  %v1269_v22 = vmul.f32 %v2300_v32, %v1267_v26  ;;  %2303 = vrcp.f32 %v1306_v31  ;;  %vm1274_vm0 = vweird.f32 %v2300_v32  ;;  %v1318_v30 = vand.u32 2147483648, %v1306_v31 }
 0x3db   :  { %v1288_v37 = vmul.f32 %v2302_v63, %v1286_v54  ;;  %2305 = vtanh.f32 %v1262_v42  ;;  %vm1293_vm1 = vweird.f32 %v2302_v63  ;;  %vm1275_vm4 = vmor %vm1273_vm2, %vm1274_vm0  ;;  %vm1312_vm9 = vweird.f32 %v1306_v31 }
 0x3dc   :  { %v1270_v1 = vsub.f32 1.0, %v1269_v22  ;;  %vm1294_vm5 = vmor %vm1292_vm3, %vm1293_vm1  ;;  %v1299_v22 = vor.u32 1.1754944e-38, %v1298_v41  ;;  %v1319_v36 = vor.u32 1.1754944e-38, %v1318_v30  ;;  %v3445_v30 = vld [vmem:[#allocation26_spill] sm:$0xff] }
 0x3dd   :  { %v1289_v48 = vsub.f32 1.0, %v1288_v37 }
 0x3de   :  { %v1271_v11 = vmul.f32 %v2300_v32, %v1270_v1 }
 0x3df   :  { %v1290_v0 = vmul.f32 %v2302_v63, %v1289_v48 }
 0x3e0   :  { %v2304_v24 = vpop.eup %2303  ;;  %v1272_v13 = vadd.f32 %v2300_v32, %v1271_v11 }
 0x3e1   :  { %v1291_v4 = vadd.f32 %v2302_v63, %v1290_v0  ;;  %v1308_v53 = vmul.f32 %v2304_v24, %v1306_v31  ;;  %v2306_v42 = vpop.eup %2305  ;;  %vm1313_vm8 = vweird.f32 %v2304_v24 }
 0x3e2   :  { %v1276_v37 = vsel %vm1275_vm4, %v2300_v32, %v1272_v13  ;;  %v1316_v32 = vand.u32 2147483647, %v1306_v31  ;;  %vm1314_vm10 = vmor %vm1312_vm9, %vm1313_vm8  ;;  %v3432_v31 = vld [vmem:[#allocation13_spill] sm:$0xff]  ;;  %v3434_v13 = vld [vmem:[#allocation15_spill] sm:$0xff] }
 0x3e3   :  { %v1281_v47 = vsel %vm1278_vm6, %v1280_v15, %v1276_v37  ;;  %v1295_v1 = vsel %vm1294_vm5, %v2302_v63, %v1291_v4  ;;  %v1309_v10 = vsub.f32 1.0, %v1308_v53  ;;  %v3435_v15 = vld [vmem:[#allocation16_spill] sm:$0xff]  ;;  %v3436_v4 = vld [vmem:[#allocation17_spill] sm:$0xff]  ;;  %v3437_v53 = vld [vmem:[#allocation18_spill] sm:$0xff] }
 0x3e4   :  { %v1300_v48 = vsel %vm1297_vm7, %v1299_v22, %v1295_v1  ;;  %v1323_v49 = vmul.f32 %v2306_v42, %v1281_v47  ;;  %vm1317_vm11 = vcmp.eq.f32.partialorder %v1316_v32, 8.507059e+37  ;;  %v3438_v22 = vld [vmem:[#allocation19_spill] sm:$0xff]  ;;  %v3439_v37 = vld [vmem:[#allocation20_spill] sm:$0xff]  ;;  %v3440_v42 = vld [vmem:[#allocation21_spill] sm:$0xff] }
 0x3e5   :  { %v1322_v20 = vmul.f32 %v1300_v48, %v2953_v40  ;;  %v1310_v11 = vmul.f32 %v2304_v24, %v1309_v10  ;;  %v2145_v40 = vld [vmem:[%s3204_s0 + $0x14] sm:$0xf]  ;;  %v3429_v10 = vld [vmem:[#allocation10_spill] sm:$0xff]  ;;  %v3442_v48 = vld [vmem:[#allocation23_spill] sm:$0xff] }
 0x3e6   :  { %v3441_v1 = vld [vmem:[#allocation22_spill] sm:$0xff]  ;;  %v3446_v32 = vld [vmem:[#allocation27_spill] sm:$0xff] }
 0x3e7   :  { %v3031_v26 = vadd.f32 %v1323_v49, %v1322_v20  ;;  %v1311_v54 = vadd.f32 %v2304_v24, %v1310_v11  ;;  %v3430_v49 = vld [vmem:[#allocation11_spill] sm:$0xff]  ;;  %v3431_v20 = vld [vmem:[#allocation12_spill] sm:$0xff] }
 0x3e8   :  { %v3443_v11 = vld [vmem:[#allocation24_spill] sm:$0xff] }
 0x3e9   :  { %2307 = vtanh.f32 %v3031_v26  ;;  %v1315_v41 = vsel %vm1314_vm10, %v2304_v24, %v1311_v54  ;;  %v3433_v24 = vld [vmem:[#allocation14_spill] sm:$0xff]  ;;  %v3444_v54 = vld [vmem:[#allocation25_spill] sm:$0xff] }
 0x3ea   :  { %v1320_v0 = vsel %vm1317_vm11, %v1319_v36, %v1315_v41  ;;  %v3447_v41 = vld [vmem:[#allocation28_spill] sm:$0xff]  ;;  %v3448_v36 = vld [vmem:[#allocation29_spill] sm:$0xff] }
 0x3ef   :  { %v2308_v63 = vpop.eup %2307 }
 0x3f0   :  { %v1326_v39 = vmul.f32 %v2308_v63, %v1320_v0  ;;  %v3449_v63 = vld [vmem:[#allocation30_spill] sm:$0xff]  ;;  %v3450_v0 = vld [vmem:[#allocation31_spill] sm:$0xff] }
 0x3f2   :  { %v1327_v47 = vpack.c.bf16 %v1326_v39, %v1326_v39  ;;  %v3451_v39 = vld [vmem:[#allocation32_spill] sm:$0xff] }
 0x3f4   :  { %2144 = vst [vmem:[%s3208_s4 + $0x10] sm:$0xf] %v1327_v47  ;;  %1340 = vmatmul.bf16.vlgmr.msra.gmra.mxu0 %v1327_v47  ;;  %1353 = vmatmul.bf16.vlgmr.msra.gmra.mxu1 %v1327_v47 }
 0x3f5   :  { %1366 = vmatmul.bf16.vlgmr.msra.gmra.mxu2 %v1327_v47  ;;  %1379 = vmatmul.bf16.vlgmr.msra.gmra.mxu3 %v1327_v47  ;;  %v3452_v47 = vld [vmem:[#allocation33_spill] sm:$0xff] }
 0x3f6   :  { %1508 = vmatpush.bf16.msra.mxu0 %v2445_v3  ;;  %1521 = vmatpush.bf16.msra.mxu1 %v2447_v7 }
 0x3f7   :  { %1534 = vmatpush.bf16.msra.mxu2 %v2449_v8  ;;  %1547 = vmatpush.bf16.msra.mxu3 %v2452_v12 }
 0x3fa   :  { %1509 = vmatpush.bf16.msra.mxu0 %v2456_v16  ;;  %1522 = vmatpush.bf16.msra.mxu1 %v2458_v17 }
 0x3fb   :  { %1535 = vmatpush.bf16.msra.mxu2 %v2461_v21  ;;  %1548 = vmatpush.bf16.msra.mxu3 %v2463_v25 }
 0x3fe   :  { %1510 = vmatpush.bf16.msra.mxu0 %v2466_v29  ;;  %1523 = vmatpush.bf16.msra.mxu1 %v2470_v33 }
 0x3ff   :  { %1536 = vmatpush.bf16.msra.mxu2 %v2472_v34  ;;  %1549 = vmatpush.bf16.msra.mxu3 %v2475_v38 }
 0x402   :  { %1511 = vmatpush.bf16.msra.mxu0 %v2478_v44  ;;  %1524 = vmatpush.bf16.msra.mxu1 %v2482_v45 }
 0x403   :  { %1537 = vmatpush.bf16.msra.mxu2 %v2484_v46  ;;  %1550 = vmatpush.bf16.msra.mxu3 %v2487_v50 }
 0x404   :  { %1392 = vmatmul.bf16.vlgmr.msrb.gmra.mxu0 %v2145_v40  ;;  %1405 = vmatmul.bf16.vlgmr.msrb.gmra.mxu1 %v2145_v40 }
 0x405   :  { %1418 = vmatmul.bf16.vlgmr.msrb.gmra.mxu2 %v2145_v40  ;;  %1431 = vmatmul.bf16.vlgmr.msrb.gmra.mxu3 %v2145_v40  ;;  %v3453_v40 = vld [vmem:[#allocation34_spill] sm:$0xff] }
 0x406   :  { %1512 = vmatpush.bf16.msra.mxu0 %v2490_v56  ;;  %1525 = vmatpush.bf16.msra.mxu1 %v2494_v57 }
 0x407   :  { %1538 = vmatpush.bf16.msra.mxu2 %v2496_v58  ;;  %1551 = vmatpush.bf16.msra.mxu3 %v2499_v62 }
 0x40a   :  { %1513 = vmatpush.bf16.msra.mxu0 %v2502_v5  ;;  %1526 = vmatpush.bf16.msra.mxu1 %v2506_v6 }
 0x40b   :  { %1539 = vmatpush.bf16.msra.mxu2 %v2508_v9  ;;  %1552 = vmatpush.bf16.msra.mxu3 %v2511_v14 }
 0x40e   :  { %1514 = vmatpush.bf16.msra.mxu0 %v2514_v23  ;;  %1527 = vmatpush.bf16.msra.mxu1 %v2518_v27 }
 0x40f   :  { %1540 = vmatpush.bf16.msra.mxu2 %v2520_v28  ;;  %1553 = vmatpush.bf16.msra.mxu3 %v2523_v35 }
 0x412   :  { %1515 = vmatpush.bf16.msra.mxu0 %v2526_v43  ;;  %1528 = vmatpush.bf16.msra.mxu1 %v2530_v51 }
 0x413   :  { %1541 = vmatpush.bf16.msra.mxu2 %v2532_v52  ;;  %1554 = vmatpush.bf16.msra.mxu3 %v2535_v55 }
 0x416   :  { %1560 = vmatpush.bf16.msrb.mxu0 %v2537_v59  ;;  %1573 = vmatpush.bf16.msrb.mxu1 %v2539_v60 }
 0x417   :  { %1586 = vmatpush.bf16.msrb.mxu2 %v2541_v61  ;;  %1599 = vmatpush.bf16.msrb.mxu3 %v2544_v2 }
 0x41a   :  { %1561 = vmatpush.bf16.msrb.mxu0 %v2550_v18  ;;  %1574 = vmatpush.bf16.msrb.mxu1 %v2554_v19 }
 0x41b   :  { %1587 = vmatpush.bf16.msrb.mxu2 %v3429_v10  ;;  %1600 = vmatpush.bf16.msrb.mxu3 %v3430_v49 }
 0x41e   :  { %1562 = vmatpush.bf16.msrb.mxu0 %v3431_v20  ;;  %1575 = vmatpush.bf16.msrb.mxu1 %v3432_v31 }
 0x41f   :  { %1588 = vmatpush.bf16.msrb.mxu2 %v3433_v24  ;;  %1601 = vmatpush.bf16.msrb.mxu3 %v3434_v13  ;;  %v3457_v24 = vld [vmem:[#allocation38_spill] sm:$0xff] }
 0x422   :  { %1563 = vmatpush.bf16.msrb.mxu0 %v3435_v15  ;;  %1576 = vmatpush.bf16.msrb.mxu1 %v3436_v4 }
 0x423   :  { %1589 = vmatpush.bf16.msrb.mxu2 %v3437_v53  ;;  %1602 = vmatpush.bf16.msrb.mxu3 %v3438_v22  ;;  %v3455_v22 = vld [vmem:[#allocation36_spill] sm:$0xff]  ;;  %v3456_v53 = vld [vmem:[#allocation37_spill] sm:$0xff] }
 0x426   :  { %1564 = vmatpush.bf16.msrb.mxu0 %v3439_v37  ;;  %1577 = vmatpush.bf16.msrb.mxu1 %v3440_v42 }
 0x427   :  { %1590 = vmatpush.bf16.msrb.mxu2 %v3441_v1  ;;  %1603 = vmatpush.bf16.msrb.mxu3 %v3442_v48 }
 0x42a   :  { %1565 = vmatpush.bf16.msrb.mxu0 %v3443_v11  ;;  %1578 = vmatpush.bf16.msrb.mxu1 %v3444_v54  ;;  %v3454_v11 = vld [vmem:[#allocation35_spill] sm:$0xff] }
 0x42b   :  { %1591 = vmatpush.bf16.msrb.mxu2 %v3445_v30  ;;  %1604 = vmatpush.bf16.msrb.mxu3 %v3446_v32 }
 0x42e   :  { %1566 = vmatpush.bf16.msrb.mxu0 %v3447_v41  ;;  %1579 = vmatpush.bf16.msrb.mxu1 %v3448_v36 }
 0x42f   :  { %1592 = vmatpush.bf16.msrb.mxu2 %v3449_v63  ;;  %1605 = vmatpush.bf16.msrb.mxu3 %v3450_v0 }
 0x432   :  { %1567 = vmatpush.bf16.msrb.mxu0 %v3451_v39  ;;  %1580 = vmatpush.bf16.msrb.mxu1 %v3452_v47 }
 0x433   :  { %1593 = vmatpush.bf16.msrb.mxu2 %v3453_v40  ;;  %1606 = vmatpush.bf16.msrb.mxu3 %v3454_v11 }
 0x471   :  { %v1341_v54 = vpop.f32.mrf.mxu0  ;;  %v1354_v30 = vpop.f32.mrf.mxu1 }
 0x478   :  { %v1367_v48 = vpop.f32.mrf.mxu2  ;;  %v1380_v32 = vpop.f32.mrf.mxu3 }
 0x479   :  { %v1343_v1 = vpop.f32.mrf.mxu0  ;;  %v1356_v41 = vpop.f32.mrf.mxu1 }
 0x480   :  { %v1369_v42 = vpop.f32.mrf.mxu2  ;;  %v1382_v36 = vpop.f32.mrf.mxu3 }
 0x481   :  { %v1393_v37 = vpop.f32.mrf.mxu0  ;;  %v1406_v63 = vpop.f32.mrf.mxu1 }
 0x482   :  { %v1394_v0 = vadd.f32 %v1393_v37, %v3455_v22  ;;  %v1407_v39 = vadd.f32 %v1406_v63, %v3456_v53 }
 0x484   :  { %v1436_v4 = vadd.f32 %v1394_v0, %v1341_v54  ;;  %v1437_v47 = vadd.f32 %v1407_v39, %v1354_v30 }
 0x486   :  { %v2146_v15 = vmul.f32 -1.442695, %v1436_v4  ;;  %v2147_v40 = vmul.f32 -1.442695, %v1437_v47  ;;  %v3458_v4 = vld [vmem:[#allocation39_spill] sm:$0xff] }
 0x488   :  { %2309 = vpow2.f32 %v2146_v15  ;;  %v1419_v11 = vpop.f32.mrf.mxu2  ;;  %v1432_v13 = vpop.f32.mrf.mxu3 }
 0x489   :  { %2311 = vpow2.f32 %v2147_v40  ;;  %v1433_v31 = vadd.f32 %v1432_v13, %v3457_v24  ;;  %v1395_v1 = vpop.f32.mrf.mxu0  ;;  %v1408_v41 = vpop.f32.mrf.mxu1  ;;  %v1420_v15 = vadd.f32 %v1419_v11, %v3458_v4 }
 0x48b   :  { %v1439_v42 = vadd.f32 %v1433_v31, %v1380_v32  ;;  %v1438_v47 = vadd.f32 %v1420_v15, %v1367_v48 }
 0x48d   :  { %v2148_v36 = vmul.f32 -1.442695, %v1439_v42 }
 0x48e   :  { %v2310_v20 = vpop.eup %2309 }
 0x48f   :  { %v2312_v49 = vpop.eup %2311  ;;  %v1443_v10 = vadd.f32 1.0, %v2310_v20  ;;  %2313 = vpow2.f32 %v2148_v36 }
 0x490   :  { %v1462_v37 = vadd.f32 1.0, %v2312_v49  ;;  %v1434_v63 = vpop.f32.mrf.mxu3  ;;  %v1421_v54 = vpop.f32.mrf.mxu2 }
 0x491   :  { %2315 = vrcp.f32 %v1443_v10  ;;  %v1455_v41 = vand.u32 2147483648, %v1443_v10  ;;  %v1453_v42 = vand.u32 2147483647, %v1443_v10  ;;  %vm1449_vm14 = vweird.f32 %v1443_v10 }
 0x492   :  { %2317 = vrcp.f32 %v1462_v37  ;;  %v1474_v20 = vand.u32 2147483648, %v1462_v37  ;;  %v1472_v63 = vand.u32 2147483647, %v1462_v37  ;;  %vm1468_vm15 = vweird.f32 %v1462_v37 }
 0x493   :  { %v1456_v48 = vor.u32 1.1754944e-38, %v1455_v41  ;;  %vm1454_vm2 = vcmp.eq.f32.partialorder %v1453_v42, 8.507059e+37 }
 0x494   :  { %vm1473_vm3 = vcmp.eq.f32.partialorder %v1472_v63, 8.507059e+37 }
 0x495   :  { %v2314_v30 = vpop.eup %2313 }
 0x496   :  { %v1482_v0 = vadd.f32 1.0, %v2314_v30 }
 0x497   :  { %v2316_v39 = vpop.eup %2315 }
 0x498   :  { %v2318_v13 = vpop.eup %2317  ;;  %v1445_v40 = vmul.f32 %v2316_v39, %v1443_v10  ;;  %2319 = vrcp.f32 %v1482_v0  ;;  %vm1450_vm12 = vweird.f32 %v2316_v39  ;;  %v1494_v41 = vand.u32 2147483648, %v1482_v0 }
 0x499   :  { %v1464_v31 = vmul.f32 %v2318_v13, %v1462_v37  ;;  %2321 = vtanh.f32 %v1438_v47  ;;  %vm1469_vm13 = vweird.f32 %v2318_v13  ;;  %vm1451_vm0 = vmor %vm1449_vm14, %vm1450_vm12  ;;  %vm1488_vm5 = vweird.f32 %v1482_v0 }
 0x49a   :  { %v1446_v32 = vsub.f32 1.0, %v1445_v40  ;;  %vm1470_vm1 = vmor %vm1468_vm15, %vm1469_vm13  ;;  %v1475_v40 = vor.u32 1.1754944e-38, %v1474_v20  ;;  %v1495_v42 = vor.u32 1.1754944e-38, %v1494_v41 }
 0x49b   :  { %v1465_v1 = vsub.f32 1.0, %v1464_v31 }
 0x49c   :  { %v1447_v49 = vmul.f32 %v2316_v39, %v1446_v32 }
 0x49d   :  { %v1466_v36 = vmul.f32 %v2318_v13, %v1465_v1 }
 0x49e   :  { %v2320_v11 = vpop.eup %2319  ;;  %v1448_v54 = vadd.f32 %v2316_v39, %v1447_v49 }
 0x49f   :  { %v1467_v15 = vadd.f32 %v2318_v13, %v1466_v36  ;;  %v1484_v30 = vmul.f32 %v2320_v11, %v1482_v0  ;;  %v2322_v47 = vpop.eup %2321  ;;  %vm1489_vm4 = vweird.f32 %v2320_v11 }
 0x4a0   :  { %v1452_v31 = vsel %vm1451_vm0, %v2316_v39, %v1448_v54  ;;  %v1492_v39 = vand.u32 2147483647, %v1482_v0  ;;  %vm1490_vm6 = vmor %vm1488_vm5, %vm1489_vm4 }
 0x4a1   :  { %v1457_v4 = vsel %vm1454_vm2, %v1456_v48, %v1452_v31  ;;  %v1471_v32 = vsel %vm1470_vm1, %v2318_v13, %v1467_v15  ;;  %v1485_v24 = vsub.f32 1.0, %v1484_v30  ;;  %v3487_v30 = vld [vmem:[#allocation38_spill] sm:$0xff] }
 0x4a2   :  { %v1476_v1 = vsel %vm1473_vm3, %v1475_v40, %v1471_v32  ;;  %v1499_v53 = vmul.f32 %v2322_v47, %v1457_v4  ;;  %vm1493_vm7 = vcmp.eq.f32.partialorder %v1492_v39, 8.507059e+37 }
 0x4a3   :  { %v1498_v22 = vmul.f32 %v1476_v1, %v3031_v26  ;;  %v1486_v49 = vmul.f32 %v2320_v11, %v1485_v24  ;;  %v3486_v24 = vld [vmem:[#allocation37_spill] sm:$0xff] }
 0x4a5   :  { %v3109_v10 = vadd.f32 %v1499_v53, %v1498_v22  ;;  %v1487_v37 = vadd.f32 %v2320_v11, %v1486_v49 }
 0x4a7   :  { %2323 = vtanh.f32 %v3109_v10  ;;  %v1491_v20 = vsel %vm1490_vm6, %v2320_v11, %v1487_v37 }
 0x4a8   :  { %v1496_v36 = vsel %vm1493_vm7, %v1495_v42, %v1491_v20 }
 0x4ad   :  { %v2324_v13 = vpop.eup %2323 }
 0x4ae   :  { %v1502_v63 = vmul.f32 %v2324_v13, %v1496_v36  ;;  %v3488_v13 = vld [vmem:[#allocation39_spill] sm:$0xff] }
 0x4b0   :  { %v1503_v4 = vpack.c.bf16 %v1502_v63, %v1502_v63 }
 0x4b2   :  { %2149 = vst [vmem:[%s3208_s4 + $0x14] sm:$0xf] %v1503_v4  ;;  %1516 = vmatmul.bf16.vlgmr.msra.gmra.mxu0 %v1503_v4  ;;  %1529 = vmatmul.bf16.vlgmr.msra.gmra.mxu1 %v1503_v4 }
 0x4b3   :  { %1542 = vmatmul.bf16.vlgmr.msra.gmra.mxu2 %v1503_v4  ;;  %1555 = vmatmul.bf16.vlgmr.msra.gmra.mxu3 %v1503_v4 }
 0x4b4   :  { %1684 = vmatpush.bf16.msra.mxu0 %v2445_v3  ;;  %1697 = vmatpush.bf16.msra.mxu1 %v2447_v7  ;;  %v2150_v3 = vld [vmem:[%s3204_s0 + $0x18] sm:$0xf]  ;;  %v3459_v7 = vld [vmem:[#allocation10_spill] sm:$0xff] }
 0x4b5   :  { %1710 = vmatpush.bf16.msra.mxu2 %v2449_v8  ;;  %1723 = vmatpush.bf16.msra.mxu3 %v2452_v12  ;;  %v3460_v8 = vld [vmem:[#allocation11_spill] sm:$0xff]  ;;  %v3461_v12 = vld [vmem:[#allocation12_spill] sm:$0xff] }
 0x4b8   :  { %1685 = vmatpush.bf16.msra.mxu0 %v2456_v16  ;;  %1698 = vmatpush.bf16.msra.mxu1 %v2458_v17  ;;  %v3462_v16 = vld [vmem:[#allocation13_spill] sm:$0xff]  ;;  %v3463_v17 = vld [vmem:[#allocation14_spill] sm:$0xff] }
 0x4b9   :  { %1711 = vmatpush.bf16.msra.mxu2 %v2461_v21  ;;  %1724 = vmatpush.bf16.msra.mxu3 %v2463_v25  ;;  %v3464_v21 = vld [vmem:[#allocation15_spill] sm:$0xff]  ;;  %v3465_v25 = vld [vmem:[#allocation16_spill] sm:$0xff] }
 0x4bc   :  { %1686 = vmatpush.bf16.msra.mxu0 %v2466_v29  ;;  %1699 = vmatpush.bf16.msra.mxu1 %v2470_v33  ;;  %v3466_v29 = vld [vmem:[#allocation17_spill] sm:$0xff]  ;;  %v3467_v33 = vld [vmem:[#allocation18_spill] sm:$0xff] }
 0x4bd   :  { %1712 = vmatpush.bf16.msra.mxu2 %v2472_v34  ;;  %1725 = vmatpush.bf16.msra.mxu3 %v2475_v38  ;;  %v3468_v34 = vld [vmem:[#allocation19_spill] sm:$0xff]  ;;  %v3469_v38 = vld [vmem:[#allocation20_spill] sm:$0xff] }
 0x4c0   :  { %1687 = vmatpush.bf16.msra.mxu0 %v2478_v44  ;;  %1700 = vmatpush.bf16.msra.mxu1 %v2482_v45  ;;  %v3470_v44 = vld [vmem:[#allocation21_spill] sm:$0xff]  ;;  %v3471_v45 = vld [vmem:[#allocation22_spill] sm:$0xff] }
 0x4c1   :  { %1713 = vmatpush.bf16.msra.mxu2 %v2484_v46  ;;  %1726 = vmatpush.bf16.msra.mxu3 %v2487_v50  ;;  %v3472_v46 = vld [vmem:[#allocation23_spill] sm:$0xff]  ;;  %v3473_v50 = vld [vmem:[#allocation24_spill] sm:$0xff] }
 0x4c2   :  { %1568 = vmatmul.bf16.vlgmr.msrb.gmra.mxu0 %v2150_v3  ;;  %1581 = vmatmul.bf16.vlgmr.msrb.gmra.mxu1 %v2150_v3 }
 0x4c3   :  { %1594 = vmatmul.bf16.vlgmr.msrb.gmra.mxu2 %v2150_v3  ;;  %1607 = vmatmul.bf16.vlgmr.msrb.gmra.mxu3 %v2150_v3 }
 0x4c4   :  { %1688 = vmatpush.bf16.msra.mxu0 %v2490_v56  ;;  %1701 = vmatpush.bf16.msra.mxu1 %v2494_v57  ;;  %v3474_v56 = vld [vmem:[#allocation25_spill] sm:$0xff]  ;;  %v3475_v57 = vld [vmem:[#allocation26_spill] sm:$0xff] }
 0x4c5   :  { %1714 = vmatpush.bf16.msra.mxu2 %v2496_v58  ;;  %1727 = vmatpush.bf16.msra.mxu3 %v2499_v62  ;;  %v3476_v58 = vld [vmem:[#allocation27_spill] sm:$0xff]  ;;  %v3477_v62 = vld [vmem:[#allocation28_spill] sm:$0xff] }
 0x4c8   :  { %1689 = vmatpush.bf16.msra.mxu0 %v2502_v5  ;;  %1702 = vmatpush.bf16.msra.mxu1 %v2506_v6  ;;  %v3478_v5 = vld [vmem:[#allocation29_spill] sm:$0xff]  ;;  %v3479_v6 = vld [vmem:[#allocation30_spill] sm:$0xff] }
 0x4c9   :  { %1715 = vmatpush.bf16.msra.mxu2 %v2508_v9  ;;  %1728 = vmatpush.bf16.msra.mxu3 %v2511_v14  ;;  %v3480_v9 = vld [vmem:[#allocation31_spill] sm:$0xff]  ;;  %v3481_v14 = vld [vmem:[#allocation32_spill] sm:$0xff] }
 0x4cc   :  { %1690 = vmatpush.bf16.msra.mxu0 %v2514_v23  ;;  %1703 = vmatpush.bf16.msra.mxu1 %v2518_v27  ;;  %v3482_v23 = vld [vmem:[#allocation33_spill] sm:$0xff]  ;;  %v3483_v27 = vld [vmem:[#allocation34_spill] sm:$0xff] }
 0x4cd   :  { %1716 = vmatpush.bf16.msra.mxu2 %v2520_v28  ;;  %1729 = vmatpush.bf16.msra.mxu3 %v2523_v35  ;;  %v3484_v28 = vld [vmem:[#allocation35_spill] sm:$0xff] }
 0x4d0   :  { %1691 = vmatpush.bf16.msra.mxu0 %v2526_v43  ;;  %1704 = vmatpush.bf16.msra.mxu1 %v2530_v51 }
 0x4d1   :  { %1717 = vmatpush.bf16.msra.mxu2 %v2532_v52  ;;  %1730 = vmatpush.bf16.msra.mxu3 %v2535_v55 }
 0x4d4   :  { %1736 = vmatpush.bf16.msrb.mxu0 %v2537_v59  ;;  %1749 = vmatpush.bf16.msrb.mxu1 %v2539_v60 }
 0x4d5   :  { %1762 = vmatpush.bf16.msrb.mxu2 %v2541_v61  ;;  %1775 = vmatpush.bf16.msrb.mxu3 %v2544_v2 }
 0x4d8   :  { %1737 = vmatpush.bf16.msrb.mxu0 %v2550_v18  ;;  %1750 = vmatpush.bf16.msrb.mxu1 %v2554_v19  ;;  %v3485_v19 = vld [vmem:[#allocation36_spill] sm:$0xff] }
 0x4d9   :  { %1763 = vmatpush.bf16.msrb.mxu2 %v3459_v7  ;;  %1776 = vmatpush.bf16.msrb.mxu3 %v3460_v8 }
 0x4dc   :  { %1738 = vmatpush.bf16.msrb.mxu0 %v3461_v12  ;;  %1751 = vmatpush.bf16.msrb.mxu1 %v3462_v16 }
 0x4dd   :  { %1764 = vmatpush.bf16.msrb.mxu2 %v3463_v17  ;;  %1777 = vmatpush.bf16.msrb.mxu3 %v3464_v21 }
 0x4e0   :  { %1739 = vmatpush.bf16.msrb.mxu0 %v3465_v25  ;;  %1752 = vmatpush.bf16.msrb.mxu1 %v3466_v29 }
 0x4e1   :  { %1765 = vmatpush.bf16.msrb.mxu2 %v3467_v33  ;;  %1778 = vmatpush.bf16.msrb.mxu3 %v3468_v34 }
 0x4e4   :  { %1740 = vmatpush.bf16.msrb.mxu0 %v3469_v38  ;;  %1753 = vmatpush.bf16.msrb.mxu1 %v3470_v44 }
 0x4e5   :  { %1766 = vmatpush.bf16.msrb.mxu2 %v3471_v45  ;;  %1779 = vmatpush.bf16.msrb.mxu3 %v3472_v46 }
 0x4e8   :  { %1741 = vmatpush.bf16.msrb.mxu0 %v3473_v50  ;;  %1754 = vmatpush.bf16.msrb.mxu1 %v3474_v56 }
 0x4e9   :  { %1767 = vmatpush.bf16.msrb.mxu2 %v3475_v57  ;;  %1780 = vmatpush.bf16.msrb.mxu3 %v3476_v58 }
 0x4ec   :  { %1742 = vmatpush.bf16.msrb.mxu0 %v3477_v62  ;;  %1755 = vmatpush.bf16.msrb.mxu1 %v3478_v5 }
 0x4ed   :  { %1768 = vmatpush.bf16.msrb.mxu2 %v3479_v6  ;;  %1781 = vmatpush.bf16.msrb.mxu3 %v3480_v9 }
 0x4f0   :  { %1743 = vmatpush.bf16.msrb.mxu0 %v3481_v14  ;;  %1756 = vmatpush.bf16.msrb.mxu1 %v3482_v23 }
 0x4f1   :  { %1769 = vmatpush.bf16.msrb.mxu2 %v3483_v27  ;;  %1782 = vmatpush.bf16.msrb.mxu3 %v3484_v28 }
 0x52f   :  { %v1517_v35 = vpop.f32.mrf.mxu0  ;;  %v1530_v43 = vpop.f32.mrf.mxu1 }
 0x536   :  { %v1543_v51 = vpop.f32.mrf.mxu2  ;;  %v1556_v52 = vpop.f32.mrf.mxu3 }
 0x537   :  { %v1519_v55 = vpop.f32.mrf.mxu0  ;;  %v1532_v59 = vpop.f32.mrf.mxu1 }
 0x53e   :  { %v1545_v60 = vpop.f32.mrf.mxu2  ;;  %v1558_v61 = vpop.f32.mrf.mxu3 }
 0x53f   :  { %v1569_v2 = vpop.f32.mrf.mxu0  ;;  %v1582_v18 = vpop.f32.mrf.mxu1 }
 0x540   :  { %v1570_v26 = vadd.f32 %v1569_v2, %v3485_v19  ;;  %v1583_v53 = vadd.f32 %v1582_v18, %v3486_v24 }
 0x542   :  { %v1612_v22 = vadd.f32 %v1570_v26, %v1517_v35  ;;  %v1613_v0 = vadd.f32 %v1583_v53, %v1530_v43 }
 0x544   :  { %v2151_v11 = vmul.f32 -1.442695, %v1612_v22  ;;  %v2152_v54 = vmul.f32 -1.442695, %v1613_v0 }
 0x546   :  { %2325 = vpow2.f32 %v2151_v11  ;;  %v1595_v48 = vpop.f32.mrf.mxu2  ;;  %v1608_v15 = vpop.f32.mrf.mxu3 }
 0x547   :  { %2327 = vpow2.f32 %v2152_v54  ;;  %v1609_v40 = vadd.f32 %v1608_v15, %v3487_v30  ;;  %v1571_v31 = vpop.f32.mrf.mxu0  ;;  %v1584_v47 = vpop.f32.mrf.mxu1  ;;  %v1596_v36 = vadd.f32 %v1595_v48, %v3488_v13 }
 0x549   :  { %v1615_v32 = vadd.f32 %v1609_v40, %v1556_v52  ;;  %v1614_v7 = vadd.f32 %v1596_v36, %v1543_v51 }
 0x54b   :  { %v2153_v1 = vmul.f32 -1.442695, %v1615_v32 }
 0x54c   :  { %v2326_v49 = vpop.eup %2325 }
 0x54d   :  { %v2328_v37 = vpop.eup %2327  ;;  %v1619_v41 = vadd.f32 1.0, %v2326_v49  ;;  %2329 = vpow2.f32 %v2153_v1 }
 0x54e   :  { %v1638_v39 = vadd.f32 1.0, %v2328_v37  ;;  %v1610_v20 = vpop.f32.mrf.mxu3  ;;  %v1597_v42 = vpop.f32.mrf.mxu2 }
 0x54f   :  { %2331 = vrcp.f32 %v1619_v41  ;;  %v1631_v25 = vand.u32 2147483648, %v1619_v41  ;;  %v1629_v34 = vand.u32 2147483647, %v1619_v41  ;;  %vm1625_vm10 = vweird.f32 %v1619_v41 }
 0x550   :  { %2333 = vrcp.f32 %v1638_v39  ;;  %v1650_v29 = vand.u32 2147483648, %v1638_v39  ;;  %v1648_v44 = vand.u32 2147483647, %v1638_v39  ;;  %vm1644_vm11 = vweird.f32 %v1638_v39 }
 0x551   :  { %v1632_v50 = vor.u32 1.1754944e-38, %v1631_v25  ;;  %vm1630_vm14 = vcmp.eq.f32.partialorder %v1629_v34, 8.507059e+37 }
 0x552   :  { %v1651_v58 = vor.u32 1.1754944e-38, %v1650_v29  ;;  %vm1649_vm15 = vcmp.eq.f32.partialorder %v1648_v44, 8.507059e+37 }
 0x553   :  { %v2330_v63 = vpop.eup %2329 }
 0x554   :  { %v1658_v4 = vadd.f32 1.0, %v2330_v63 }
 0x555   :  { %v2332_v3 = vpop.eup %2331 }
 0x556   :  { %v2334_v8 = vpop.eup %2333  ;;  %v1621_v12 = vmul.f32 %v2332_v3, %v1619_v41  ;;  %2335 = vrcp.f32 %v1658_v4  ;;  %vm1626_vm8 = vweird.f32 %v2332_v3  ;;  %v1670_v52 = vand.u32 2147483648, %v1658_v4 }
 0x557   :  { %v1640_v16 = vmul.f32 %v2334_v8, %v1638_v39  ;;  %2337 = vtanh.f32 %v1614_v7  ;;  %vm1645_vm9 = vweird.f32 %v2334_v8  ;;  %vm1627_vm12 = vmor %vm1625_vm10, %vm1626_vm8  ;;  %vm1664_vm1 = vweird.f32 %v1658_v4 }
 0x558   :  { %v1622_v17 = vsub.f32 1.0, %v1621_v12  ;;  %vm1646_vm13 = vmor %vm1644_vm11, %vm1645_vm9  ;;  %v1668_v55 = vand.u32 2147483647, %v1658_v4  ;;  %v1671_v60 = vor.u32 1.1754944e-38, %v1670_v52 }
 0x559   :  { %v1641_v21 = vsub.f32 1.0, %v1640_v16 }
 0x55a   :  { %v1623_v33 = vmul.f32 %v2332_v3, %v1622_v17  ;;  %vm1669_vm3 = vcmp.eq.f32.partialorder %v1668_v55, 8.507059e+37 }
 0x55b   :  { %v1642_v38 = vmul.f32 %v2334_v8, %v1641_v21 }
 0x55c   :  { %v2336_v45 = vpop.eup %2335  ;;  %v1624_v46 = vadd.f32 %v2332_v3, %v1623_v33 }
 0x55d   :  { %v1643_v56 = vadd.f32 %v2334_v8, %v1642_v38  ;;  %v1660_v57 = vmul.f32 %v2336_v45, %v1658_v4  ;;  %v2338_v5 = vpop.eup %2337  ;;  %vm1665_vm0 = vweird.f32 %v2336_v45 }
 0x55e   :  { %v1628_v62 = vsel %vm1627_vm12, %v2332_v3, %v1624_v46  ;;  %vm1666_vm2 = vmor %vm1664_vm1, %vm1665_vm0 }
 0x55f   :  { %v1633_v6 = vsel %vm1630_vm14, %v1632_v50, %v1628_v62  ;;  %v1647_v9 = vsel %vm1646_vm13, %v2334_v8, %v1643_v56  ;;  %v1661_v14 = vsub.f32 1.0, %v1660_v57 }
 0x560   :  { %v1652_v23 = vsel %vm1649_vm15, %v1651_v58, %v1647_v9  ;;  %v1675_v27 = vmul.f32 %v2338_v5, %v1633_v6 }
 0x561   :  { %v1674_v28 = vmul.f32 %v1652_v23, %v3109_v10  ;;  %v1662_v35 = vmul.f32 %v2336_v45, %v1661_v14  ;;  %v2155_v10 = vld [vmem:[%s3204_s0 + $0x1c] sm:$0xf] }
 0x563   :  { %v3187_v43 = vadd.f32 %v1675_v27, %v1674_v28  ;;  %v1663_v51 = vadd.f32 %v2336_v45, %v1662_v35 }
 0x565   :  { %2339 = vtanh.f32 %v3187_v43  ;;  %v1667_v59 = vsel %vm1666_vm2, %v2336_v45, %v1663_v51 }
 0x566   :  { %v1672_v2 = vsel %vm1669_vm3, %v1671_v60, %v1667_v59 }
 0x56b   :  { %v2340_v61 = vpop.eup %2339 }
 0x56c   :  { %v1678_v18 = vmul.f32 %v2340_v61, %v1672_v2 }
 0x56e   :  { %v1679_v26 = vpack.c.bf16 %v1678_v18, %v1678_v18 }
 0x570   :  { %2154 = vst [vmem:[%s3208_s4 + $0x18] sm:$0xf] %v1679_v26  ;;  %1692 = vmatmul.bf16.vlgmr.msra.gmra.mxu0 %v1679_v26  ;;  %1705 = vmatmul.bf16.vlgmr.msra.gmra.mxu1 %v1679_v26 }
 0x571   :  { %1718 = vmatmul.bf16.vlgmr.msra.gmra.mxu2 %v1679_v26  ;;  %1731 = vmatmul.bf16.vlgmr.msra.gmra.mxu3 %v1679_v26 }
 0x580   :  { %1744 = vmatmul.bf16.vlgmr.msrb.gmra.mxu0 %v2155_v10  ;;  %1757 = vmatmul.bf16.vlgmr.msrb.gmra.mxu1 %v2155_v10 }
 0x581   :  { %1770 = vmatmul.bf16.vlgmr.msrb.gmra.mxu2 %v2155_v10  ;;  %1783 = vmatmul.bf16.vlgmr.msrb.gmra.mxu3 %v2155_v10 }
 0x5ed   :  { %v1693_v53 = vpop.f32.mrf.mxu0  ;;  %v1706_v22 = vpop.f32.mrf.mxu1 }
 0x5f4   :  { %v1719_v0 = vpop.f32.mrf.mxu2  ;;  %v1732_v11 = vpop.f32.mrf.mxu3 }
 0x5f5   :  { %v1695_v54 = vpop.f32.mrf.mxu0  ;;  %v1708_v48 = vpop.f32.mrf.mxu1 }
 0x5fc   :  { %v1721_v15 = vpop.f32.mrf.mxu2  ;;  %v1734_v40 = vpop.f32.mrf.mxu3 }
 0x5fd   :  { %v1745_v31 = vpop.f32.mrf.mxu0  ;;  %v1758_v47 = vpop.f32.mrf.mxu1 }
 0x5fe   :  { %v1746_v32 = vadd.f32 %v1745_v31, %v3485_v19  ;;  %v1759_v1 = vadd.f32 %v1758_v47, %v3486_v24 }
 0x600   :  { %v1788_v49 = vadd.f32 %v1746_v32, %v1693_v53  ;;  %v1789_v37 = vadd.f32 %v1759_v1, %v1706_v22 }
 0x602   :  { %v2156_v41 = vmul.f32 -1.442695, %v1788_v49  ;;  %v2157_v39 = vmul.f32 -1.442695, %v1789_v37 }
 0x604   :  { %2341 = vpow2.f32 %v2156_v41  ;;  %v1771_v20 = vpop.f32.mrf.mxu2  ;;  %v1784_v42 = vpop.f32.mrf.mxu3 }
 0x605   :  { %2343 = vpow2.f32 %v2157_v39  ;;  %v1785_v36 = vadd.f32 %v1784_v42, %v3487_v30  ;;  %v1747_v63 = vpop.f32.mrf.mxu0  ;;  %v1760_v4 = vpop.f32.mrf.mxu1  ;;  %v1772_v21 = vadd.f32 %v1771_v20, %v3488_v13 }
 0x607   :  { %v1791_v3 = vadd.f32 %v1785_v36, %v1732_v11  ;;  %v1790_v34 = vadd.f32 %v1772_v21, %v1719_v0 }
 0x609   :  { %v2158_v7 = vmul.f32 -1.442695, %v1791_v3 }
 0x60a   :  { %v2342_v8 = vpop.eup %2341 }
 0x60b   :  { %v2344_v12 = vpop.eup %2343  ;;  %v1795_v16 = vadd.f32 1.0, %v2342_v8  ;;  %2345 = vpow2.f32 %v2158_v7 }
 0x60c   :  { %v1814_v19 = vadd.f32 1.0, %v2344_v12  ;;  %v1786_v24 = vpop.f32.mrf.mxu3  ;;  %v1773_v17 = vpop.f32.mrf.mxu2 }
 0x60d   :  { %2347 = vrcp.f32 %v1795_v16  ;;  %v1807_v50 = vand.u32 2147483648, %v1795_v16  ;;  %v1805_v58 = vand.u32 2147483647, %v1795_v16  ;;  %vm1801_vm6 = vweird.f32 %v1795_v16 }
 0x60e   :  { %2349 = vrcp.f32 %v1814_v19  ;;  %v1826_v56 = vand.u32 2147483648, %v1814_v19  ;;  %v1824_v5 = vand.u32 2147483647, %v1814_v19  ;;  %vm1820_vm7 = vweird.f32 %v1814_v19 }
 0x60f   :  { %v1808_v9 = vor.u32 1.1754944e-38, %v1807_v50  ;;  %vm1806_vm10 = vcmp.eq.f32.partialorder %v1805_v58, 8.507059e+37 }
 0x610   :  { %v1827_v27 = vor.u32 1.1754944e-38, %v1826_v56  ;;  %vm1825_vm11 = vcmp.eq.f32.partialorder %v1824_v5, 8.507059e+37 }
 0x611   :  { %v2346_v25 = vpop.eup %2345 }
 0x612   :  { %v1834_v29 = vadd.f32 1.0, %v2346_v25 }
 0x613   :  { %v2348_v33 = vpop.eup %2347 }
 0x614   :  { %v2350_v30 = vpop.eup %2349  ;;  %v1797_v38 = vmul.f32 %v2348_v33, %v1795_v16  ;;  %2351 = vrcp.f32 %v1834_v29  ;;  %vm1802_vm4 = vweird.f32 %v2348_v33  ;;  %v1846_v10 = vand.u32 2147483648, %v1834_v29 }
 0x615   :  { %v1816_v44 = vmul.f32 %v2350_v30, %v1814_v19  ;;  %2353 = vtanh.f32 %v1790_v34  ;;  %vm1821_vm5 = vweird.f32 %v2350_v30  ;;  %vm1803_vm8 = vmor %vm1801_vm6, %vm1802_vm4  ;;  %vm1840_vm13 = vweird.f32 %v1834_v29 }
 0x616   :  { %v1798_v45 = vsub.f32 1.0, %v1797_v38  ;;  %vm1822_vm9 = vmor %vm1820_vm7, %vm1821_vm5  ;;  %v1844_v53 = vand.u32 2147483647, %v1834_v29  ;;  %v1847_v0 = vor.u32 1.1754944e-38, %v1846_v10 }
 0x617   :  { %v1817_v46 = vsub.f32 1.0, %v1816_v44 }
 0x618   :  { %v1799_v57 = vmul.f32 %v2348_v33, %v1798_v45  ;;  %vm1845_vm15 = vcmp.eq.f32.partialorder %v1844_v53, 8.507059e+37 }
 0x619   :  { %v1818_v62 = vmul.f32 %v2350_v30, %v1817_v46 }
 0x61a   :  { %v2352_v13 = vpop.eup %2351  ;;  %v1800_v6 = vadd.f32 %v2348_v33, %v1799_v57 }
 0x61b   :  { %v1819_v14 = vadd.f32 %v2350_v30, %v1818_v62  ;;  %v1836_v23 = vmul.f32 %v2352_v13, %v1834_v29  ;;  %v2354_v35 = vpop.eup %2353  ;;  %vm1841_vm12 = vweird.f32 %v2352_v13 }
 0x61c   :  { %v1804_v28 = vsel %vm1803_vm8, %v2348_v33, %v1800_v6  ;;  %vm1842_vm14 = vmor %vm1840_vm13, %vm1841_vm12 }
 0x61d   :  { %v1809_v51 = vsel %vm1806_vm10, %v1808_v9, %v1804_v28  ;;  %v1823_v52 = vsel %vm1822_vm9, %v2350_v30, %v1819_v14  ;;  %v1837_v55 = vsub.f32 1.0, %v1836_v23 }
 0x61e   :  { %v1828_v59 = vsel %vm1825_vm11, %v1827_v27, %v1823_v52  ;;  %v1851_v60 = vmul.f32 %v2354_v35, %v1809_v51 }
 0x61f   :  { %v1850_v61 = vmul.f32 %v1828_v59, %v3187_v43  ;;  %v1838_v2 = vmul.f32 %v2352_v13, %v1837_v55 }
 0x621   :  { %v1852_v18 = vadd.f32 %v1851_v60, %v1850_v61  ;;  %v1839_v26 = vadd.f32 %v2352_v13, %v1838_v2 }
 0x623   :  { %2355 = vtanh.f32 %v1852_v18  ;;  %v1843_v22 = vsel %vm1842_vm14, %v2352_v13, %v1839_v26 }
 0x624   :  { %v1848_v54 = vsel %vm1845_vm15, %v1847_v0, %v1843_v22 }
 0x629   :  { %v2356_v11 = vpop.eup %2355 }
 0x62a   :  { %v1854_v48 = vmul.f32 %v2356_v11, %v1848_v54 }
 0x62c   :  { %v1855_v15 = vpack.c.bf16 %v1854_v48, %v1854_v48 }
 0x62e   :  { %2159 = vst [vmem:[%s3208_s4 + $0x1c] sm:$0xf] %v1855_v15 }
 0x62f   :  { %1864 = vsyncpa [#allocation5], 1 }
 0x630   :  { %1865 = vsyncpa [#allocation7], 1 }

</bundles_post_ra>
